<compile_context>
chip_gen: v6e
topology: v6e:2x2x1
jax: 0.10.0
libtpu: 0.0.40
codegen_flags: <defaults>
</compile_context>

<pallas_src>
import functools

import jax
import jax.numpy as jnp
import numpy as np
from jax import lax
from jax.experimental import pallas as pl
from jax.experimental.pallas import tpu as pltpu

LANE = 128      # TPU lane width: channels are zero-padded to a multiple of this.
SUBLANE = 8     # TPU sublane width: halo'd image width is rounded up to this.


def _round_up(x, m):
    return (x + m - 1) // m * m


def _pick_tile_h(h, target):
    """Largest divisor of h that is <= target (avoids the silent th=H cliff)."""
    target = max(1, min(int(target), h))
    for d in range(target, 0, -1):
        if h % d == 0:
            return d
    return 1


# ------------------------------- fused kernel --------------------------------

def fused_basic_block_kernel(xpad_ref, w1_ref, w2_ref, s1_ref, b1_ref, s2_ref,
                             b2_ref, out_ref, hbuf_ref, *, th, w_out, wb):
    """One (image, row-tile) step of BasicBlock (stride=1, no downsample).

    xpad_ref : (1, H+4, Wb+2, Cp) zero-padded input image (compute dtype),
               resident per image; original pixel (r, c) sits at (r+2, c+2).
    w1_ref   : (9, Cp, Cp) conv1 weights, tap-major (kh*3 + kw).
    w2_ref   : (9, Cp, Cp) conv2 weights.
    s*/b*    : (1, Cp) f32 folded BatchNorm scale / bias.
    out_ref  : (1, th, W, Cp) output tile.
    hbuf_ref : (th+2, Wb, Cp) VMEM scratch holding relu(bn1(conv1(x))) for the
               tile rows plus a 1-row / 1-col halo (col b <-> image col b-1);
               the out-of-image ring is zeroed so conv2 sees SAME padding.
    """
    hi = pl.program_id(1)
    nh = pl.num_programs(1)
    cp = xpad_ref.shape[-1]
    h0 = pl.multiple_of(hi * th, th)

    # ---- conv1 + bn1 + relu over the (th+2, Wb) halo window ------------------
    m1 = (th + 2) * wb
    acc1 = jnp.zeros((m1, cp), jnp.float32)
    for kh in range(3):
        for kw in range(3):
            lhs = xpad_ref[:, pl.ds(h0 + kh, th + 2), pl.ds(kw, wb), :]
            lhs = lhs.reshape(m1, cp)
            acc1 = acc1 + jnp.dot(lhs, w1_ref[kh * 3 + kw],
                                  preferred_element_type=jnp.float32)
    h1 = jnp.maximum(acc1 * s1_ref[...] + b1_ref[...], 0.0)
    h1 = h1.reshape(th + 2, wb, cp)

    # Zero only the out-of-image halo ring (cols -1 / >= W always; halo rows
    # only when the tile touches the top / bottom image edge).
    row = lax.broadcasted_iota(jnp.int32, (th + 2, wb, cp), 0)
    col = lax.broadcasted_iota(jnp.int32, (th + 2, wb, cp), 1)
    row_lo = jnp.where(hi == 0, 1, 0)
    row_hi = jnp.where(hi == nh - 1, th, th + 1)
    keep = (col >= 1) & (col <= w_out) & (row >= row_lo) & (row <= row_hi)
    hbuf_ref[...] = jnp.where(keep, h1, 0.0).astype(hbuf_ref.dtype)

    # ---- conv2 + bn2 + residual add + relu over the (th, W) tile -------------
    m2 = th * w_out
    acc2 = jnp.zeros((m2, cp), jnp.float32)
    for kh in range(3):
        for kw in range(3):
            lhs = hbuf_ref[pl.ds(kh, th), pl.ds(kw, w_out), :].reshape(m2, cp)
            acc2 = acc2 + jnp.dot(lhs, w2_ref[kh * 3 + kw],
                                  preferred_element_type=jnp.float32)
    res = xpad_ref[:, pl.ds(h0 + 2, th), pl.ds(2, w_out), :].reshape(m2, cp)
    y = acc2 * s2_ref[...] + b2_ref[...] + res.astype(jnp.float32)
    y = jnp.maximum(y, 0.0)
    out_ref[...] = y.reshape(1, th, w_out, cp).astype(out_ref.dtype)


# ------------------------------ pallas_call wrapper ---------------------------

def _fused_call(xpad, w1, w2, s1, b1, s2, b2, *, h, w, th, wb, out_dtype):
    n = xpad.shape[0]
    cp = xpad.shape[-1]
    nh = h // th
    bpe_c = xpad.dtype.itemsize
    bpe_o = jnp.dtype(out_dtype).itemsize
    m1, m2 = (th + 2) * wb, th * w

    flops = 2 * n * nh * 9 * (m1 + m2) * cp * cp
    bytes_accessed = (xpad.size * bpe_c
                      + (w1.size + w2.size) * w1.dtype.itemsize
                      + (s1.size + b1.size + s2.size + b2.size) * 4
                      + n * h * w * cp * bpe_o)
    # VMEM budget: resident input block + both weights (double-buffered),
    # output tile (double-buffered), halo scratch, f32 accumulators/temps.
    vmem_est = (2 * (h + 4) * (wb + 2) * cp * bpe_c
                + 2 * 2 * 9 * cp * cp * w1.dtype.itemsize
                + 2 * th * w * cp * bpe_o
                + (th + 2) * wb * cp * bpe_c
                + 4 * (m1 + m2) * cp * 4)
    vmem_limit = int(min(64 * 2**20, max(32 * 2**20, 2 * vmem_est)))

    return pl.pallas_call(
        functools.partial(fused_basic_block_kernel, th=th, w_out=w, wb=wb),
        out_shape=jax.ShapeDtypeStruct((n, h, w, cp), out_dtype),
        grid_spec=pltpu.PrefetchScalarGridSpec(
            num_scalar_prefetch=0,
            grid=(n, nh),
            in_specs=[
                # Full padded image per n, resident across its row tiles.
                pl.BlockSpec((1, h + 4, wb + 2, cp), lambda ni, hi: (ni, 0, 0, 0)),
                pl.BlockSpec((9, cp, cp), lambda ni, hi: (0, 0, 0)),
                pl.BlockSpec((9, cp, cp), lambda ni, hi: (0, 0, 0)),
                pl.BlockSpec((1, cp), lambda ni, hi: (0, 0)),
                pl.BlockSpec((1, cp), lambda ni, hi: (0, 0)),
                pl.BlockSpec((1, cp), lambda ni, hi: (0, 0)),
                pl.BlockSpec((1, cp), lambda ni, hi: (0, 0)),
            ],
            out_specs=pl.BlockSpec((1, th, w, cp), lambda ni, hi: (ni, hi, 0, 0)),
            scratch_shapes=[pltpu.VMEM((th + 2, wb, cp), xpad.dtype)],
        ),
        compiler_params=pltpu.CompilerParams(
            dimension_semantics=("parallel", "parallel"),
            vmem_limit_bytes=vmem_limit),
        cost_estimate=pl.CostEstimate(flops=flops, transcendentals=0,
                                      bytes_accessed=bytes_accessed),
    )(xpad, w1, w2, s1, b1, s2, b2)


# ------------------------------ JAX wrappers ----------------------------------

def fold_bn(gamma, beta, running_mean, running_var, eps=1e-5):
    scale = gamma / jnp.sqrt(running_var + eps)
    bias = beta - running_mean * scale
    return scale, bias


def _prep_weight(w_hwio, cp, dtype):
    """Zero-pad channels to the lane width; lay out as (9, Cp, Cp) tap-major."""
    kh, kw, cin, cout = w_hwio.shape
    wpad = jnp.pad(w_hwio, ((0, 0), (0, 0), (0, cp - cin), (0, cp - cout)))
    return wpad.reshape(kh * kw, cp, cp).astype(dtype)


def _prep_affine(v, cp):
    return jnp.pad(v, (0, cp - v.shape[0])).reshape(1, cp).astype(jnp.float32)


def basic_block_forward_nhwc(x_nhwc, params, *, tile_h=8,
                             compute_dtype=jnp.bfloat16):
    """BasicBlock forward (stride=1, downsample=None) on NHWC input."""
    n, h, w, c = x_nhwc.shape
    kh, kw, cin, planes = params["w1"].shape
    assert (kh, kw) == (3, 3) and cin == c and planes == c, (
        "stride=1 / downsample=None BasicBlock requires inplanes == planes")
    # TODO(synk): stride>1 / downsample (strided 1x1 conv) branch not implemented.

    cp = _round_up(c, LANE)                 # lane-dense channels
    th = _pick_tile_h(h, tile_h)            # rows per grid step (divisor of H)
    wb = _round_up(w + 2, SUBLANE)          # halo'd width, sublane-aligned

    # Single pad + single cast: channels -> Cp, 2-row halo, 2..(wb-w) col halo.
    xpad = jnp.pad(x_nhwc, ((0, 0), (2, 2), (2, wb - w), (0, cp - c)))
    xpad = xpad.astype(compute_dtype)

    w1 = _prep_weight(params["w1"], cp, compute_dtype)
    w2 = _prep_weight(params["w2"], cp, compute_dtype)
    s1 = _prep_affine(params["s1"], cp)
    b1 = _prep_affine(params["b1"], cp)
    s2 = _prep_affine(params["s2"], cp)
    b2 = _prep_affine(params["b2"], cp)

    out = _fused_call(xpad, w1, w2, s1, b1, s2, b2,
                      h=h, w=w, th=th, wb=wb, out_dtype=x_nhwc.dtype)
    return out[..., :c]                     # strip channel padding


def basic_block_forward(x_nchw, params, *, tile_h=8, compute_dtype=jnp.bfloat16):
    """BasicBlock forward on NCHW input (PyTorch layout)."""
    x = jnp.transpose(x_nchw, (0, 2, 3, 1))
    out = basic_block_forward_nhwc(x, params, tile_h=tile_h,
                                   compute_dtype=compute_dtype)
    return jnp.transpose(out, (0, 3, 1, 2))


# ------------------------------ reference -------------------------------------

def ref_forward(x_nchw, params):
    x = jnp.transpose(x_nchw, (0, 2, 3, 1))
    dn = ("NHWC", "HWIO", "NHWC")
    o = jax.lax.conv_general_dilated(x, params["w1"], (1, 1), "SAME",
                                     dimension_numbers=dn)
    o = jnp.maximum(o * params["s1"].reshape(1, 1, 1, -1)
                    + params["b1"].reshape(1, 1, 1, -1), 0.0)
    o = jax.lax.conv_general_dilated(o, params["w2"], (1, 1), "SAME",
                                     dimension_numbers=dn)
    o = o * params["s2"].reshape(1, 1, 1, -1) + params["b2"].reshape(1, 1, 1, -1) + x
    o = jnp.maximum(o, 0.0)
    return jnp.transpose(o, (0, 3, 1, 2))


# --------------------------------- main ----------------------------------------

if __name__ == "__main__":
    key = jax.random.PRNGKey(0)
    k_x, k_w1, k_w2, k_g1, k_b1, k_g2, k_b2 = jax.random.split(key, 7)

    N, C, H, W = 2, 8, 16, 16          # inplanes = planes = 8, stride = 1
    planes = C

    x = jax.random.normal(k_x, (N, C, H, W), jnp.float32)

    # Conv weights in HWIO layout (PyTorch stores OIHW: (planes, inplanes, 3, 3)).
    w1 = 0.1 * jax.random.normal(k_w1, (3, 3, C, planes), jnp.float32)
    w2 = 0.1 * jax.random.normal(k_w2, (3, 3, planes, planes), jnp.float32)

    # BatchNorm (inference mode): gamma/beta random, running stats = (0, 1).
    g1 = 1.0 + 0.1 * jax.random.normal(k_g1, (planes,), jnp.float32)
    be1 = 0.1 * jax.random.normal(k_b1, (planes,), jnp.float32)
    g2 = 1.0 + 0.1 * jax.random.normal(k_g2, (planes,), jnp.float32)
    be2 = 0.1 * jax.random.normal(k_b2, (planes,), jnp.float32)
    mean = jnp.zeros((planes,), jnp.float32)
    var = jnp.ones((planes,), jnp.float32)

    s1, b1 = fold_bn(g1, be1, mean, var)
    s2, b2 = fold_bn(g2, be2, mean, var)

    params = {"w1": w1, "s1": s1, "b1": b1, "w2": w2, "s2": s2, "b2": b2}

    ref = jax.block_until_ready(ref_forward(x, params))

    # Tight correctness check with f32 matmul operands.
    fwd_f32 = jax.jit(functools.partial(basic_block_forward,
                                        compute_dtype=jnp.float32))
    out_f32 = jax.block_until_ready(fwd_f32(x, params))
    assert out_f32.shape == (N, C, H, W)
    np.testing.assert_allclose(np.asarray(out_f32), np.asarray(ref),
                               rtol=1e-3, atol=1e-3)

    # Recommended production path: bf16 operands, f32 accumulation/epilogue
    # (looser tolerance per the bf16 rounding of operands and the residual).
    fwd_bf16 = jax.jit(functools.partial(basic_block_forward,
                                         compute_dtype=jnp.bfloat16))
    out_bf16 = jax.block_until_ready(fwd_bf16(x, params))
    np.testing.assert_allclose(np.asarray(out_bf16), np.asarray(ref),
                               rtol=1e-1, atol=1e-1)

    print("KERNEL_OK")
</pallas_src>

<mosaic_0001>
module attributes {stable_mosaic.version = 11 : i64} {
  func.func @fused_basic_block_kernel(%arg0: i32, %arg1: i32, %arg2: memref<1x20x26x128xf32, #tpu.memory_space<vmem>>, %arg3: memref<9x128x128xf32, #tpu.memory_space<vmem>>, %arg4: memref<9x128x128xf32, #tpu.memory_space<vmem>>, %arg5: memref<1x128xf32, #tpu.memory_space<vmem>>, %arg6: memref<1x128xf32, #tpu.memory_space<vmem>>, %arg7: memref<1x128xf32, #tpu.memory_space<vmem>>, %arg8: memref<1x128xf32, #tpu.memory_space<vmem>>, %arg9: memref<1x8x16x128xf32, #tpu.memory_space<vmem>>, %arg10: memref<10x24x128xf32, #tpu.memory_space<vmem>>) attributes {dimension_semantics = [#tpu.dimension_semantics<parallel>, #tpu.dimension_semantics<parallel>], iteration_bounds = array<i64: 2, 2>, scalar_prefetch = 0 : i64, scratch_operands = 1 : i64, tpu.core_type = #tpu.core_type<tc>, window_params = [{transform_indices = @transform_0, window_bounds = array<i64: 1, 20, 26, 128>}, {pipeline_mode = #tpu.pipeline_mode<synchronous>, transform_indices = @transform_1, window_bounds = array<i64: 9, 128, 128>}, {pipeline_mode = #tpu.pipeline_mode<synchronous>, transform_indices = @transform_2, window_bounds = array<i64: 9, 128, 128>}, {pipeline_mode = #tpu.pipeline_mode<synchronous>, transform_indices = @transform_3, window_bounds = array<i64: 1, 128>}, {pipeline_mode = #tpu.pipeline_mode<synchronous>, transform_indices = @transform_4, window_bounds = array<i64: 1, 128>}, {pipeline_mode = #tpu.pipeline_mode<synchronous>, transform_indices = @transform_5, window_bounds = array<i64: 1, 128>}, {pipeline_mode = #tpu.pipeline_mode<synchronous>, transform_indices = @transform_6, window_bounds = array<i64: 1, 128>}, {transform_indices = @transform_7, window_bounds = array<i64: 1, 8, 16, 128>}]} {
    %c8_i32 = arith.constant 8 : i32
    %0 = arith.muli %arg1, %c8_i32 : i32
    %1 = tpu.assume_multiple %0, 8 : i32
    %cst = arith.constant 0.000000e+00 : f32
    %2 = vector.broadcast %cst : f32 to vector<240x128xf32>
    %c0_i32 = arith.constant 0 : i32
    %3 = arith.addi %1, %c0_i32 : i32
    %c0 = arith.constant 0 : index
    %4 = arith.index_cast %3 : i32 to index
    %c0_0 = arith.constant 0 : index
    %c0_1 = arith.constant 0 : index
    %5 = vector.load %arg2[%c0, %4, %c0_0, %c0_1] : memref<1x20x26x128xf32, #tpu.memory_space<vmem>>, vector<1x10x24x128xf32>
    %6 = vector.shape_cast %5 : vector<1x10x24x128xf32> to vector<240x128xf32>
    %c0_2 = arith.constant 0 : index
    %c0_3 = arith.constant 0 : index
    %c0_4 = arith.constant 0 : index
    %7 = vector.load %arg3[%c0_2, %c0_3, %c0_4] : memref<9x128x128xf32, #tpu.memory_space<vmem>>, vector<1x128x128xf32>
    %8 = vector.shape_cast %7 : vector<1x128x128xf32> to vector<128x128xf32>
    %cst_5 = arith.constant dense<0.000000e+00> : vector<240x128xf32>
    %9 = tpu.matmul %6, %8, %cst_5 {dimension_numbers = #tpu.dot_dimension_numbers<[1], [0], [0], [1], [0, 0, 1, 1], [], []>} : vector<240x128xf32>, vector<128x128xf32>, vector<240x128xf32> -> vector<240x128xf32>
    %10 = arith.addf %2, %9 : vector<240x128xf32>
    %c0_i32_6 = arith.constant 0 : i32
    %11 = arith.addi %1, %c0_i32_6 : i32
    %c0_7 = arith.constant 0 : index
    %12 = arith.index_cast %11 : i32 to index
    %c1 = arith.constant 1 : index
    %c0_8 = arith.constant 0 : index
    %13 = vector.load %arg2[%c0_7, %12, %c1, %c0_8] : memref<1x20x26x128xf32, #tpu.memory_space<vmem>>, vector<1x10x24x128xf32>
    %14 = vector.shape_cast %13 : vector<1x10x24x128xf32> to vector<240x128xf32>
    %c1_9 = arith.constant 1 : index
    %c0_10 = arith.constant 0 : index
    %c0_11 = arith.constant 0 : index
    %15 = vector.load %arg3[%c1_9, %c0_10, %c0_11] : memref<9x128x128xf32, #tpu.memory_space<vmem>>, vector<1x128x128xf32>
    %16 = vector.shape_cast %15 : vector<1x128x128xf32> to vector<128x128xf32>
    %cst_12 = arith.constant dense<0.000000e+00> : vector<240x128xf32>
    %17 = tpu.matmul %14, %16, %cst_12 {dimension_numbers = #tpu.dot_dimension_numbers<[1], [0], [0], [1], [0, 0, 1, 1], [], []>} : vector<240x128xf32>, vector<128x128xf32>, vector<240x128xf32> -> vector<240x128xf32>
    %18 = arith.addf %10, %17 : vector<240x128xf32>
    %c0_i32_13 = arith.constant 0 : i32
    %19 = arith.addi %1, %c0_i32_13 : i32
    %c0_14 = arith.constant 0 : index
    %20 = arith.index_cast %19 : i32 to index
    %c2 = arith.constant 2 : index
    %c0_15 = arith.constant 0 : index
    %21 = vector.load %arg2[%c0_14, %20, %c2, %c0_15] : memref<1x20x26x128xf32, #tpu.memory_space<vmem>>, vector<1x10x24x128xf32>
    %22 = vector.shape_cast %21 : vector<1x10x24x128xf32> to vector<240x128xf32>
    %c2_16 = arith.constant 2 : index
    %c0_17 = arith.constant 0 : index
    %c0_18 = arith.constant 0 : index
    %23 = vector.load %arg3[%c2_16, %c0_17, %c0_18] : memref<9x128x128xf32, #tpu.memory_space<vmem>>, vector<1x128x128xf32>
    %24 = vector.shape_cast %23 : vector<1x128x128xf32> to vector<128x128xf32>
    %cst_19 = arith.constant dense<0.000000e+00> : vector<240x128xf32>
    %25 = tpu.matmul %22, %24, %cst_19 {dimension_numbers = #tpu.dot_dimension_numbers<[1], [0], [0], [1], [0, 0, 1, 1], [], []>} : vector<240x128xf32>, vector<128x128xf32>, vector<240x128xf32> -> vector<240x128xf32>
    %26 = arith.addf %18, %25 : vector<240x128xf32>
    %c1_i32 = arith.constant 1 : i32
    %27 = arith.addi %1, %c1_i32 : i32
    %c0_20 = arith.constant 0 : index
    %28 = arith.index_cast %27 : i32 to index
    %c0_21 = arith.constant 0 : index
    %c0_22 = arith.constant 0 : index
    %29 = vector.load %arg2[%c0_20, %28, %c0_21, %c0_22] : memref<1x20x26x128xf32, #tpu.memory_space<vmem>>, vector<1x10x24x128xf32>
    %30 = vector.shape_cast %29 : vector<1x10x24x128xf32> to vector<240x128xf32>
    %c3 = arith.constant 3 : index
    %c0_23 = arith.constant 0 : index
    %c0_24 = arith.constant 0 : index
    %31 = vector.load %arg3[%c3, %c0_23, %c0_24] : memref<9x128x128xf32, #tpu.memory_space<vmem>>, vector<1x128x128xf32>
    %32 = vector.shape_cast %31 : vector<1x128x128xf32> to vector<128x128xf32>
    %cst_25 = arith.constant dense<0.000000e+00> : vector<240x128xf32>
    %33 = tpu.matmul %30, %32, %cst_25 {dimension_numbers = #tpu.dot_dimension_numbers<[1], [0], [0], [1], [0, 0, 1, 1], [], []>} : vector<240x128xf32>, vector<128x128xf32>, vector<240x128xf32> -> vector<240x128xf32>
    %34 = arith.addf %26, %33 : vector<240x128xf32>
    %c1_i32_26 = arith.constant 1 : i32
    %35 = arith.addi %1, %c1_i32_26 : i32
    %c0_27 = arith.constant 0 : index
    %36 = arith.index_cast %35 : i32 to index
    %c1_28 = arith.constant 1 : index
    %c0_29 = arith.constant 0 : index
    %37 = vector.load %arg2[%c0_27, %36, %c1_28, %c0_29] : memref<1x20x26x128xf32, #tpu.memory_space<vmem>>, vector<1x10x24x128xf32>
    %38 = vector.shape_cast %37 : vector<1x10x24x128xf32> to vector<240x128xf32>
    %c4 = arith.constant 4 : index
    %c0_30 = arith.constant 0 : index
    %c0_31 = arith.constant 0 : index
    %39 = vector.load %arg3[%c4, %c0_30, %c0_31] : memref<9x128x128xf32, #tpu.memory_space<vmem>>, vector<1x128x128xf32>
    %40 = vector.shape_cast %39 : vector<1x128x128xf32> to vector<128x128xf32>
    %cst_32 = arith.constant dense<0.000000e+00> : vector<240x128xf32>
    %41 = tpu.matmul %38, %40, %cst_32 {dimension_numbers = #tpu.dot_dimension_numbers<[1], [0], [0], [1], [0, 0, 1, 1], [], []>} : vector<240x128xf32>, vector<128x128xf32>, vector<240x128xf32> -> vector<240x128xf32>
    %42 = arith.addf %34, %41 : vector<240x128xf32>
    %c1_i32_33 = arith.constant 1 : i32
    %43 = arith.addi %1, %c1_i32_33 : i32
    %c0_34 = arith.constant 0 : index
    %44 = arith.index_cast %43 : i32 to index
    %c2_35 = arith.constant 2 : index
    %c0_36 = arith.constant 0 : index
    %45 = vector.load %arg2[%c0_34, %44, %c2_35, %c0_36] : memref<1x20x26x128xf32, #tpu.memory_space<vmem>>, vector<1x10x24x128xf32>
    %46 = vector.shape_cast %45 : vector<1x10x24x128xf32> to vector<240x128xf32>
    %c5 = arith.constant 5 : index
    %c0_37 = arith.constant 0 : index
    %c0_38 = arith.constant 0 : index
    %47 = vector.load %arg3[%c5, %c0_37, %c0_38] : memref<9x128x128xf32, #tpu.memory_space<vmem>>, vector<1x128x128xf32>
    %48 = vector.shape_cast %47 : vector<1x128x128xf32> to vector<128x128xf32>
    %cst_39 = arith.constant dense<0.000000e+00> : vector<240x128xf32>
    %49 = tpu.matmul %46, %48, %cst_39 {dimension_numbers = #tpu.dot_dimension_numbers<[1], [0], [0], [1], [0, 0, 1, 1], [], []>} : vector<240x128xf32>, vector<128x128xf32>, vector<240x128xf32> -> vector<240x128xf32>
    %50 = arith.addf %42, %49 : vector<240x128xf32>
    %c2_i32 = arith.constant 2 : i32
    %51 = arith.addi %1, %c2_i32 : i32
    %c0_40 = arith.constant 0 : index
    %52 = arith.index_cast %51 : i32 to index
    %c0_41 = arith.constant 0 : index
    %c0_42 = arith.constant 0 : index
    %53 = vector.load %arg2[%c0_40, %52, %c0_41, %c0_42] : memref<1x20x26x128xf32, #tpu.memory_space<vmem>>, vector<1x10x24x128xf32>
    %54 = vector.shape_cast %53 : vector<1x10x24x128xf32> to vector<240x128xf32>
    %c6 = arith.constant 6 : index
    %c0_43 = arith.constant 0 : index
    %c0_44 = arith.constant 0 : index
    %55 = vector.load %arg3[%c6, %c0_43, %c0_44] : memref<9x128x128xf32, #tpu.memory_space<vmem>>, vector<1x128x128xf32>
    %56 = vector.shape_cast %55 : vector<1x128x128xf32> to vector<128x128xf32>
    %cst_45 = arith.constant dense<0.000000e+00> : vector<240x128xf32>
    %57 = tpu.matmul %54, %56, %cst_45 {dimension_numbers = #tpu.dot_dimension_numbers<[1], [0], [0], [1], [0, 0, 1, 1], [], []>} : vector<240x128xf32>, vector<128x128xf32>, vector<240x128xf32> -> vector<240x128xf32>
    %58 = arith.addf %50, %57 : vector<240x128xf32>
    %c2_i32_46 = arith.constant 2 : i32
    %59 = arith.addi %1, %c2_i32_46 : i32
    %c0_47 = arith.constant 0 : index
    %60 = arith.index_cast %59 : i32 to index
    %c1_48 = arith.constant 1 : index
    %c0_49 = arith.constant 0 : index
    %61 = vector.load %arg2[%c0_47, %60, %c1_48, %c0_49] : memref<1x20x26x128xf32, #tpu.memory_space<vmem>>, vector<1x10x24x128xf32>
    %62 = vector.shape_cast %61 : vector<1x10x24x128xf32> to vector<240x128xf32>
    %c7 = arith.constant 7 : index
    %c0_50 = arith.constant 0 : index
    %c0_51 = arith.constant 0 : index
    %63 = vector.load %arg3[%c7, %c0_50, %c0_51] : memref<9x128x128xf32, #tpu.memory_space<vmem>>, vector<1x128x128xf32>
    %64 = vector.shape_cast %63 : vector<1x128x128xf32> to vector<128x128xf32>
    %cst_52 = arith.constant dense<0.000000e+00> : vector<240x128xf32>
    %65 = tpu.matmul %62, %64, %cst_52 {dimension_numbers = #tpu.dot_dimension_numbers<[1], [0], [0], [1], [0, 0, 1, 1], [], []>} : vector<240x128xf32>, vector<128x128xf32>, vector<240x128xf32> -> vector<240x128xf32>
    %66 = arith.addf %58, %65 : vector<240x128xf32>
    %c2_i32_53 = arith.constant 2 : i32
    %67 = arith.addi %1, %c2_i32_53 : i32
    %c0_54 = arith.constant 0 : index
    %68 = arith.index_cast %67 : i32 to index
    %c2_55 = arith.constant 2 : index
    %c0_56 = arith.constant 0 : index
    %69 = vector.load %arg2[%c0_54, %68, %c2_55, %c0_56] : memref<1x20x26x128xf32, #tpu.memory_space<vmem>>, vector<1x10x24x128xf32>
    %70 = vector.shape_cast %69 : vector<1x10x24x128xf32> to vector<240x128xf32>
    %c8 = arith.constant 8 : index
    %c0_57 = arith.constant 0 : index
    %c0_58 = arith.constant 0 : index
    %71 = vector.load %arg3[%c8, %c0_57, %c0_58] : memref<9x128x128xf32, #tpu.memory_space<vmem>>, vector<1x128x128xf32>
    %72 = vector.shape_cast %71 : vector<1x128x128xf32> to vector<128x128xf32>
    %cst_59 = arith.constant dense<0.000000e+00> : vector<240x128xf32>
    %73 = tpu.matmul %70, %72, %cst_59 {dimension_numbers = #tpu.dot_dimension_numbers<[1], [0], [0], [1], [0, 0, 1, 1], [], []>} : vector<240x128xf32>, vector<128x128xf32>, vector<240x128xf32> -> vector<240x128xf32>
    %74 = arith.addf %66, %73 : vector<240x128xf32>
    %c0_60 = arith.constant 0 : index
    %c0_61 = arith.constant 0 : index
    %75 = vector.load %arg5[%c0_60, %c0_61] : memref<1x128xf32, #tpu.memory_space<vmem>>, vector<1x128xf32>
    %76 = vector.broadcast %75 : vector<1x128xf32> to vector<240x128xf32>
    %77 = arith.mulf %74, %76 : vector<240x128xf32>
    %c0_62 = arith.constant 0 : index
    %c0_63 = arith.constant 0 : index
    %78 = vector.load %arg6[%c0_62, %c0_63] : memref<1x128xf32, #tpu.memory_space<vmem>>, vector<1x128xf32>
    %79 = vector.broadcast %78 : vector<1x128xf32> to vector<240x128xf32>
    %80 = arith.addf %77, %79 : vector<240x128xf32>
    %cst_64 = arith.constant 0.000000e+00 : f32
    %81 = vector.broadcast %cst_64 : f32 to vector<240x128xf32>
    %82 = arith.maximumf %80, %81 : vector<240x128xf32>
    %83 = vector.shape_cast %82 : vector<240x128xf32> to vector<10x24x128xf32>
    %84 = tpu.iota {dimensions = array<i32: 0>} : vector<10x24x128xi32>
    %85 = tpu.iota {dimensions = array<i32: 1>} : vector<10x24x128xi32>
    %c0_i32_65 = arith.constant 0 : i32
    %86 = arith.cmpi eq, %arg1, %c0_i32_65 : i32
    %c1_i32_66 = arith.constant 1 : i32
    %c0_i32_67 = arith.constant 0 : i32
    %87 = arith.select %86, %c1_i32_66, %c0_i32_67 : i32
    %c1_i32_68 = arith.constant 1 : i32
    %88 = arith.cmpi eq, %arg1, %c1_i32_68 : i32
    %c8_i32_69 = arith.constant 8 : i32
    %c9_i32 = arith.constant 9 : i32
    %89 = arith.select %88, %c8_i32_69, %c9_i32 : i32
    %c1_i32_70 = arith.constant 1 : i32
    %90 = vector.broadcast %c1_i32_70 : i32 to vector<10x24x128xi32>
    %91 = arith.cmpi sge, %85, %90 : vector<10x24x128xi32>
    %c16_i32 = arith.constant 16 : i32
    %92 = vector.broadcast %c16_i32 : i32 to vector<10x24x128xi32>
    %93 = arith.cmpi sle, %85, %92 : vector<10x24x128xi32>
    %94 = arith.andi %91, %93 : vector<10x24x128xi1>
    %95 = vector.broadcast %87 : i32 to vector<10x24x128xi32>
    %96 = arith.cmpi sge, %84, %95 : vector<10x24x128xi32>
    %97 = arith.andi %94, %96 : vector<10x24x128xi1>
    %98 = vector.broadcast %89 : i32 to vector<10x24x128xi32>
    %99 = arith.cmpi sle, %84, %98 : vector<10x24x128xi32>
    %100 = arith.andi %97, %99 : vector<10x24x128xi1>
    %cst_71 = arith.constant 0.000000e+00 : f32
    %101 = vector.broadcast %cst_71 : f32 to vector<10x24x128xf32>
    %102 = arith.select %100, %83, %101 : vector<10x24x128xi1>, vector<10x24x128xf32>
    %c0_72 = arith.constant 0 : index
    %c0_73 = arith.constant 0 : index
    %c0_74 = arith.constant 0 : index
    %103 = vector.load %arg10[%c0_72, %c0_73, %c0_74] : memref<10x24x128xf32, #tpu.memory_space<vmem>>, vector<10x24x128xf32>
    tpu.vector_store %arg10[%c0_72, %c0_73, %c0_74], %102 {strides = array<i32>} : memref<10x24x128xf32, #tpu.memory_space<vmem>>, vector<10x24x128xf32>,
    %cst_75 = arith.constant 0.000000e+00 : f32
    %104 = vector.broadcast %cst_75 : f32 to vector<128x128xf32>
    %c0_76 = arith.constant 0 : index
    %c0_77 = arith.constant 0 : index
    %c0_78 = arith.constant 0 : index
    %105 = vector.load %arg10[%c0_76, %c0_77, %c0_78] : memref<10x24x128xf32, #tpu.memory_space<vmem>>, vector<8x16x128xf32>
    %106 = vector.shape_cast %105 : vector<8x16x128xf32> to vector<128x128xf32>
    %c0_79 = arith.constant 0 : index
    %c0_80 = arith.constant 0 : index
    %c0_81 = arith.constant 0 : index
    %107 = vector.load %arg4[%c0_79, %c0_80, %c0_81] : memref<9x128x128xf32, #tpu.memory_space<vmem>>, vector<1x128x128xf32>
    %108 = vector.shape_cast %107 : vector<1x128x128xf32> to vector<128x128xf32>
    %cst_82 = arith.constant dense<0.000000e+00> : vector<128x128xf32>
    %109 = tpu.matmul %106, %108, %cst_82 {dimension_numbers = #tpu.dot_dimension_numbers<[1], [0], [0], [1], [0, 0, 1, 1], [], []>} : vector<128x128xf32>, vector<128x128xf32>, vector<128x128xf32> -> vector<128x128xf32>
    %110 = arith.addf %104, %109 : vector<128x128xf32>
    %c0_83 = arith.constant 0 : index
    %c1_84 = arith.constant 1 : index
    %c0_85 = arith.constant 0 : index
    %111 = vector.load %arg10[%c0_83, %c1_84, %c0_85] : memref<10x24x128xf32, #tpu.memory_space<vmem>>, vector<8x16x128xf32>
    %112 = vector.shape_cast %111 : vector<8x16x128xf32> to vector<128x128xf32>
    %c1_86 = arith.constant 1 : index
    %c0_87 = arith.constant 0 : index
    %c0_88 = arith.constant 0 : index
    %113 = vector.load %arg4[%c1_86, %c0_87, %c0_88] : memref<9x128x128xf32, #tpu.memory_space<vmem>>, vector<1x128x128xf32>
    %114 = vector.shape_cast %113 : vector<1x128x128xf32> to vector<128x128xf32>
    %cst_89 = arith.constant dense<0.000000e+00> : vector<128x128xf32>
    %115 = tpu.matmul %112, %114, %cst_89 {dimension_numbers = #tpu.dot_dimension_numbers<[1], [0], [0], [1], [0, 0, 1, 1], [], []>} : vector<128x128xf32>, vector<128x128xf32>, vector<128x128xf32> -> vector<128x128xf32>
    %116 = arith.addf %110, %115 : vector<128x128xf32>
    %c0_90 = arith.constant 0 : index
    %c2_91 = arith.constant 2 : index
    %c0_92 = arith.constant 0 : index
    %117 = vector.load %arg10[%c0_90, %c2_91, %c0_92] : memref<10x24x128xf32, #tpu.memory_space<vmem>>, vector<8x16x128xf32>
    %118 = vector.shape_cast %117 : vector<8x16x128xf32> to vector<128x128xf32>
    %c2_93 = arith.constant 2 : index
    %c0_94 = arith.constant 0 : index
    %c0_95 = arith.constant 0 : index
    %119 = vector.load %arg4[%c2_93, %c0_94, %c0_95] : memref<9x128x128xf32, #tpu.memory_space<vmem>>, vector<1x128x128xf32>
    %120 = vector.shape_cast %119 : vector<1x128x128xf32> to vector<128x128xf32>
    %cst_96 = arith.constant dense<0.000000e+00> : vector<128x128xf32>
    %121 = tpu.matmul %118, %120, %cst_96 {dimension_numbers = #tpu.dot_dimension_numbers<[1], [0], [0], [1], [0, 0, 1, 1], [], []>} : vector<128x128xf32>, vector<128x128xf32>, vector<128x128xf32> -> vector<128x128xf32>
    %122 = arith.addf %116, %121 : vector<128x128xf32>
    %c1_97 = arith.constant 1 : index
    %c0_98 = arith.constant 0 : index
    %c0_99 = arith.constant 0 : index
    %123 = vector.load %arg10[%c1_97, %c0_98, %c0_99] : memref<10x24x128xf32, #tpu.memory_space<vmem>>, vector<8x16x128xf32>
    %124 = vector.shape_cast %123 : vector<8x16x128xf32> to vector<128x128xf32>
    %c3_100 = arith.constant 3 : index
    %c0_101 = arith.constant 0 : index
    %c0_102 = arith.constant 0 : index
    %125 = vector.load %arg4[%c3_100, %c0_101, %c0_102] : memref<9x128x128xf32, #tpu.memory_space<vmem>>, vector<1x128x128xf32>
    %126 = vector.shape_cast %125 : vector<1x128x128xf32> to vector<128x128xf32>
    %cst_103 = arith.constant dense<0.000000e+00> : vector<128x128xf32>
    %127 = tpu.matmul %124, %126, %cst_103 {dimension_numbers = #tpu.dot_dimension_numbers<[1], [0], [0], [1], [0, 0, 1, 1], [], []>} : vector<128x128xf32>, vector<128x128xf32>, vector<128x128xf32> -> vector<128x128xf32>
    %128 = arith.addf %122, %127 : vector<128x128xf32>
    %c1_104 = arith.constant 1 : index
    %c1_105 = arith.constant 1 : index
    %c0_106 = arith.constant 0 : index
    %129 = vector.load %arg10[%c1_104, %c1_105, %c0_106] : memref<10x24x128xf32, #tpu.memory_space<vmem>>, vector<8x16x128xf32>
    %130 = vector.shape_cast %129 : vector<8x16x128xf32> to vector<128x128xf32>
    %c4_107 = arith.constant 4 : index
    %c0_108 = arith.constant 0 : index
    %c0_109 = arith.constant 0 : index
    %131 = vector.load %arg4[%c4_107, %c0_108, %c0_109] : memref<9x128x128xf32, #tpu.memory_space<vmem>>, vector<1x128x128xf32>
    %132 = vector.shape_cast %131 : vector<1x128x128xf32> to vector<128x128xf32>
    %cst_110 = arith.constant dense<0.000000e+00> : vector<128x128xf32>
    %133 = tpu.matmul %130, %132, %cst_110 {dimension_numbers = #tpu.dot_dimension_numbers<[1], [0], [0], [1], [0, 0, 1, 1], [], []>} : vector<128x128xf32>, vector<128x128xf32>, vector<128x128xf32> -> vector<128x128xf32>
    %134 = arith.addf %128, %133 : vector<128x128xf32>
    %c1_111 = arith.constant 1 : index
    %c2_112 = arith.constant 2 : index
    %c0_113 = arith.constant 0 : index
    %135 = vector.load %arg10[%c1_111, %c2_112, %c0_113] : memref<10x24x128xf32, #tpu.memory_space<vmem>>, vector<8x16x128xf32>
    %136 = vector.shape_cast %135 : vector<8x16x128xf32> to vector<128x128xf32>
    %c5_114 = arith.constant 5 : index
    %c0_115 = arith.constant 0 : index
    %c0_116 = arith.constant 0 : index
    %137 = vector.load %arg4[%c5_114, %c0_115, %c0_116] : memref<9x128x128xf32, #tpu.memory_space<vmem>>, vector<1x128x128xf32>
    %138 = vector.shape_cast %137 : vector<1x128x128xf32> to vector<128x128xf32>
    %cst_117 = arith.constant dense<0.000000e+00> : vector<128x128xf32>
    %139 = tpu.matmul %136, %138, %cst_117 {dimension_numbers = #tpu.dot_dimension_numbers<[1], [0], [0], [1], [0, 0, 1, 1], [], []>} : vector<128x128xf32>, vector<128x128xf32>, vector<128x128xf32> -> vector<128x128xf32>
    %140 = arith.addf %134, %139 : vector<128x128xf32>
    %c2_118 = arith.constant 2 : index
    %c0_119 = arith.constant 0 : index
    %c0_120 = arith.constant 0 : index
    %141 = vector.load %arg10[%c2_118, %c0_119, %c0_120] : memref<10x24x128xf32, #tpu.memory_space<vmem>>, vector<8x16x128xf32>
    %142 = vector.shape_cast %141 : vector<8x16x128xf32> to vector<128x128xf32>
    %c6_121 = arith.constant 6 : index
    %c0_122 = arith.constant 0 : index
    %c0_123 = arith.constant 0 : index
    %143 = vector.load %arg4[%c6_121, %c0_122, %c0_123] : memref<9x128x128xf32, #tpu.memory_space<vmem>>, vector<1x128x128xf32>
    %144 = vector.shape_cast %143 : vector<1x128x128xf32> to vector<128x128xf32>
    %cst_124 = arith.constant dense<0.000000e+00> : vector<128x128xf32>
    %145 = tpu.matmul %142, %144, %cst_124 {dimension_numbers = #tpu.dot_dimension_numbers<[1], [0], [0], [1], [0, 0, 1, 1], [], []>} : vector<128x128xf32>, vector<128x128xf32>, vector<128x128xf32> -> vector<128x128xf32>
    %146 = arith.addf %140, %145 : vector<128x128xf32>
    %c2_125 = arith.constant 2 : index
    %c1_126 = arith.constant 1 : index
    %c0_127 = arith.constant 0 : index
    %147 = vector.load %arg10[%c2_125, %c1_126, %c0_127] : memref<10x24x128xf32, #tpu.memory_space<vmem>>, vector<8x16x128xf32>
    %148 = vector.shape_cast %147 : vector<8x16x128xf32> to vector<128x128xf32>
    %c7_128 = arith.constant 7 : index
    %c0_129 = arith.constant 0 : index
    %c0_130 = arith.constant 0 : index
    %149 = vector.load %arg4[%c7_128, %c0_129, %c0_130] : memref<9x128x128xf32, #tpu.memory_space<vmem>>, vector<1x128x128xf32>
    %150 = vector.shape_cast %149 : vector<1x128x128xf32> to vector<128x128xf32>
    %cst_131 = arith.constant dense<0.000000e+00> : vector<128x128xf32>
    %151 = tpu.matmul %148, %150, %cst_131 {dimension_numbers = #tpu.dot_dimension_numbers<[1], [0], [0], [1], [0, 0, 1, 1], [], []>} : vector<128x128xf32>, vector<128x128xf32>, vector<128x128xf32> -> vector<128x128xf32>
    %152 = arith.addf %146, %151 : vector<128x128xf32>
    %c2_132 = arith.constant 2 : index
    %c2_133 = arith.constant 2 : index
    %c0_134 = arith.constant 0 : index
    %153 = vector.load %arg10[%c2_132, %c2_133, %c0_134] : memref<10x24x128xf32, #tpu.memory_space<vmem>>, vector<8x16x128xf32>
    %154 = vector.shape_cast %153 : vector<8x16x128xf32> to vector<128x128xf32>
    %c8_135 = arith.constant 8 : index
    %c0_136 = arith.constant 0 : index
    %c0_137 = arith.constant 0 : index
    %155 = vector.load %arg4[%c8_135, %c0_136, %c0_137] : memref<9x128x128xf32, #tpu.memory_space<vmem>>, vector<1x128x128xf32>
    %156 = vector.shape_cast %155 : vector<1x128x128xf32> to vector<128x128xf32>
    %cst_138 = arith.constant dense<0.000000e+00> : vector<128x128xf32>
    %157 = tpu.matmul %154, %156, %cst_138 {dimension_numbers = #tpu.dot_dimension_numbers<[1], [0], [0], [1], [0, 0, 1, 1], [], []>} : vector<128x128xf32>, vector<128x128xf32>, vector<128x128xf32> -> vector<128x128xf32>
    %158 = arith.addf %152, %157 : vector<128x128xf32>
    %c2_i32_139 = arith.constant 2 : i32
    %159 = arith.addi %1, %c2_i32_139 : i32
    %c0_140 = arith.constant 0 : index
    %160 = arith.index_cast %159 : i32 to index
    %c2_141 = arith.constant 2 : index
    %c0_142 = arith.constant 0 : index
    %161 = vector.load %arg2[%c0_140, %160, %c2_141, %c0_142] : memref<1x20x26x128xf32, #tpu.memory_space<vmem>>, vector<1x8x16x128xf32>
    %162 = vector.shape_cast %161 : vector<1x8x16x128xf32> to vector<128x128xf32>
    %c0_143 = arith.constant 0 : index
    %c0_144 = arith.constant 0 : index
    %163 = vector.load %arg7[%c0_143, %c0_144] : memref<1x128xf32, #tpu.memory_space<vmem>>, vector<1x128xf32>
    %164 = vector.broadcast %163 : vector<1x128xf32> to vector<128x128xf32>
    %165 = arith.mulf %158, %164 : vector<128x128xf32>
    %c0_145 = arith.constant 0 : index
    %c0_146 = arith.constant 0 : index
    %166 = vector.load %arg8[%c0_145, %c0_146] : memref<1x128xf32, #tpu.memory_space<vmem>>, vector<1x128xf32>
    %167 = vector.broadcast %166 : vector<1x128xf32> to vector<128x128xf32>
    %168 = arith.addf %165, %167 : vector<128x128xf32>
    %169 = arith.addf %168, %162 : vector<128x128xf32>
    %cst_147 = arith.constant 0.000000e+00 : f32
    %170 = vector.broadcast %cst_147 : f32 to vector<128x128xf32>
    %171 = arith.maximumf %169, %170 : vector<128x128xf32>
    %172 = vector.shape_cast %171 : vector<128x128xf32> to vector<1x8x16x128xf32>
    %c0_148 = arith.constant 0 : index
    %c0_149 = arith.constant 0 : index
    %c0_150 = arith.constant 0 : index
    %c0_151 = arith.constant 0 : index
    %173 = vector.load %arg9[%c0_148, %c0_149, %c0_150, %c0_151] : memref<1x8x16x128xf32, #tpu.memory_space<vmem>>, vector<1x8x16x128xf32>
    tpu.vector_store %arg9[%c0_148, %c0_149, %c0_150, %c0_151], %172 {strides = array<i32>} : memref<1x8x16x128xf32, #tpu.memory_space<vmem>>, vector<1x8x16x128xf32>,
    return
  }
  func.func @transform_0(%arg0: i32, %arg1: i32) -> (i32, i32, i32, i32) {
    %c0_i32 = arith.constant 0 : i32
    %c0_i32_0 = arith.constant 0 : i32
    %c0_i32_1 = arith.constant 0 : i32
    %c0_i32_2 = arith.constant 0 : i32
    return %arg0, %c0_i32, %c0_i32_0, %c0_i32_1 : i32, i32, i32, i32
  }
  func.func @transform_1(%arg0: i32, %arg1: i32) -> (i32, i32, i32) {
    %c0_i32 = arith.constant 0 : i32
    %c0_i32_0 = arith.constant 0 : i32
    %c0_i32_1 = arith.constant 0 : i32
    %c0_i32_2 = arith.constant 0 : i32
    return %c0_i32, %c0_i32_0, %c0_i32_1 : i32, i32, i32
  }
  func.func @transform_2(%arg0: i32, %arg1: i32) -> (i32, i32, i32) {
    %c0_i32 = arith.constant 0 : i32
    %c0_i32_0 = arith.constant 0 : i32
    %c0_i32_1 = arith.constant 0 : i32
    %c0_i32_2 = arith.constant 0 : i32
    return %c0_i32, %c0_i32_0, %c0_i32_1 : i32, i32, i32
  }
  func.func @transform_3(%arg0: i32, %arg1: i32) -> (i32, i32) {
    %c0_i32 = arith.constant 0 : i32
    %c0_i32_0 = arith.constant 0 : i32
    %c0_i32_1 = arith.constant 0 : i32
    return %c0_i32, %c0_i32_0 : i32, i32
  }
  func.func @transform_4(%arg0: i32, %arg1: i32) -> (i32, i32) {
    %c0_i32 = arith.constant 0 : i32
    %c0_i32_0 = arith.constant 0 : i32
    %c0_i32_1 = arith.constant 0 : i32
    return %c0_i32, %c0_i32_0 : i32, i32
  }
  func.func @transform_5(%arg0: i32, %arg1: i32) -> (i32, i32) {
    %c0_i32 = arith.constant 0 : i32
    %c0_i32_0 = arith.constant 0 : i32
    %c0_i32_1 = arith.constant 0 : i32
    return %c0_i32, %c0_i32_0 : i32, i32
  }
  func.func @transform_6(%arg0: i32, %arg1: i32) -> (i32, i32) {
    %c0_i32 = arith.constant 0 : i32
    %c0_i32_0 = arith.constant 0 : i32
    %c0_i32_1 = arith.constant 0 : i32
    return %c0_i32, %c0_i32_0 : i32, i32
  }
  func.func @transform_7(%arg0: i32, %arg1: i32) -> (i32, i32, i32, i32) {
    %c0_i32 = arith.constant 0 : i32
    %c0_i32_0 = arith.constant 0 : i32
    %c0_i32_1 = arith.constant 0 : i32
    return %arg0, %arg1, %c0_i32, %c0_i32_0 : i32, i32, i32, i32
  }
}

</mosaic_0001>

<bundles_post_ra>
// kernel: basic_block_forward.1
= control target key start
LH: loop header
LB: loop body
LE: loop exit
PB: predicated region body
PF: predicated region fallthrough
CT: control target
= control target key end

     0   :  { %s7631_s24 = smov 0   ;;  %s7633_s25 = smov 0   ;;  %s11038_s0 = inlined_call_operand.vmem [shape: f32[2,20,26,128], index: 0, kind: input, shape index: {}]   ;;  %s11039_s1 = inlined_call_operand.vmem [shape: f32[9,128,128], index: 1, kind: input, shape index: {}]   ;;  %s11040_s2 = inlined_call_operand.vmem [shape: f32[9,128,128], index: 2, kind: input, shape index: {}]   ;;  %s11041_s3 = inlined_call_operand.vmem [shape: f32[1,128], index: 3, kind: input, shape index: {}]   ;;  %s11042_s4 = inlined_call_operand.vmem [shape: f32[1,128], index: 4, kind: input, shape index: {}]   ;;  %s11043_s5 = inlined_call_operand.vmem [shape: f32[1,128], index: 5, kind: input, shape index: {}]   ;;  %s11044_s6 = inlined_call_operand.vmem [shape: f32[1,128], index: 6, kind: input, shape index: {}]   ;;  %s11045_s7 = inlined_call_operand.vmem [shape: f32[2,16,16,128], index: 7, kind: output, shape index: {}]  }
   0x1   :  { %s7635_s26 = smov 0   ;;  %s7637_s27 = smov 0  }
   0x2   :  { %s7639_s28 = smov 0  }
   0x3 LB: > { %s26_s29 = sadd.s32 1, %s7581_s26  ;;  %s29_s30 = sadd.s32 1, %s7585_s27  ;;  %s7589_s28 = sphi %s7639_s28, %s17_s28   ;;  %s7585_s27 = sphi %s7637_s27, %s11475_s27   ;;  %s7581_s26 = sphi %s7635_s26, %s11474_s26   ;;  %s7577_s25 = sphi %s7633_s25, %s11473_s25   ;;  %s7573_s24 = sphi %s7631_s24, %s11472_s24  }
   0x4   : > { %p27_p0 = scmp.ge.s32.totalorder %s26_s29, 2  ;;  %p5072_p1 = scmp.ge.s32.totalorder %s7589_s28, 1 }
   0x5   : > { %p251_p2 = scmp.lt.s32.totalorder %s7589_s28, 5 }
   0x6   : > { %s11477_s29 = smov (%p27_p0, %s26_s29), 0  ;;  %s11479_s30 = smov (!%p27_p0, %s29_s30), %s7585_s27 }
   0x7   : > { %p252_p3 = pnand %p5072_p1, %p251_p2  ;;  %p31_p4 = scmp.ge.s32.totalorder %s11479_s30, 2 }
   0x9   : > { %s11481_s30 = smov (%p31_p4, %s11479_s30), 0  ;;  %255 = sbr.rel (%p252_p3) target bundleno = 945 (0x3b1), region = 48 }
   0xe   : > { %v5095_v0 = vld [vmem:[%s11039_s1 + $0xf8] sm:$0xff]  ;;  %v5094_v2 = vld [vmem:[%s11039_s1 + $0xf0] sm:$0xff]  ;;  %v5093_v4 = vld [vmem:[%s11039_s1 + $0xe8] sm:$0xff]  ;;  %p288_p5 = scmp.lt.s32.totalorder %s7577_s25, 1  ;;  %s5542_s16 = sshll.u32 %s7573_s24, 8 }
   0xf   : > { %v352_v1 = vld [vmem:[%s11039_s1 + $0x78] sm:$0xff]  ;;  %6247 = vmatprep.subr.mxu0 %v5095_v0  ;;  %v351_v3 = vld [vmem:[%s11039_s1 + $0x70] sm:$0xff]  ;;  %v350_v5 = vld [vmem:[%s11039_s1 + $0x68] sm:$0xff]  ;;  %p2988_p6 = scmp.eq.s32.totalorder %s7573_s24, 0  ;;  %p2990_p7 = scmp.eq.s32.totalorder %s7573_s24, 1 }
  0x10   : > { %6324 = vmatprep.subr.mxu1 %v352_v1  ;;  %6248 = vmatpush3.msra.mxu0 %v5095_v0  ;;  %v5092_v6 = vld [vmem:[%s11039_s1 + $0xe0] sm:$0xff]  ;;  %v5091_v8 = vld [vmem:[%s11039_s1 + $0xd8] sm:$0xff]  ;;  %v5090_v10 = vld [vmem:[%s11039_s1 + $0xd0] sm:$0xff]  ;;  %s11483_s25 = smov (!%p288_p5, %s7577_s25), 1 }
  0x11   : > { %6325 = vmatpush3.msra.mxu1 %v352_v1  ;;  %6249 = vmatprep.subr.mxu0 %v5094_v2  ;;  %v349_v7 = vld [vmem:[%s11039_s1 + $0x60] sm:$0xff]  ;;  %v348_v9 = vld [vmem:[%s11039_s1 + $0x58] sm:$0xff]  ;;  %v347_v11 = vld [vmem:[%s11039_s1 + $0x50] sm:$0xff]  ;;  %s7476_s20 = smul.u32 640, %s11483_s25 }
  0x12   : > { %6326 = vmatprep.subr.mxu1 %v351_v3  ;;  %6250 = vmatpush3.msra.mxu0 %v5094_v2  ;;  %v5089_v12 = vld [vmem:[%s11039_s1 + $0xc8] sm:$0xff]  ;;  %v5088_v14 = vld [vmem:[%s11039_s1 + $0xc0] sm:$0xff]  ;;  %v5087_v16 = vld [vmem:[%s11039_s1 + $0xb8] sm:$0xff]  ;;  %s2989_s22 = scalar_select %p2988_p6, 1, 0 }
  0x13   : > { %6327 = vmatpush3.msra.mxu1 %v351_v3  ;;  %6251 = vmatprep.subr.mxu0 %v5093_v4  ;;  %v346_v13 = vld [vmem:[%s11039_s1 + $0x48] sm:$0xff]  ;;  %v345_v15 = vld [vmem:[%s11039_s1 + $0x40] sm:$0xff]  ;;  %v344_v17 = vld [vmem:[%s11039_s1 + $0x38] sm:$0xff]  ;;  %s292_s15 = scalar_lea.vmem %s11038_s0, %s7476_s20  ;;  %s5076_s20 = sshll.u32 %s11483_s25, 5 }
  0x14   : > { %6328 = vmatprep.subr.mxu1 %v350_v5  ;;  %6252 = vmatpush3.msra.mxu0 %v5093_v4  ;;  %v5086_v18 = vld [vmem:[%s11039_s1 + $0xb0] sm:$0xff]  ;;  %v5085_v20 = vld [vmem:[%s11039_s1 + $0xa8] sm:$0xff]  ;;  %v5084_v22 = vld [vmem:[%s11039_s1 + $0xa0] sm:$0xff]  ;;  %s7764_s9 = scalar_lea.vmem %s292_s15, %s5542_s16 }
  0x15   : > { %6329 = vmatpush3.msra.mxu1 %v350_v5  ;;  %6253 = vmatprep.subr.mxu0 %v5092_v6  ;;  %v343_v19 = vld [vmem:[%s11039_s1 + $0x30] sm:$0xff]  ;;  %v342_v21 = vld [vmem:[%s11039_s1 + $0x28] sm:$0xff]  ;;  %v341_v23 = vld [vmem:[%s11039_s1 + $0x20] sm:$0xff]  ;;  %s2991_s23 = scalar_select %p2990_p7, 8, 9 }
  0x16   : > { %6330 = vmatprep.subr.mxu1 %v349_v7  ;;  %6254 = vmatpush3.msra.mxu0 %v5092_v6  ;;  %v5083_v24 = vld [vmem:[%s11039_s1 + $0x98] sm:$0xff]  ;;  %v5082_v26 = vld [vmem:[%s11039_s1 + $0x90] sm:$0xff]  ;;  %v5081_v28 = vld [vmem:[%s11039_s1 + $0x88] sm:$0xff] }
  0x17   : > { %6331 = vmatpush3.msra.mxu1 %v349_v7  ;;  %6255 = vmatprep.subr.mxu0 %v5091_v8  ;;  %v340_v25 = vld [vmem:[%s11039_s1 + $0x18] sm:$0xff]  ;;  %v339_v27 = vld [vmem:[%s11039_s1 + $0x10] sm:$0xff]  ;;  %v338_v29 = vld [vmem:[%s11039_s1 + $0x8] sm:$0xff] }
  0x18   : > { %6332 = vmatprep.subr.mxu1 %v348_v9  ;;  %6256 = vmatpush3.msra.mxu0 %v5091_v8  ;;  %v5080_v30 = vld [vmem:[%s11039_s1 + $0x80] sm:$0xff]  ;;  %v354_v34 = vld [vmem:[%s7764_s9 + $0x9] sm:$0xff]  ;;  %v5111_v36 = vld [vmem:[%s11039_s1 + $0x178] sm:$0xff] }
  0x19   : > { %6333 = vmatpush3.msra.mxu1 %v348_v9  ;;  %6257 = vmatprep.subr.mxu0 %v5090_v10  ;;  %v337_v31 = vld [vmem:[%s11039_s1] sm:$0xff]  ;;  %v308_v35 = vld [vmem:[%s7764_s9 + $0x8] sm:$0xff]  ;;  %v355_v37 = vld [vmem:[%s7764_s9 + $0x11] sm:$0xff] }
  0x1a   : > { %6334 = vmatprep.subr.mxu1 %v347_v11  ;;  %6258 = vmatpush3.msra.mxu0 %v5090_v10  ;;  %v353_v32 = vld [vmem:[%s7764_s9 + $0x1] sm:$0xff]  ;;  %v309_v38 = vld [vmem:[%s7764_s9 + $0x10] sm:$0xff]  ;;  %v5159_v40 = vld [vmem:[%s11039_s1 + $0x1f8] sm:$0xff] }
  0x1b   : > { %6335 = vmatpush3.msra.mxu1 %v347_v11  ;;  %6259 = vmatprep.subr.mxu0 %v5089_v12  ;;  %v307_v33 = vld [vmem:[%s7764_s9] sm:$0xff]  ;;  %v5110_v39 = vld [vmem:[%s11039_s1 + $0x170] sm:$0xff]  ;;  %v7797_v44 = vld [vmem:[%s7764_s9 + $0x28] sm:$0xff] }
  0x1c   : > { %6336 = vmatprep.subr.mxu1 %v346_v13  ;;  %6260 = vmatpush3.msra.mxu0 %v5089_v12  ;;  %v7788_v41 = vld [vmem:[%s7764_s9 + $0x21] sm:$0xff]  ;;  %v7794_v43 = vld [vmem:[%s7764_s9 + $0x29] sm:$0xff]  ;;  %v7806_v46 = vld [vmem:[%s7764_s9 + $0x31] sm:$0xff] }
  0x1d   : > { %6337 = vmatpush3.msra.mxu1 %v346_v13  ;;  %6261 = vmatprep.subr.mxu0 %v5088_v14  ;;  %v7791_v42 = vld [vmem:[%s7764_s9 + $0x20] sm:$0xff]  ;;  %v5109_v45 = vld [vmem:[%s11039_s1 + $0x168] sm:$0xff]  ;;  %v7809_v47 = vld [vmem:[%s7764_s9 + $0x30] sm:$0xff] }
  0x1e   : > { %6338 = vmatprep.subr.mxu1 %v345_v15  ;;  %6262 = vmatpush3.msra.mxu0 %v5088_v14  ;;  %v7813_v48 = vld [vmem:[%s7764_s9 + $0x41] sm:$0xff]  ;;  %v5158_v51 = vld [vmem:[%s11039_s1 + $0x1f0] sm:$0xff]  ;;  %v5107_v56 = vld [vmem:[%s11039_s1 + $0x158] sm:$0xff] }
  0x1f   : > { %6339 = vmatpush3.msra.mxu1 %v345_v15  ;;  %6263 = vmatprep.subr.mxu0 %v5087_v16  ;;  %v7816_v49 = vld [vmem:[%s7764_s9 + $0x40] sm:$0xff]  ;;  %v7829_v52 = vld [vmem:[%s7764_s9 + $0x49] sm:$0xff]  ;;  %v7835_v54 = vld [vmem:[%s7764_s9 + $0x51] sm:$0xff] }
  0x20   : > { %6340 = vmatprep.subr.mxu1 %v344_v17  ;;  %6264 = vmatpush3.msra.mxu0 %v5087_v16  ;;  %v5108_v50 = vld [vmem:[%s11039_s1 + $0x160] sm:$0xff]  ;;  %v7832_v53 = vld [vmem:[%s7764_s9 + $0x48] sm:$0xff]  ;;  %v7838_v55 = vld [vmem:[%s7764_s9 + $0x50] sm:$0xff] }
  0x21   : > { %6341 = vmatpush3.msra.mxu1 %v344_v17  ;;  %6265 = vmatprep.subr.mxu0 %v5086_v18  ;;  %v5157_v57 = vld [vmem:[%s11039_s1 + $0x1e8] sm:$0xff]  ;;  %v7854_v59 = vld [vmem:[%s7764_s9 + $0x60] sm:$0xff]  ;;  %v5106_v62 = vld [vmem:[%s11039_s1 + $0x150] sm:$0xff] }
  0x22   : > { %6342 = vmatprep.subr.mxu1 %v343_v19  ;;  %6266 = vmatpush3.msra.mxu0 %v5086_v18  ;;  %v7851_v58 = vld [vmem:[%s7764_s9 + $0x61] sm:$0xff]  ;;  %v7857_v60 = vld [vmem:[%s7764_s9 + $0x69] sm:$0xff]  ;;  %v7873_v0 = vld [vmem:[%s7764_s9 + $0x71] sm:$0xff] }
  0x23   : > { %6343 = vmatpush3.msra.mxu1 %v343_v19  ;;  %6267 = vmatprep.subr.mxu0 %v5085_v20  ;;  %v7860_v61 = vld [vmem:[%s7764_s9 + $0x68] sm:$0xff]  ;;  %v5156_v63 = vld [vmem:[%s11039_s1 + $0x1e0] sm:$0xff]  ;;  %v7876_v1 = vld [vmem:[%s7764_s9 + $0x70] sm:$0xff] }
  0x24   : > { %6344 = vmatprep.subr.mxu1 %v342_v21  ;;  %6268 = vmatpush3.msra.mxu0 %v5085_v20  ;;  %v7879_v2 = vld [vmem:[%s7764_s9 + $0x81] sm:$0xff]  ;;  %v5155_v5 = vld [vmem:[%s11039_s1 + $0x1d8] sm:$0xff]  ;;  %v7895_v6 = vld [vmem:[%s7764_s9 + $0x89] sm:$0xff] }
  0x25   : > { %6345 = vmatpush3.msra.mxu1 %v342_v21  ;;  %6269 = vmatprep.subr.mxu0 %v5084_v22  ;;  %v7882_v3 = vld [vmem:[%s7764_s9 + $0x80] sm:$0xff]  ;;  %v5105_v4 = vld [vmem:[%s11039_s1 + $0x148] sm:$0xff]  ;;  %v7901_v8 = vld [vmem:[%s7764_s9 + $0x91] sm:$0xff] }
  0x26   : > { %6346 = vmatprep.subr.mxu1 %v341_v23  ;;  %6270 = vmatpush3.msra.mxu0 %v5084_v22  ;;  %v7898_v7 = vld [vmem:[%s7764_s9 + $0x88] sm:$0xff]  ;;  %v7904_v9 = vld [vmem:[%s7764_s9 + $0x90] sm:$0xff]  ;;  %v5104_v10 = vld [vmem:[%s11039_s1 + $0x140] sm:$0xff] }
  0x27   : > { %6347 = vmatpush3.msra.mxu1 %v341_v23  ;;  %6271 = vmatprep.subr.mxu0 %v5083_v24  ;;  %v5154_v11 = vld [vmem:[%s11039_s1 + $0x1d0] sm:$0xff]  ;;  %v7917_v12 = vld [vmem:[%s7764_s9 + $0xa1] sm:$0xff]  ;;  %v5103_v14 = vld [vmem:[%s11039_s1 + $0x138] sm:$0xff] }
  0x28   : > { %6348 = vmatprep.subr.mxu1 %v340_v25  ;;  %6272 = vmatpush3.msra.mxu0 %v5083_v24  ;;  %v7920_v13 = vld [vmem:[%s7764_s9 + $0xa0] sm:$0xff]  ;;  %v7926_v15 = vld [vmem:[%s7764_s9 + $0xa9] sm:$0xff]  ;;  %v7941_v19 = vld [vmem:[%s7764_s9 + $0xb1] sm:$0xff] }
  0x29   : > { %6349 = vmatpush3.msra.mxu1 %v340_v25  ;;  %6273 = vmatprep.subr.mxu0 %v5082_v26  ;;  %v7929_v16 = vld [vmem:[%s7764_s9 + $0xa8] sm:$0xff]  ;;  %v5102_v17 = vld [vmem:[%s11039_s1 + $0x130] sm:$0xff]  ;;  %v7951_v22 = vld [vmem:[%s7764_s9 + $0xc0] sm:$0xff] }
  0x2a   : > { %6350 = vmatprep.subr.mxu1 %v339_v27  ;;  %6274 = vmatpush3.msra.mxu0 %v5082_v26  ;;  %v5153_v18 = vld [vmem:[%s11039_s1 + $0x1c8] sm:$0xff]  ;;  %v7944_v20 = vld [vmem:[%s7764_s9 + $0xb0] sm:$0xff]  ;;  %v5152_v24 = vld [vmem:[%s11039_s1 + $0x1c0] sm:$0xff] }
  0x2b   : > { %6351 = vmatpush3.msra.mxu1 %v339_v27  ;;  %6275 = vmatprep.subr.mxu0 %v5081_v28  ;;  %v7948_v21 = vld [vmem:[%s7764_s9 + $0xc1] sm:$0xff]  ;;  %v7964_v25 = vld [vmem:[%s7764_s9 + $0xc9] sm:$0xff]  ;;  %v7970_v27 = vld [vmem:[%s7764_s9 + $0xd1] sm:$0xff] }
  0x2c   : > { %6352 = vmatprep.subr.mxu1 %v338_v29  ;;  %6276 = vmatpush3.msra.mxu0 %v5081_v28  ;;  %v5101_v23 = vld [vmem:[%s11039_s1 + $0x128] sm:$0xff]  ;;  %v7973_v28 = vld [vmem:[%s7764_s9 + $0xd0] sm:$0xff] }
  0x2d   : > { %6353 = vmatpush3.msra.mxu1 %v338_v29  ;;  %6277 = vmatprep.subr.mxu0 %v5080_v30  ;;  %v7967_v26 = vld [vmem:[%s7764_s9 + $0xc8] sm:$0xff]  ;;  %v5100_v29 = vld [vmem:[%s11039_s1 + $0x120] sm:$0xff] }
  0x2e   : > { %6354 = vmatprep.subr.mxu1 %v337_v31  ;;  %6278 = vmatpush3.msra.mxu0 %v5080_v30  ;;  %v5151_v30 = vld [vmem:[%s11039_s1 + $0x1b8] sm:$0xff] }
  0x2f   : > { %6279 = vmatprep.mubr.f32.mxu0 %v353_v32  ;;  %6355 = vmatpush3.msra.mxu1 %v337_v31  ;;  %v7986_v31 = vld [vmem:[%s7764_s9 + $0xe1] sm:$0xff] }
  0x30   : > { %6356 = vmatprep.mubr.f32.mxu1 %v307_v33  ;;  %6280 = vmatmul.mubr.f32.vlgmr.msra.gmra.mxu0 %v354_v34  ;;  %v7989_v32 = vld [vmem:[%s7764_s9 + $0xe0] sm:$0xff]  ;;  %v7992_v33 = vld [vmem:[%s7764_s9 + $0xe9] sm:$0xff] }
  0x31   : > { %6357 = vmatmul.mubr.f32.vlgmr.msra.gmra.mxu1 %v308_v35  ;;  %6401 = vmatprep.subr.mxu0 %v5111_v36  ;;  %v7995_v34 = vld [vmem:[%s7764_s9 + $0xe8] sm:$0xff]  ;;  %v5099_v35 = vld [vmem:[%s11039_s1 + $0x118] sm:$0xff] }
  0x32   : > { %6282 = vmatprep.mubr.f32.mxu0 %v355_v37  ;;  %6402 = vmatpush3.msra.mxu0 %v5111_v36  ;;  %v5150_v36 = vld [vmem:[%s11039_s1 + $0x1b0] sm:$0xff] }
  0x33   : > { %6359 = vmatprep.mubr.f32.mxu1 %v309_v38  ;;  %6403 = vmatprep.subr.mxu0 %v5110_v39  ;;  %v8008_v37 = vld [vmem:[%s7764_s9 + $0xf1] sm:$0xff] }
  0x34   : > { %6478 = vmatprep.subr.mxu1 %v5159_v40  ;;  %6283 = vmatmul.mubr.f32.gmra.mxu0 %v7788_v41  ;;  %v8011_v38 = vld [vmem:[%s7764_s9 + $0xf0] sm:$0xff] }
  0x35   : > { %6360 = vmatmul.mubr.f32.gmra.mxu1 %v7791_v42  ;;  %6404 = vmatpush3.msra.mxu0 %v5110_v39  ;;  %v8014_v39 = vld [vmem:[%s7764_s9 + $0x101] sm:$0xff] }
  0x36   : > { %6285 = vmatprep.mubr.f32.mxu0 %v7794_v43  ;;  %6362 = vmatprep.mubr.f32.mxu1 %v7797_v44 }
  0x37   : > { %6405 = vmatprep.subr.mxu0 %v5109_v45  ;;  %6479 = vmatpush3.msra.mxu1 %v5159_v40  ;;  %v8017_v40 = vld [vmem:[%s7764_s9 + $0x100] sm:$0xff] }
  0x38   : > { %6406 = vmatpush3.msra.mxu0 %v5109_v45  ;;  %6480 = vmatprep.subr.mxu1 %v5158_v51  ;;  %v5098_v45 = vld [vmem:[%s11039_s1 + $0x110] sm:$0xff] }
  0x39   : > { %6286 = vmatmul.mubr.f32.gmra.mxu0 %v7806_v46  ;;  %6363 = vmatmul.mubr.f32.gmra.mxu1 %v7809_v47 }
  0x3a   : > { %6288 = vmatprep.mubr.f32.mxu0 %v7813_v48  ;;  %6365 = vmatprep.mubr.f32.mxu1 %v7816_v49 }
  0x3b   : > { %6407 = vmatprep.subr.mxu0 %v5108_v50  ;;  %6481 = vmatpush3.msra.mxu1 %v5158_v51  ;;  %v8029_v51 = vld [vmem:[%s7764_s9 + $0x108] sm:$0xff] }
  0x3c   : > { %6408 = vmatpush3.msra.mxu0 %v5108_v50  ;;  %6482 = vmatprep.subr.mxu1 %v5157_v57  ;;  %v8026_v50 = vld [vmem:[%s7764_s9 + $0x109] sm:$0xff] }
  0x3d   : > { %6289 = vmatmul.mubr.f32.gmra.mxu0 %v7829_v52  ;;  %6366 = vmatmul.mubr.f32.gmra.mxu1 %v7832_v53 }
  0x3e   : > { %6291 = vmatprep.mubr.f32.mxu0 %v7835_v54  ;;  %6368 = vmatprep.mubr.f32.mxu1 %v7838_v55 }
  0x3f   : > { %6409 = vmatprep.subr.mxu0 %v5107_v56  ;;  %6483 = vmatpush3.msra.mxu1 %v5157_v57  ;;  %v8036_v57 = vld [vmem:[%s7764_s9 + $0x111] sm:$0xff] }
  0x40   : > { %6410 = vmatpush3.msra.mxu0 %v5107_v56  ;;  %6484 = vmatprep.subr.mxu1 %v5156_v63  ;;  %v5149_v56 = vld [vmem:[%s11039_s1 + $0x1a8] sm:$0xff] }
  0x41   : > { %6292 = vmatmul.mubr.f32.gmra.mxu0 %v7851_v58  ;;  %6369 = vmatmul.mubr.f32.gmra.mxu1 %v7854_v59 }
  0x42   : > { %6294 = vmatprep.mubr.f32.mxu0 %v7857_v60  ;;  %6371 = vmatprep.mubr.f32.mxu1 %v7860_v61 }
  0x43   : > { %6411 = vmatprep.subr.mxu0 %v5106_v62  ;;  %6485 = vmatpush3.msra.mxu1 %v5156_v63  ;;  %v5148_v63 = vld [vmem:[%s11039_s1 + $0x1a0] sm:$0xff] }
  0x44   : > { %6412 = vmatpush3.msra.mxu0 %v5106_v62  ;;  %6486 = vmatprep.subr.mxu1 %v5155_v5  ;;  %v8039_v62 = vld [vmem:[%s7764_s9 + $0x110] sm:$0xff] }
  0x45   : > { %6295 = vmatmul.mubr.f32.gmra.mxu0 %v7873_v0  ;;  %6372 = vmatmul.mubr.f32.gmra.mxu1 %v7876_v1 }
  0x46   : > { %6297 = vmatprep.mubr.f32.mxu0 %v7879_v2  ;;  %6374 = vmatprep.mubr.f32.mxu1 %v7882_v3 }
  0x47   : > { %6413 = vmatprep.subr.mxu0 %v5105_v4  ;;  %6487 = vmatpush3.msra.mxu1 %v5155_v5  ;;  %v8051_v5 = vld [vmem:[%s7764_s9 + $0x121] sm:$0xff] }
  0x48   : > { %6414 = vmatpush3.msra.mxu0 %v5105_v4  ;;  %6488 = vmatprep.subr.mxu1 %v5154_v11  ;;  %v5097_v4 = vld [vmem:[%s11039_s1 + $0x108] sm:$0xff] }
  0x49   : > { %6298 = vmatmul.mubr.f32.gmra.mxu0 %v7895_v6  ;;  %6375 = vmatmul.mubr.f32.gmra.mxu1 %v7898_v7 }
  0x4a   : > { %6300 = vmatprep.mubr.f32.mxu0 %v7901_v8  ;;  %6377 = vmatprep.mubr.f32.mxu1 %v7904_v9 }
  0x4b   : > { %6415 = vmatprep.subr.mxu0 %v5104_v10  ;;  %6489 = vmatpush3.msra.mxu1 %v5154_v11  ;;  %v5147_v11 = vld [vmem:[%s11039_s1 + $0x198] sm:$0xff] }
  0x4c   : > { %6416 = vmatpush3.msra.mxu0 %v5104_v10  ;;  %6490 = vmatprep.subr.mxu1 %v5153_v18  ;;  %v8054_v10 = vld [vmem:[%s7764_s9 + $0x120] sm:$0xff] }
  0x4d   : > { %6301 = vmatmul.mubr.f32.gmra.mxu0 %v7917_v12  ;;  %6378 = vmatmul.mubr.f32.gmra.mxu1 %v7920_v13 }
  0x4e   : > { %6417 = vmatprep.subr.mxu0 %v5103_v14  ;;  %6303 = vmatprep.mubr.f32.mxu0 %v7926_v15 }
  0x4f   : > { %6380 = vmatprep.mubr.f32.mxu1 %v7929_v16  ;;  %6418 = vmatpush3.msra.mxu0 %v5103_v14  ;;  %v8061_v14 = vld [vmem:[%s7764_s9 + $0x129] sm:$0xff] }
  0x50   : > { %6419 = vmatprep.subr.mxu0 %v5102_v17  ;;  %6491 = vmatpush3.msra.mxu1 %v5153_v18  ;;  %v8069_v18 = vld [vmem:[%s7764_s9 + $0x131] sm:$0xff] }
  0x51   : > { %6304 = vmatmul.mubr.f32.gmra.mxu0 %v7941_v19  ;;  %6381 = vmatmul.mubr.f32.gmra.mxu1 %v7944_v20 }
  0x52   : > { %6306 = vmatprep.mubr.f32.mxu0 %v7948_v21  ;;  %6383 = vmatprep.mubr.f32.mxu1 %v7951_v22 }
  0x53   : > { %6420 = vmatpush3.msra.mxu0 %v5102_v17  ;;  %6492 = vmatprep.subr.mxu1 %v5152_v24  ;;  %v8066_v17 = vld [vmem:[%s7764_s9 + $0x128] sm:$0xff] }
  0x54   : > { %6421 = vmatprep.subr.mxu0 %v5101_v23  ;;  %6493 = vmatpush3.msra.mxu1 %v5152_v24  ;;  %v5146_v24 = vld [vmem:[%s11039_s1 + $0x190] sm:$0xff] }
  0x55   : > { %6307 = vmatmul.mubr.f32.gmra.mxu0 %v7964_v25  ;;  %6384 = vmatmul.mubr.f32.gmra.mxu1 %v7967_v26 }
  0x56   : > { %6309 = vmatprep.mubr.f32.mxu0 %v7970_v27  ;;  %6386 = vmatprep.mubr.f32.mxu1 %v7973_v28 }
  0x57   : > { %6422 = vmatpush3.msra.mxu0 %v5101_v23  ;;  %6494 = vmatprep.subr.mxu1 %v5151_v30  ;;  %v8072_v23 = vld [vmem:[%s7764_s9 + $0x130] sm:$0xff] }
  0x58   : > { %6423 = vmatprep.subr.mxu0 %v5100_v29  ;;  %6495 = vmatpush3.msra.mxu1 %v5151_v30  ;;  %v5145_v30 = vld [vmem:[%s11039_s1 + $0x188] sm:$0xff] }
  0x59   : > { %6310 = vmatmul.mubr.f32.gmra.mxu0 %v7986_v31  ;;  %6387 = vmatmul.mubr.f32.gmra.mxu1 %v7989_v32 }
  0x5a   : > { %6312 = vmatprep.mubr.f32.mxu0 %v7992_v33  ;;  %6389 = vmatprep.mubr.f32.mxu1 %v7995_v34 }
  0x5b   : > { %6424 = vmatpush3.msra.mxu0 %v5100_v29  ;;  %6496 = vmatprep.subr.mxu1 %v5150_v36  ;;  %v5096_v29 = vld [vmem:[%s11039_s1 + $0x100] sm:$0xff] }
  0x5c   : > { %6425 = vmatprep.subr.mxu0 %v5099_v35  ;;  %6497 = vmatpush3.msra.mxu1 %v5150_v36  ;;  %v831_v36 = vld [vmem:[%s7764_s9 + $0xa] sm:$0xff] }
  0x5d   : > { %6313 = vmatmul.mubr.f32.gmra.mxu0 %v8008_v37  ;;  %6390 = vmatmul.mubr.f32.gmra.mxu1 %v8011_v38 }
  0x5e   : > { %6426 = vmatpush3.msra.mxu0 %v5099_v35  ;;  %6315 = vmatprep.mubr.f32.mxu0 %v8014_v39  ;;  %v830_v35 = vld [vmem:[%s7764_s9 + $0x2] sm:$0xff] }
  0x5f   : > { %6392 = vmatprep.mubr.f32.mxu1 %v8017_v40  ;;  %6427 = vmatprep.subr.mxu0 %v5098_v45 }
  0x60   : > { %6428 = vmatpush3.msra.mxu0 %v5098_v45  ;;  %6498 = vmatprep.subr.mxu1 %v5149_v56  ;;  %v5144_v45 = vld [vmem:[%s11039_s1 + $0x180] sm:$0xff] }
  0x61   : > { %6316 = vmatmul.mubr.f32.gmra.mxu0 %v8026_v50  ;;  %6393 = vmatmul.mubr.f32.gmra.mxu1 %v8029_v51 }
  0x62   : > { %6318 = vmatprep.mubr.f32.mxu0 %v8036_v57  ;;  %6395 = vmatprep.mubr.f32.mxu1 %v8039_v62 }
  0x63   : > { %6499 = vmatpush3.msra.mxu1 %v5149_v56  ;;  %6429 = vmatprep.subr.mxu0 %v5097_v4  ;;  %v5205_v56 = vld [vmem:[%s11039_s1 + $0x278] sm:$0xff] }
  0x64   : > { %6500 = vmatprep.subr.mxu1 %v5148_v63  ;;  %6430 = vmatpush3.msra.mxu0 %v5097_v4  ;;  %v5204_v4 = vld [vmem:[%s11039_s1 + $0x270] sm:$0xff] }
  0x65   : > { %6319 = vmatmul.mubr.f32.gmra.mxu0 %v8051_v5  ;;  %6396 = vmatmul.mubr.f32.gmra.mxu1 %v8054_v10 }
  0x66   : > { %6501 = vmatpush3.msra.mxu1 %v5148_v63  ;;  %6321 = vmatprep.mubr.f32.mxu0 %v8061_v14  ;;  %v832_v63 = vld [vmem:[%s7764_s9 + $0x12] sm:$0xff] }
  0x67   : > { %6502 = vmatprep.subr.mxu1 %v5147_v11  ;;  %6398 = vmatprep.mubr.f32.mxu1 %v8066_v17 }
  0x68   : > { %6503 = vmatpush3.msra.mxu1 %v5147_v11  ;;  %6431 = vmatprep.subr.mxu0 %v5096_v29  ;;  %v8101_v11 = vld [vmem:[%s7764_s9 + $0x22] sm:$0xff] }
  0x69   : > { %6322 = vmatmul.mubr.f32.gmra.mxu0 %v8069_v18  ;;  %6399 = vmatmul.mubr.f32.gmra.mxu1 %v8072_v23 }
  0x6a   : > { %6504 = vmatprep.subr.mxu1 %v5146_v24  ;;  %6432 = vmatpush3.msra.mxu0 %v5096_v29  ;;  %v5203_v29 = vld [vmem:[%s11039_s1 + $0x268] sm:$0xff] }
  0x6b   : > { %6505 = vmatpush3.msra.mxu1 %v5146_v24  ;;  %6433 = vmatprep.mubr.f32.mxu0 %v830_v35  ;;  %v8105_v24 = vld [vmem:[%s7764_s9 + $0x2a] sm:$0xff] }
  0x6c   : > { %6506 = vmatprep.subr.mxu1 %v5145_v30  ;;  %6555 = vmatprep.subr.mxu0 %v5205_v56  ;;  %v8130_v35 = vld [vmem:[%s7764_s9 + $0x4a] sm:$0xff] }
  0x6d   : > { %6507 = vmatpush3.msra.mxu1 %v5145_v30  ;;  %6434 = vmatmul.mubr.f32.vlgmr.msra.gmra.mxu0 %v831_v36  ;;  %v8121_v30 = vld [vmem:[%s7764_s9 + $0x42] sm:$0xff] }
  0x6e   : > { %6508 = vmatprep.subr.mxu1 %v5144_v45  ;;  %6510 = vmatprep.mubr.f32.mxu1 %v7791_v42  ;;  %v8114_v42 = vld [vmem:[%s7764_s9 + $0x32] sm:$0xff]  ;;  %v5199_v36 = vld [vmem:[%s11039_s1 + $0x248] sm:$0xff] }
  0x6f   : > { %6509 = vmatpush3.msra.mxu1 %v5144_v45  ;;  %6556 = vmatpush3.msra.mxu0 %v5205_v56  ;;  %v8146_v45 = vld [vmem:[%s7764_s9 + $0x62] sm:$0xff]  ;;  %v5197_v56 = vld [vmem:[%s11039_s1 + $0x238] sm:$0xff] }
  0x70   : > { %6511 = vmatmul.mubr.f32.vlgmr.msra.gmra.mxu1 %v7797_v44  ;;  %6436 = vmatprep.mubr.f32.mxu0 %v832_v63  ;;  %v5202_v44 = vld [vmem:[%s11039_s1 + $0x260] sm:$0xff]  ;;  %v5251_v63 = vld [vmem:[%s11039_s1 + $0x2f8] sm:$0xff] }
  0x71   : > { %6557 = vmatprep.subr.mxu0 %v5204_v4  ;;  %6437 = vmatmul.mubr.f32.gmra.mxu0 %v8101_v11 }
  0x72   : > { %6513 = vmatprep.mubr.f32.mxu1 %v7809_v47  ;;  %6558 = vmatpush3.msra.mxu0 %v5204_v4  ;;  %v5201_v47 = vld [vmem:[%s11039_s1 + $0x258] sm:$0xff]  ;;  %v5250_v4 = vld [vmem:[%s11039_s1 + $0x2f0] sm:$0xff] }
  0x73   : > { %6439 = vmatprep.mubr.f32.mxu0 %v8105_v24  ;;  %6559 = vmatprep.subr.mxu0 %v5203_v29 }
  0x74   : > { %6514 = vmatmul.mubr.f32.gmra.mxu1 %v7816_v49  ;;  %6560 = vmatpush3.msra.mxu0 %v5203_v29  ;;  %v5200_v49 = vld [vmem:[%s11039_s1 + $0x250] sm:$0xff] }
  0x75   : > { %6516 = vmatprep.mubr.f32.mxu1 %v7832_v53  ;;  %6440 = vmatmul.mubr.f32.gmra.mxu0 %v8114_v42  ;;  %v8137_v53 = vld [vmem:[%s7764_s9 + $0x52] sm:$0xff]  ;;  %v8178_v29 = vld [vmem:[%s7764_s9 + $0x8a] sm:$0xff] }
  0x76   : > { %6561 = vmatprep.subr.mxu0 %v5202_v44  ;;  %6442 = vmatprep.mubr.f32.mxu0 %v8121_v30 }
  0x77   : > { %6562 = vmatpush3.msra.mxu0 %v5202_v44  ;;  %6632 = vmatprep.subr.mxu1 %v5251_v63  ;;  %v5249_v44 = vld [vmem:[%s11039_s1 + $0x2e8] sm:$0xff] }
  0x78   : > { %6517 = vmatmul.mubr.f32.gmra.mxu1 %v7838_v55  ;;  %6563 = vmatprep.subr.mxu0 %v5201_v47  ;;  %v5198_v55 = vld [vmem:[%s11039_s1 + $0x240] sm:$0xff] }
  0x79   : > { %6519 = vmatprep.mubr.f32.mxu1 %v7854_v59  ;;  %6564 = vmatpush3.msra.mxu0 %v5201_v47  ;;  %v8153_v59 = vld [vmem:[%s7764_s9 + $0x6a] sm:$0xff]  ;;  %v8194_v47 = vld [vmem:[%s7764_s9 + $0xa2] sm:$0xff] }
  0x7a   : > { %6443 = vmatmul.mubr.f32.gmra.mxu0 %v8130_v35  ;;  %6565 = vmatprep.subr.mxu0 %v5200_v49 }
  0x7b   : > { %6445 = vmatprep.mubr.f32.mxu0 %v8137_v53  ;;  %6566 = vmatpush3.msra.mxu0 %v5200_v49  ;;  %v8201_v49 = vld [vmem:[%s7764_s9 + $0xaa] sm:$0xff] }
  0x7c   : > { %6520 = vmatmul.mubr.f32.gmra.mxu1 %v7860_v61  ;;  %6567 = vmatprep.subr.mxu0 %v5199_v36  ;;  %v8165_v61 = vld [vmem:[%s7764_s9 + $0x72] sm:$0xff] }
  0x7d   : > { %6522 = vmatprep.mubr.f32.mxu1 %v7876_v1  ;;  %6568 = vmatpush3.msra.mxu0 %v5199_v36  ;;  %v8169_v1 = vld [vmem:[%s7764_s9 + $0x82] sm:$0xff]  ;;  %v5247_v36 = vld [vmem:[%s11039_s1 + $0x2d8] sm:$0xff] }
  0x7e   : > { %6446 = vmatmul.mubr.f32.gmra.mxu0 %v8146_v45  ;;  %6569 = vmatprep.subr.mxu0 %v5198_v55 }
  0x7f   : > { %6448 = vmatprep.mubr.f32.mxu0 %v8153_v59  ;;  %6570 = vmatpush3.msra.mxu0 %v5198_v55  ;;  %v5246_v55 = vld [vmem:[%s11039_s1 + $0x2d0] sm:$0xff] }
  0x80   : > { %6523 = vmatmul.mubr.f32.gmra.mxu1 %v7882_v3  ;;  %6571 = vmatprep.subr.mxu0 %v5197_v56  ;;  %v5196_v3 = vld [vmem:[%s11039_s1 + $0x230] sm:$0xff] }
  0x81   : > { %6525 = vmatprep.mubr.f32.mxu1 %v7898_v7  ;;  %6633 = vmatpush3.msra.mxu1 %v5251_v63  ;;  %v8185_v7 = vld [vmem:[%s7764_s9 + $0x92] sm:$0xff]  ;;  %v5245_v63 = vld [vmem:[%s11039_s1 + $0x2c8] sm:$0xff] }
  0x82   : > { %6449 = vmatmul.mubr.f32.gmra.mxu0 %v8165_v61  ;;  %6634 = vmatprep.subr.mxu1 %v5250_v4 }
  0x83   : > { %6451 = vmatprep.mubr.f32.mxu0 %v8169_v1  ;;  %6572 = vmatpush3.msra.mxu0 %v5197_v56  ;;  %v8226_v56 = vld [vmem:[%s7764_s9 + $0xca] sm:$0xff] }
  0x84   : > { %6526 = vmatmul.mubr.f32.gmra.mxu1 %v7904_v9  ;;  %6573 = vmatprep.subr.mxu0 %v5196_v3  ;;  %v5248_v9 = vld [vmem:[%s11039_s1 + $0x2e0] sm:$0xff] }
  0x85   : > { %6528 = vmatprep.mubr.f32.mxu1 %v7920_v13  ;;  %6635 = vmatpush3.msra.mxu1 %v5250_v4  ;;  %v5195_v13 = vld [vmem:[%s11039_s1 + $0x228] sm:$0xff] }
  0x86   : > { %6452 = vmatmul.mubr.f32.gmra.mxu0 %v8178_v29  ;;  %6636 = vmatprep.subr.mxu1 %v5249_v44  ;;  %v8242_v4 = vld [vmem:[%s7764_s9 + $0xe2] sm:$0xff] }
  0x87   : > { %6454 = vmatprep.mubr.f32.mxu0 %v8185_v7  ;;  %6574 = vmatpush3.msra.mxu0 %v5196_v3  ;;  %v8249_v3 = vld [vmem:[%s7764_s9 + $0xea] sm:$0xff] }
  0x88   : > { %6529 = vmatmul.mubr.f32.gmra.mxu1 %v7929_v16  ;;  %v8213_v16 = vld [vmem:[%s7764_s9 + $0xb2] sm:$0xff]  ;;  %6575 = vmatprep.subr.mxu0 %v5195_v13 }
  0x89   : > { %6531 = vmatprep.mubr.f32.mxu1 %v7944_v20  ;;  %6637 = vmatpush3.msra.mxu1 %v5249_v44  ;;  %v8217_v20 = vld [vmem:[%s7764_s9 + $0xc2] sm:$0xff]  ;;  %v8258_v44 = vld [vmem:[%s7764_s9 + $0xf2] sm:$0xff] }
  0x8a   : > { %6455 = vmatmul.mubr.f32.gmra.mxu0 %v8194_v47  ;;  %6638 = vmatprep.subr.mxu1 %v5248_v9 }
  0x8b   : > { %6457 = vmatprep.mubr.f32.mxu0 %v8201_v49  ;;  %6639 = vmatpush3.msra.mxu1 %v5248_v9  ;;  %v8265_v9 = vld [vmem:[%s7764_s9 + $0x102] sm:$0xff] }
  0x8c   : > { %6532 = vmatmul.mubr.f32.gmra.mxu1 %v7951_v22  ;;  %6640 = vmatprep.subr.mxu1 %v5247_v36  ;;  %v5194_v22 = vld [vmem:[%s11039_s1 + $0x220] sm:$0xff] }
  0x8d   : > { %6534 = vmatprep.mubr.f32.mxu1 %v7967_v26  ;;  %6641 = vmatpush3.msra.mxu1 %v5247_v36  ;;  %v8233_v26 = vld [vmem:[%s7764_s9 + $0xd2] sm:$0xff] }
  0x8e   : > { %6458 = vmatmul.mubr.f32.gmra.mxu0 %v8213_v16  ;;  %6642 = vmatprep.subr.mxu1 %v5246_v55  ;;  %v8285_v36 = vld [vmem:[%s7764_s9 + $0x112] sm:$0xff] }
  0x8f   : > { %6460 = vmatprep.mubr.f32.mxu0 %v8217_v20  ;;  %6576 = vmatpush3.msra.mxu0 %v5195_v13  ;;  %v5192_v13 = vld [vmem:[%s11039_s1 + $0x210] sm:$0xff] }
  0x90   : > { %6535 = vmatmul.mubr.f32.gmra.mxu1 %v7973_v28  ;;  %6577 = vmatprep.subr.mxu0 %v5194_v22  ;;  %v5244_v28 = vld [vmem:[%s11039_s1 + $0x2c0] sm:$0xff] }
  0x91   : > { %6537 = vmatprep.mubr.f32.mxu1 %v7989_v32  ;;  %6643 = vmatpush3.msra.mxu1 %v5246_v55  ;;  %v5193_v32 = vld [vmem:[%s11039_s1 + $0x218] sm:$0xff]  ;;  %v8289_v55 = vld [vmem:[%s7764_s9 + $0x122] sm:$0xff] }
  0x92   : > { %6461 = vmatmul.mubr.f32.gmra.mxu0 %v8226_v56  ;;  %6644 = vmatprep.subr.mxu1 %v5245_v63 }
  0x93   : > { %6463 = vmatprep.mubr.f32.mxu0 %v8233_v26  ;;  %6578 = vmatpush3.msra.mxu0 %v5194_v22  ;;  %v8301_v22 = vld [vmem:[%s7764_s9 + $0x140] sm:$0xff] }
  0x94   : > { %6538 = vmatmul.mubr.f32.gmra.mxu1 %v7995_v34  ;;  %6579 = vmatprep.subr.mxu0 %v5193_v32  ;;  %v5243_v34 = vld [vmem:[%s11039_s1 + $0x2b8] sm:$0xff] }
  0x95   : > { %6540 = vmatprep.mubr.f32.mxu1 %v8011_v38  ;;  %6645 = vmatpush3.msra.mxu1 %v5245_v63  ;;  %v5242_v38 = vld [vmem:[%s11039_s1 + $0x2b0] sm:$0xff] }
  0x96   : > { %6464 = vmatmul.mubr.f32.gmra.mxu0 %v8242_v4  ;;  %6646 = vmatprep.subr.mxu1 %v5244_v28  ;;  %v8308_v63 = vld [vmem:[%s7764_s9 + $0x12a] sm:$0xff] }
  0x97   : > { %6466 = vmatprep.mubr.f32.mxu0 %v8249_v3  ;;  %6580 = vmatpush3.msra.mxu0 %v5193_v32  ;;  %v8318_v32 = vld [vmem:[%s7764_s9 + $0x148] sm:$0xff] }
  0x98   : > { %6541 = vmatmul.mubr.f32.gmra.mxu1 %v8017_v40  ;;  %v8277_v40 = vld [vmem:[%s7764_s9 + $0x10a] sm:$0xff]  ;;  %6581 = vmatprep.subr.mxu0 %v5192_v13 }
  0x99   : > { %6543 = vmatprep.mubr.f32.mxu1 %v8029_v51  ;;  %6647 = vmatpush3.msra.mxu1 %v5244_v28  ;;  %v5241_v51 = vld [vmem:[%s11039_s1 + $0x2a8] sm:$0xff]  ;;  %v8311_v28 = vld [vmem:[%s7764_s9 + $0x132] sm:$0xff] }
  0x9a   : > { %6467 = vmatmul.mubr.f32.gmra.mxu0 %v8258_v44  ;;  %6648 = vmatprep.subr.mxu1 %v5243_v34 }
  0x9b   : > { %6469 = vmatprep.mubr.f32.mxu0 %v8265_v9  ;;  %6649 = vmatpush3.msra.mxu1 %v5243_v34  ;;  %v5190_v34 = vld [vmem:[%s11039_s1 + $0x200] sm:$0xff] }
  0x9c   : > { %6544 = vmatmul.mubr.f32.gmra.mxu1 %v8039_v62  ;;  %6650 = vmatprep.subr.mxu1 %v5242_v38  ;;  %v5240_v62 = vld [vmem:[%s11039_s1 + $0x2a0] sm:$0xff] }
  0x9d   : > { %6546 = vmatprep.mubr.f32.mxu1 %v8054_v10  ;;  %6651 = vmatpush3.msra.mxu1 %v5242_v38  ;;  %v5191_v10 = vld [vmem:[%s11039_s1 + $0x208] sm:$0xff]  ;;  %v8326_v38 = vld [vmem:[%s7764_s9 + $0x150] sm:$0xff] }
  0x9e   : > { %6470 = vmatmul.mubr.f32.gmra.mxu0 %v8277_v40  ;;  %6652 = vmatprep.subr.mxu1 %v5241_v51 }
  0x9f   : > { %6582 = vmatpush3.msra.mxu0 %v5192_v13  ;;  %6472 = vmatprep.mubr.f32.mxu0 %v8285_v36  ;;  %v5237_v13 = vld [vmem:[%s11039_s1 + $0x288] sm:$0xff] }
  0xa0   : > { %6547 = vmatmul.mubr.f32.gmra.mxu1 %v8066_v17  ;;  %v5239_v17 = vld [vmem:[%s11039_s1 + $0x298] sm:$0xff]  ;;  %6583 = vmatprep.subr.mxu0 %v5191_v10 }
  0xa1   : > { %6653 = vmatpush3.msra.mxu1 %v5241_v51  ;;  %6549 = vmatprep.mubr.f32.mxu1 %v8072_v23  ;;  %v5238_v23 = vld [vmem:[%s11039_s1 + $0x290] sm:$0xff]  ;;  %v5236_v51 = vld [vmem:[%s11039_s1 + $0x280] sm:$0xff] }
  0xa2   : > { %6473 = vmatmul.mubr.f32.gmra.mxu0 %v8289_v55  ;;  %6654 = vmatprep.subr.mxu1 %v5240_v62 }
  0xa3   : > { %6655 = vmatpush3.msra.mxu1 %v5240_v62  ;;  %6584 = vmatpush3.msra.mxu0 %v5191_v10  ;;  %v5299_v62 = vld [vmem:[%s11039_s1 + $0x378] sm:$0xff]  ;;  %v5298_v10 = vld [vmem:[%s11039_s1 + $0x370] sm:$0xff] }
  0xa4   : > { %6550 = vmatmul.mubr.f32.gmra.mxu1 %v8301_v22  ;;  %6656 = vmatprep.subr.mxu1 %v5239_v17 }
  0xa5   : > { %6475 = vmatprep.mubr.f32.mxu0 %v8308_v63  ;;  %6657 = vmatpush3.msra.mxu1 %v5239_v17  ;;  %v5305_v17 = vld [vmem:[%s7764_s9 + $0x71] sm:$0xff] }
  0xa6   : > { %6476 = vmatmul.mubr.f32.gmra.mxu0 %v8311_v28  ;;  %6658 = vmatprep.subr.mxu1 %v5238_v23 }
  0xa7   : > { %6552 = vmatprep.mubr.f32.mxu1 %v8318_v32  ;;  %6585 = vmatprep.subr.mxu0 %v5190_v34 }
  0xa8   : > { %6659 = vmatpush3.msra.mxu1 %v5238_v23  ;;  %6586 = vmatpush3.msra.mxu0 %v5190_v34  ;;  %v5387_v23 = vld [vmem:[%s11039_s1 + $0x458] sm:$0xff] }
  0xa9   : > { %6553 = vmatmul.mubr.f32.gmra.mxu1 %v8326_v38  ;;  %6660 = vmatprep.subr.mxu1 %v5237_v13 }
  0xaa   : > { %6587 = vmatprep.mubr.f32.mxu0 %v7788_v41  ;;  %6661 = vmatpush3.msra.mxu1 %v5237_v13  ;;  %v5297_v41 = vld [vmem:[%s11039_s1 + $0x368] sm:$0xff] }
  0xab   : > { %6588 = vmatmul.mubr.f32.vlgmr.msra.gmra.mxu0 %v7794_v43  ;;  %6662 = vmatprep.subr.mxu1 %v5236_v51  ;;  %v5296_v43 = vld [vmem:[%s11039_s1 + $0x360] sm:$0xff] }
  0xac   : > { %6709 = vmatprep.subr.mxu0 %v5299_v62  ;;  %6663 = vmatpush3.msra.mxu1 %v5236_v51  ;;  %v5306_v13 = vld [vmem:[%s7764_s9 + $0x81] sm:$0xff] }
  0xad   : > { %6664 = vmatprep.mubr.f32.mxu1 %v8101_v11  ;;  %6710 = vmatpush3.msra.mxu0 %v5299_v62  ;;  %v5285_v11 = vld [vmem:[%s11039_s1 + $0x308] sm:$0xff] }
  0xae   : > { %6665 = vmatmul.mubr.f32.vlgmr.msra.gmra.mxu1 %v8105_v24  ;;  %6590 = vmatprep.mubr.f32.mxu0 %v7806_v46  ;;  %v5295_v46 = vld [vmem:[%s11039_s1 + $0x358] sm:$0xff]  ;;  %v5261_v51 = vld [vmem:[%s7764_s9 + $0x88] sm:$0xff] }
  0xaf   : > { %6711 = vmatprep.subr.mxu0 %v5298_v10  ;;  %6591 = vmatmul.mubr.f32.gmra.mxu0 %v7813_v48  ;;  %v5294_v48 = vld [vmem:[%s11039_s1 + $0x350] sm:$0xff]  ;;  %v5333_v24 = vld [vmem:[%s11039_s1 + $0x398] sm:$0xff] }
  0xb0   : > { %6667 = vmatprep.mubr.f32.mxu1 %v8114_v42  ;;  %6712 = vmatpush3.msra.mxu0 %v5298_v10  ;;  %v8482_v42 = vld [vmem:[%s7764_s9 + $0x149] sm:$0xff] }
  0xb1   : > { %6593 = vmatprep.mubr.f32.mxu0 %v7829_v52  ;;  %6713 = vmatprep.subr.mxu0 %v5297_v41  ;;  %v5293_v52 = vld [vmem:[%s11039_s1 + $0x348] sm:$0xff] }
  0xb2   : > { %6668 = vmatmul.mubr.f32.gmra.mxu1 %v8121_v30  ;;  %6714 = vmatpush3.msra.mxu0 %v5297_v41  ;;  %v5332_v30 = vld [vmem:[%s11039_s1 + $0x390] sm:$0xff] }
  0xb3   : > { %6670 = vmatprep.mubr.f32.mxu1 %v8130_v35  ;;  %6594 = vmatmul.mubr.f32.gmra.mxu0 %v7835_v54  ;;  %v5292_v54 = vld [vmem:[%s11039_s1 + $0x340] sm:$0xff]  ;;  %v8492_v35 = vld [vmem:[%s7764_s9 + $0x14a] sm:$0xff] }
  0xb4   : > { %6715 = vmatprep.subr.mxu0 %v5296_v43  ;;  %6596 = vmatprep.mubr.f32.mxu0 %v7851_v58  ;;  %v5291_v58 = vld [vmem:[%s11039_s1 + $0x338] sm:$0xff]  ;;  %v5386_v41 = vld [vmem:[%s11039_s1 + $0x450] sm:$0xff] }
  0xb5   : > { %6716 = vmatpush3.msra.mxu0 %v5296_v43 }
  0xb6   : > { %6671 = vmatmul.mubr.f32.gmra.mxu1 %v8137_v53  ;;  %6717 = vmatprep.subr.mxu0 %v5295_v46  ;;  %v5284_v53 = vld [vmem:[%s11039_s1 + $0x300] sm:$0xff] }
  0xb7   : > { %6673 = vmatprep.mubr.f32.mxu1 %v8146_v45  ;;  %6718 = vmatpush3.msra.mxu0 %v5295_v46  ;;  %v8500_v45 = vld [vmem:[%s7764_s9 + $0x152] sm:$0xff] }
  0xb8   : > { %6597 = vmatmul.mubr.f32.gmra.mxu0 %v7857_v60  ;;  %6719 = vmatprep.subr.mxu0 %v5294_v48  ;;  %v5345_v60 = vld [vmem:[%s11039_s1 + $0x3f8] sm:$0xff]  ;;  %v5262_v46 = vld [vmem:[%s7764_s9 + $0x90] sm:$0xff] }
  0xb9   : > { %6599 = vmatprep.mubr.f32.mxu0 %v7873_v0  ;;  %6720 = vmatpush3.msra.mxu0 %v5294_v48  ;;  %v5344_v0 = vld [vmem:[%s11039_s1 + $0x3f0] sm:$0xff] }
  0xba   : > { %6674 = vmatmul.mubr.f32.gmra.mxu1 %v8153_v59  ;;  %6721 = vmatprep.subr.mxu0 %v5293_v52  ;;  %v5331_v59 = vld [vmem:[%s11039_s1 + $0x388] sm:$0xff] }
  0xbb   : > { %6676 = vmatprep.mubr.f32.mxu1 %v8165_v61  ;;  %6722 = vmatpush3.msra.mxu0 %v5293_v52  ;;  %v5254_v61 = vld [vmem:[%s7764_s9 + $0x40] sm:$0xff]  ;;  %v5307_v48 = vld [vmem:[%s7764_s9 + $0x89] sm:$0xff] }
  0xbc   : > { %6600 = vmatmul.mubr.f32.gmra.mxu0 %v7879_v2  ;;  %6723 = vmatprep.subr.mxu0 %v5292_v54  ;;  %v5290_v2 = vld [vmem:[%s11039_s1 + $0x330] sm:$0xff] }
  0xbd   : > { %6602 = vmatprep.mubr.f32.mxu0 %v7895_v6  ;;  %6724 = vmatpush3.msra.mxu0 %v5292_v54  ;;  %v5343_v6 = vld [vmem:[%s11039_s1 + $0x3e8] sm:$0xff] }
  0xbe   : > { %6677 = vmatmul.mubr.f32.gmra.mxu1 %v8169_v1  ;;  %6725 = vmatprep.subr.mxu0 %v5291_v58  ;;  %v5255_v1 = vld [vmem:[%s7764_s9 + $0x48] sm:$0xff] }
  0xbf   : > { %6679 = vmatprep.mubr.f32.mxu1 %v8178_v29  ;;  %6786 = vmatprep.subr.mxu1 %v5345_v60  ;;  %v5330_v29 = vld [vmem:[%s11039_s1 + $0x380] sm:$0xff] }
  0xc0   : > { %6603 = vmatmul.mubr.f32.gmra.mxu0 %v7901_v8  ;;  %6787 = vmatpush3.msra.mxu1 %v5345_v60  ;;  %v5342_v8 = vld [vmem:[%s11039_s1 + $0x3e0] sm:$0xff] }
  0xc1   : > { %6605 = vmatprep.mubr.f32.mxu0 %v7917_v12  ;;  %6726 = vmatpush3.msra.mxu0 %v5291_v58  ;;  %v5289_v12 = vld [vmem:[%s11039_s1 + $0x328] sm:$0xff] }
  0xc2   : > { %6680 = vmatmul.mubr.f32.gmra.mxu1 %v8185_v7  ;;  %6788 = vmatprep.subr.mxu1 %v5344_v0  ;;  %v5391_v7 = vld [vmem:[%s11039_s1 + $0x478] sm:$0xff]  ;;  %v5385_v58 = vld [vmem:[%s11039_s1 + $0x448] sm:$0xff] }
  0xc3   : > { %6682 = vmatprep.mubr.f32.mxu1 %v8194_v47  ;;  %6789 = vmatpush3.msra.mxu1 %v5344_v0  ;;  %v5300_v47 = vld [vmem:[%s7764_s9 + $0x41] sm:$0xff]  ;;  %v5308_v0 = vld [vmem:[%s7764_s9 + $0x91] sm:$0xff] }
  0xc4   : > { %6606 = vmatmul.mubr.f32.gmra.mxu0 %v7926_v15  ;;  %6727 = vmatprep.subr.mxu0 %v5290_v2  ;;  %v5341_v15 = vld [vmem:[%s11039_s1 + $0x3d8] sm:$0xff] }
  0xc5   : > { %6608 = vmatprep.mubr.f32.mxu0 %v7941_v19  ;;  %6790 = vmatprep.subr.mxu1 %v5343_v6  ;;  %v5340_v19 = vld [vmem:[%s11039_s1 + $0x3d0] sm:$0xff] }
  0xc6   : > { %6683 = vmatmul.mubr.f32.gmra.mxu1 %v8201_v49  ;;  %6728 = vmatpush3.msra.mxu0 %v5290_v2  ;;  %v5301_v49 = vld [vmem:[%s7764_s9 + $0x49] sm:$0xff]  ;;  %v5263_v2 = vld [vmem:[%s7764_s9 + $0xa0] sm:$0xff] }
  0xc7   : > { %6685 = vmatprep.mubr.f32.mxu1 %v8213_v16  ;;  %6791 = vmatpush3.msra.mxu1 %v5343_v6  ;;  %v5256_v16 = vld [vmem:[%s7764_s9 + $0x50] sm:$0xff] }
  0xc8   : > { %6609 = vmatmul.mubr.f32.gmra.mxu0 %v7948_v21  ;;  %6792 = vmatprep.subr.mxu1 %v5342_v8  ;;  %v5288_v21 = vld [vmem:[%s11039_s1 + $0x320] sm:$0xff] }
  0xc9   : > { %6611 = vmatprep.mubr.f32.mxu0 %v7964_v25  ;;  %6793 = vmatpush3.msra.mxu1 %v5342_v8  ;;  %v5339_v25 = vld [vmem:[%s11039_s1 + $0x3c8] sm:$0xff] }
  0xca   : > { %6686 = vmatmul.mubr.f32.gmra.mxu1 %v8217_v20  ;;  %6729 = vmatprep.subr.mxu0 %v5289_v12  ;;  %v5390_v20 = vld [vmem:[%s11039_s1 + $0x470] sm:$0xff] }
  0xcb   : > { %6688 = vmatprep.mubr.f32.mxu1 %v8226_v56  ;;  %6794 = vmatprep.subr.mxu1 %v5341_v15  ;;  %v5257_v56 = vld [vmem:[%s7764_s9 + $0x60] sm:$0xff] }
  0xcc   : > { %6612 = vmatmul.mubr.f32.gmra.mxu0 %v7970_v27  ;;  %6795 = vmatpush3.msra.mxu1 %v5341_v15  ;;  %v5338_v27 = vld [vmem:[%s11039_s1 + $0x3c0] sm:$0xff] }
  0xcd   : > { %6614 = vmatprep.mubr.f32.mxu0 %v7986_v31  ;;  %6730 = vmatpush3.msra.mxu0 %v5289_v12  ;;  %v5287_v31 = vld [vmem:[%s11039_s1 + $0x318] sm:$0xff]  ;;  %v5384_v12 = vld [vmem:[%s11039_s1 + $0x440] sm:$0xff] }
  0xce   : > { %6689 = vmatmul.mubr.f32.gmra.mxu1 %v8233_v26  ;;  %6796 = vmatprep.subr.mxu1 %v5340_v19  ;;  %v5302_v26 = vld [vmem:[%s7764_s9 + $0x51] sm:$0xff] }
  0xcf   : > { %6691 = vmatprep.mubr.f32.mxu1 %v8242_v4  ;;  %6797 = vmatpush3.msra.mxu1 %v5340_v19  ;;  %v5258_v4 = vld [vmem:[%s7764_s9 + $0x68] sm:$0xff] }
  0xd0   : > { %6615 = vmatmul.mubr.f32.gmra.mxu0 %v7992_v33  ;;  %6731 = vmatprep.subr.mxu0 %v5288_v21  ;;  %v5337_v33 = vld [vmem:[%s11039_s1 + $0x3b8] sm:$0xff]  ;;  %v5264_v19 = vld [vmem:[%s7764_s9 + $0xa8] sm:$0xff] }
  0xd1   : > { %6617 = vmatprep.mubr.f32.mxu0 %v8008_v37  ;;  %6798 = vmatprep.subr.mxu1 %v5339_v25  ;;  %v5336_v37 = vld [vmem:[%s11039_s1 + $0x3b0] sm:$0xff] }
  0xd2   : > { %6692 = vmatmul.mubr.f32.gmra.mxu1 %v8249_v3  ;;  %6732 = vmatpush3.msra.mxu0 %v5288_v21  ;;  %v5303_v3 = vld [vmem:[%s7764_s9 + $0x61] sm:$0xff] }
  0xd3   : > { %6694 = vmatprep.mubr.f32.mxu1 %v8258_v44  ;;  %6799 = vmatpush3.msra.mxu1 %v5339_v25  ;;  %v5389_v44 = vld [vmem:[%s11039_s1 + $0x468] sm:$0xff] }
  0xd4   : > { %6618 = vmatmul.mubr.f32.gmra.mxu0 %v8014_v39  ;;  %6800 = vmatprep.subr.mxu1 %v5338_v27  ;;  %v5286_v39 = vld [vmem:[%s11039_s1 + $0x310] sm:$0xff]  ;;  %v5309_v21 = vld [vmem:[%s7764_s9 + $0xa1] sm:$0xff] }
  0xd5   : > { %6620 = vmatprep.mubr.f32.mxu0 %v8026_v50  ;;  %6733 = vmatprep.subr.mxu0 %v5287_v31  ;;  %v5335_v50 = vld [vmem:[%s11039_s1 + $0x3a8] sm:$0xff] }
  0xd6   : > { %6695 = vmatmul.mubr.f32.gmra.mxu1 %v8265_v9  ;;  %6734 = vmatpush3.msra.mxu0 %v5287_v31  ;;  %v5304_v9 = vld [vmem:[%s7764_s9 + $0x69] sm:$0xff]  ;;  %v5383_v31 = vld [vmem:[%s11039_s1 + $0x438] sm:$0xff] }
  0xd7   : > { %6697 = vmatprep.mubr.f32.mxu1 %v8277_v40  ;;  %6801 = vmatpush3.msra.mxu1 %v5338_v27  ;;  %v5259_v40 = vld [vmem:[%s7764_s9 + $0x70] sm:$0xff] }
  0xd8   : > { %6621 = vmatmul.mubr.f32.gmra.mxu0 %v8036_v57  ;;  %6802 = vmatprep.subr.mxu1 %v5337_v33  ;;  %v8463_v57 = vld [vmem:[%s7764_s9 + $0x141] sm:$0xff] }
  0xd9   : > { %6623 = vmatprep.mubr.f32.mxu0 %v8051_v5  ;;  %6803 = vmatpush3.msra.mxu1 %v5337_v33  ;;  %v5334_v5 = vld [vmem:[%s11039_s1 + $0x3a0] sm:$0xff] }
  0xda   : > { %6698 = vmatmul.mubr.f32.gmra.mxu1 %v8285_v36  ;;  %6804 = vmatprep.subr.mxu1 %v5336_v37  ;;  %v5388_v36 = vld [vmem:[%s11039_s1 + $0x460] sm:$0xff] }
  0xdb   : > { %6700 = vmatprep.mubr.f32.mxu1 %v8289_v55  ;;  %6735 = vmatprep.subr.mxu0 %v5286_v39  ;;  %v5260_v55 = vld [vmem:[%s7764_s9 + $0x80] sm:$0xff] }
  0xdc   : > { %6624 = vmatmul.mubr.f32.gmra.mxu0 %v8061_v14  ;;  %6805 = vmatpush3.msra.mxu1 %v5336_v37  ;;  %v8475_v14 = vld [vmem:[%s7764_s9 + $0x142] sm:$0xff] }
  0xdd   : > { %6736 = vmatpush3.msra.mxu0 %v5286_v39  ;;  %6806 = vmatprep.subr.mxu1 %v5335_v50  ;;  %v5310_v37 = vld [vmem:[%s7764_s9 + $0xa9] sm:$0xff] }
  0xde   : > { %6701 = vmatmul.mubr.f32.gmra.mxu1 %v8308_v63  ;;  %6626 = vmatprep.mubr.f32.mxu0 %v8069_v18  ;;  %v8485_v18 = vld [vmem:[%s7764_s9 + $0x151] sm:$0xff] }
  0xdf   : > { %6807 = vmatpush3.msra.mxu1 %v5335_v50  ;;  %6703 = vmatprep.mubr.f32.mxu1 %v8311_v28  ;;  %v5265_v39 = vld [vmem:[%s7764_s9 + $0xb0] sm:$0xff] }
  0xe0   : > { %6627 = vmatmul.mubr.f32.gmra.mxu0 %v8463_v57  ;;  %6808 = vmatprep.subr.mxu1 %v5334_v5 }
  0xe1   : > { %6737 = vmatprep.subr.mxu0 %v5285_v11  ;;  %6809 = vmatpush3.msra.mxu1 %v5334_v5 }
  0xe2   : > { %6704 = vmatmul.mubr.f32.gmra.mxu1 %v8475_v14  ;;  %6738 = vmatpush3.msra.mxu0 %v5285_v11  ;;  %v5382_v11 = vld [vmem:[%s11039_s1 + $0x430] sm:$0xff] }
  0xe3   : > { %6810 = vmatprep.subr.mxu1 %v5333_v24  ;;  %6629 = vmatprep.mubr.f32.mxu0 %v8482_v42 }
  0xe4   : > { %6811 = vmatpush3.msra.mxu1 %v5333_v24  ;;  %6630 = vmatmul.mubr.f32.gmra.mxu0 %v8485_v18 }
  0xe5   : > { %6812 = vmatprep.subr.mxu1 %v5332_v30  ;;  %6706 = vmatprep.mubr.f32.mxu1 %v8492_v35 }
  0xe6   : > { %6739 = vmatprep.subr.mxu0 %v5284_v53  ;;  %6813 = vmatpush3.msra.mxu1 %v5332_v30  ;;  %v5266_v30 = vld [vmem:[%s7764_s9 + $0xc0] sm:$0xff] }
  0xe7   : > { %6707 = vmatmul.mubr.f32.gmra.mxu1 %v8500_v45  ;;  %6740 = vmatpush3.msra.mxu0 %v5284_v53  ;;  %v5311_v53 = vld [vmem:[%s7764_s9 + $0xb1] sm:$0xff] }
  0xe8   : > { %6814 = vmatprep.subr.mxu1 %v5331_v59  ;;  %6741 = vmatprep.mubr.f32.mxu0 %v5254_v61 }
  0xe9   : > { %6815 = vmatpush3.msra.mxu1 %v5331_v59  ;;  %6742 = vmatmul.mubr.f32.vlgmr.msra.gmra.mxu0 %v5255_v1  ;;  %v5381_v1 = vld [vmem:[%s11039_s1 + $0x428] sm:$0xff] }
  0xea   : > { %6816 = vmatprep.subr.mxu1 %v5330_v29  ;;  %6863 = vmatprep.subr.mxu0 %v5391_v7 }
  0xeb   : > { %6817 = vmatpush3.msra.mxu1 %v5330_v29  ;;  %6818 = vmatprep.mubr.f32.mxu1 %v5300_v47  ;;  %v5267_v47 = vld [vmem:[%s7764_s9 + $0xc8] sm:$0xff] }
  0xec   : > { %6864 = vmatpush3.msra.mxu0 %v5391_v7  ;;  %6819 = vmatmul.mubr.f32.vlgmr.msra.gmra.mxu1 %v5301_v49  ;;  %v5312_v7 = vld [vmem:[%s7764_s9 + $0xc1] sm:$0xff] }
  0xed   : > { %6744 = vmatprep.mubr.f32.mxu0 %v5256_v16  ;;  %6865 = vmatprep.subr.mxu0 %v5390_v20 }
  0xee   : > { %6745 = vmatmul.mubr.f32.gmra.mxu0 %v5257_v56  ;;  %6821 = vmatprep.mubr.f32.mxu1 %v5302_v26  ;;  %v5268_v26 = vld [vmem:[%s7764_s9 + $0xd0] sm:$0xff] }
  0xef   : > { %6866 = vmatpush3.msra.mxu0 %v5390_v20  ;;  %6747 = vmatprep.mubr.f32.mxu0 %v5258_v4  ;;  %v5380_v20 = vld [vmem:[%s11039_s1 + $0x420] sm:$0xff]  ;;  %v5313_v4 = vld [vmem:[%s7764_s9 + $0xc9] sm:$0xff] }
  0xf0   : > { %6822 = vmatmul.mubr.f32.gmra.mxu1 %v5303_v3  ;;  %6867 = vmatprep.subr.mxu0 %v5389_v44  ;;  %v6281_v63 = vpop.f32.mrf.mxu0 }
  0xf1   : > { %6824 = vmatprep.mubr.f32.mxu1 %v5304_v9  ;;  %6868 = vmatpush3.msra.mxu0 %v5389_v44  ;;  %v6358_v28 = vpop.f32.mrf.mxu1  ;;  %v5379_v9 = vld [vmem:[%s11039_s1 + $0x418] sm:$0xff] }
  0xf2   : > { %6748 = vmatmul.mubr.f32.gmra.mxu0 %v5259_v40  ;;  %v8538_v34 = vadd.f32 %v6358_v28, %v6281_v63  ;;  %6869 = vmatprep.subr.mxu0 %v5388_v36  ;;  %v466_v62 = vpop.f32.mrf.mxu0  ;;  %v5378_v28 = vld [vmem:[%s11039_s1 + $0x410] sm:$0xff] }
  0xf3   : > { %6750 = vmatprep.mubr.f32.mxu0 %v5260_v55  ;;  %6870 = vmatpush3.msra.mxu0 %v5388_v36  ;;  %v681_v10 = vpop.f32.mrf.mxu1  ;;  %v5314_v36 = vld [vmem:[%s7764_s9 + $0xd1] sm:$0xff]  ;;  %v5269_v55 = vld [vmem:[%s7764_s9 + $0xe0] sm:$0xff] }
  0xf4   : > { %6825 = vmatmul.mubr.f32.gmra.mxu1 %v5305_v17  ;;  %v8545_v43 = vadd.f32 %v681_v10, %v466_v62  ;;  %6871 = vmatprep.subr.mxu0 %v5387_v23  ;;  %v6284_v52 = vpop.f32.mrf.mxu0  ;;  %v5377_v10 = vld [vmem:[%s11039_s1 + $0x408] sm:$0xff] }
  0xf5   : > { %6827 = vmatprep.mubr.f32.mxu1 %v5306_v13  ;;  %v6361_v54 = vpop.f32.mrf.mxu1  ;;  %6872 = vmatpush3.msra.mxu0 %v5387_v23  ;;  %v5270_v23 = vld [vmem:[%s7764_s9 + $0xe8] sm:$0xff] }
  0xf6   : > { %6751 = vmatmul.mubr.f32.gmra.mxu0 %v5261_v51  ;;  %v8552_v60 = vadd.f32 %v6361_v54, %v6284_v52  ;;  %6873 = vmatprep.subr.mxu0 %v5386_v41  ;;  %v476_v6 = vpop.f32.mrf.mxu0  ;;  %v5315_v13 = vld [vmem:[%s7764_s9 + $0xe1] sm:$0xff] }
  0xf7   : > { %6753 = vmatprep.mubr.f32.mxu0 %v5262_v46  ;;  %v691_v8 = vpop.f32.mrf.mxu1  ;;  %6874 = vmatpush3.msra.mxu0 %v5386_v41  ;;  %v5316_v46 = vld [vmem:[%s7764_s9 + $0xe9] sm:$0xff] }
  0xf8   : > { %6828 = vmatmul.mubr.f32.gmra.mxu1 %v5307_v48  ;;  %v8559_v15 = vadd.f32 %v691_v8, %v476_v6  ;;  %6875 = vmatprep.subr.mxu0 %v5385_v58  ;;  %v5271_v48 = vld [vmem:[%s7764_s9 + $0xf0] sm:$0xff] }
  0xf9   : > { %6830 = vmatprep.mubr.f32.mxu1 %v5308_v0  ;;  %v6287_v25 = vpop.f32.mrf.mxu0  ;;  %v6364_v27 = vpop.f32.mrf.mxu1  ;;  %6876 = vmatpush3.msra.mxu0 %v5385_v58  ;;  %v5376_v58 = vld [vmem:[%s11039_s1 + $0x400] sm:$0xff] }
  0xfa   : > { %6754 = vmatmul.mubr.f32.gmra.mxu0 %v5263_v2  ;;  %v8566_v33 = vadd.f32 %v6364_v27, %v6287_v25  ;;  %6877 = vmatprep.subr.mxu0 %v5384_v12  ;;  %v5272_v0 = vld [vmem:[%s7764_s9 + $0x100] sm:$0xff]  ;;  %v5317_v2 = vld [vmem:[%s7764_s9 + $0xf1] sm:$0xff] }
  0xfb   : > { %6756 = vmatprep.mubr.f32.mxu0 %v5264_v19  ;;  %v486_v50 = vpop.f32.mrf.mxu0  ;;  %v701_v5 = vpop.f32.mrf.mxu1  ;;  %6878 = vmatpush3.msra.mxu0 %v5384_v12  ;;  %v5318_v19 = vld [vmem:[%s7764_s9 + $0x101] sm:$0xff] }
  0xfc   : > { %6831 = vmatmul.mubr.f32.gmra.mxu1 %v5309_v21  ;;  %v8573_v24 = vadd.f32 %v701_v5, %v486_v50  ;;  %6879 = vmatprep.subr.mxu0 %v5383_v31  ;;  %v5273_v21 = vld [vmem:[%s7764_s9 + $0x108] sm:$0xff] }
  0xfd   : > { %6833 = vmatprep.mubr.f32.mxu1 %v5310_v37  ;;  %v6290_v59 = vpop.f32.mrf.mxu0  ;;  %v6367_v61 = vpop.f32.mrf.mxu1  ;;  %6880 = vmatpush3.msra.mxu0 %v5383_v31  ;;  %v5274_v31 = vld [vmem:[%s7764_s9 + $0x110] sm:$0xff] }
  0xfe   : > { %6757 = vmatmul.mubr.f32.gmra.mxu0 %v5265_v39  ;;  %v8580_v29 = vadd.f32 %v6367_v61, %v6290_v59  ;;  %6881 = vmatprep.subr.mxu0 %v5382_v11  ;;  %v5319_v37 = vld [vmem:[%s7764_s9 + $0x109] sm:$0xff] }
  0xff   : > { %6759 = vmatprep.mubr.f32.mxu0 %v5266_v30  ;;  %v496_v49 = vpop.f32.mrf.mxu0  ;;  %v711_v16 = vpop.f32.mrf.mxu1  ;;  %6882 = vmatpush3.msra.mxu0 %v5382_v11  ;;  %v5320_v11 = vld [vmem:[%s7764_s9 + $0x111] sm:$0xff]  ;;  %v5275_v30 = vld [vmem:[%s7764_s9 + $0x120] sm:$0xff]  ;;  %v5276_v61 = vld [vmem:[%s7764_s9 + $0x128] sm:$0xff] }
 0x100   : > { %6834 = vmatmul.mubr.f32.gmra.mxu1 %v5311_v53  ;;  %v8587_v56 = vadd.f32 %v711_v16, %v496_v49  ;;  %6883 = vmatprep.subr.mxu0 %v5381_v1  ;;  %v5322_v16 = vld [vmem:[%s7764_s9 + $0x129] sm:$0xff] }
 0x101   : > { %6836 = vmatprep.mubr.f32.mxu1 %v5312_v7  ;;  %v6293_v3 = vpop.f32.mrf.mxu0  ;;  %v6370_v44 = vpop.f32.mrf.mxu1  ;;  %6884 = vmatpush3.msra.mxu0 %v5381_v1  ;;  %v5321_v1 = vld [vmem:[%s7764_s9 + $0x121] sm:$0xff] }
 0x102   : > { %6760 = vmatmul.mubr.f32.gmra.mxu0 %v5267_v47  ;;  %v8594_v40 = vadd.f32 %v6370_v44, %v6293_v3  ;;  %6885 = vmatprep.subr.mxu0 %v5380_v20  ;;  %v5323_v3 = vld [vmem:[%s7764_s9 + $0x131] sm:$0xff] }
 0x103   : > { %6762 = vmatprep.mubr.f32.mxu0 %v5268_v26  ;;  %v8598_v17 = vpop.f32.mrf.mxu0  ;;  %v8600_v63 = vpop.f32.mrf.mxu1  ;;  %6886 = vmatpush3.msra.mxu0 %v5380_v20  ;;  %v5277_v20 = vld [vmem:[%s7764_s9 + $0x130] sm:$0xff] }
 0x104   : > { %6837 = vmatmul.mubr.f32.gmra.mxu1 %v5313_v4  ;;  %6887 = vmatprep.subr.mxu0 %v5379_v9 }
 0x105   : > { %6839 = vmatprep.mubr.f32.mxu1 %v5314_v36  ;;  %v6296_v51 = vpop.f32.mrf.mxu0  ;;  %v6373_v62 = vpop.f32.mrf.mxu1  ;;  %6888 = vmatpush3.msra.mxu0 %v5379_v9 }
 0x106   : > { %6763 = vmatmul.mubr.f32.gmra.mxu0 %v5269_v55  ;;  %v8610_v41 = vadd.f32 %v6373_v62, %v6296_v51  ;;  %6889 = vmatprep.subr.mxu0 %v5378_v28  ;;  %v5281_v62 = vld [vmem:[%s7764_s9 + $0x160] sm:$0xff] }
 0x107   : > { %6765 = vmatprep.mubr.f32.mxu0 %v5270_v23  ;;  %v8614_v52 = vpop.f32.mrf.mxu0  ;;  %v8616_v54 = vpop.f32.mrf.mxu1  ;;  %6890 = vmatpush3.msra.mxu0 %v5378_v28 }
 0x108   : > { %6840 = vmatmul.mubr.f32.gmra.mxu1 %v5315_v13  ;;  %6891 = vmatprep.subr.mxu0 %v5377_v10 }
 0x109   : > { %6842 = vmatprep.mubr.f32.mxu1 %v5316_v46  ;;  %v6299_v6 = vpop.f32.mrf.mxu0  ;;  %v6376_v8 = vpop.f32.mrf.mxu1  ;;  %6892 = vmatpush3.msra.mxu0 %v5377_v10  ;;  %v5327_v46 = vld [vmem:[%s7764_s9 + $0x161] sm:$0xff] }
 0x10a   : > { %6766 = vmatmul.mubr.f32.gmra.mxu0 %v5271_v48  ;;  %v8623_v12 = vadd.f32 %v6376_v8, %v6299_v6  ;;  %6893 = vmatprep.subr.mxu0 %v5376_v58  ;;  %v5329_v8 = vld [vmem:[%s7764_s9 + $0x171] sm:$0xff] }
 0x10b   : > { %6768 = vmatprep.mubr.f32.mxu0 %v5272_v0  ;;  %v8627_v25 = vpop.f32.mrf.mxu0  ;;  %v8629_v27 = vpop.f32.mrf.mxu1  ;;  %6894 = vmatpush3.msra.mxu0 %v5376_v58  ;;  %v5283_v0 = vld [vmem:[%s7764_s9 + $0x170] sm:$0xff] }
 0x10c   : > { %6843 = vmatmul.mubr.f32.gmra.mxu1 %v5317_v2 }
 0x10d   : > { %6845 = vmatprep.mubr.f32.mxu1 %v5318_v19  ;;  %v6302_v39 = vpop.f32.mrf.mxu0  ;;  %v6379_v50 = vpop.f32.mrf.mxu1 }
 0x10e   : > { %6769 = vmatmul.mubr.f32.gmra.mxu0 %v5273_v21  ;;  %v8633_v5 = vadd.f32 %v6379_v50, %v6302_v39  ;;  %v5348_v50 = vld [vmem:[%s7764_s9 + $0x52] sm:$0xff] }
 0x10f   : > { %6771 = vmatprep.mubr.f32.mxu0 %v5274_v31  ;;  %v8637_v53 = vpop.f32.mrf.mxu0  ;;  %v8639_v59 = vpop.f32.mrf.mxu1  ;;  %v5347_v31 = vld [vmem:[%s7764_s9 + $0x4a] sm:$0xff] }
 0x110   : > { %6846 = vmatmul.mubr.f32.gmra.mxu1 %v5319_v37 }
 0x111   : > { %6848 = vmatprep.mubr.f32.mxu1 %v5320_v11  ;;  %v6305_v7 = vpop.f32.mrf.mxu0  ;;  %v6382_v47 = vpop.f32.mrf.mxu1 }
 0x112   : > { %6772 = vmatmul.mubr.f32.gmra.mxu0 %v5275_v30  ;;  %v8643_v49 = vadd.f32 %v6382_v47, %v6305_v7 }
 0x113   : > { %6774 = vmatprep.mubr.f32.mxu0 %v5276_v61  ;;  %v8647_v26 = vpop.f32.mrf.mxu0  ;;  %v8649_v4 = vpop.f32.mrf.mxu1 }
 0x114   : > { %6849 = vmatmul.mubr.f32.gmra.mxu1 %v5321_v1  ;;  %v5349_v1 = vld [vmem:[%s7764_s9 + $0x62] sm:$0xff] }
 0x115   : > { %6851 = vmatprep.mubr.f32.mxu1 %v5322_v16  ;;  %v6308_v44 = vpop.f32.mrf.mxu0  ;;  %v6385_v9 = vpop.f32.mrf.mxu1  ;;  %v5350_v16 = vld [vmem:[%s7764_s9 + $0x6a] sm:$0xff] }
 0x116   : > { %6775 = vmatmul.mubr.f32.gmra.mxu0 %v5277_v20  ;;  %v8652_v36 = vadd.f32 %v6385_v9, %v6308_v44  ;;  %v5351_v9 = vld [vmem:[%s7764_s9 + $0x72] sm:$0xff] }
 0x117   : > { %6777 = vmatprep.mubr.f32.mxu0 %v8301_v22  ;;  %v8655_v55 = vpop.f32.mrf.mxu0  ;;  %v8657_v28 = vpop.f32.mrf.mxu1 }
 0x118   : > { %6852 = vmatmul.mubr.f32.gmra.mxu1 %v5323_v3 }
 0x119   : > { %6854 = vmatprep.mubr.f32.mxu1 %v8463_v57  ;;  %v6311_v23 = vpop.f32.mrf.mxu0  ;;  %v6388_v13 = vpop.f32.mrf.mxu1  ;;  %v5282_v57 = vld [vmem:[%s7764_s9 + $0x168] sm:$0xff] }
 0x11a   : > { %6778 = vmatmul.mubr.f32.gmra.mxu0 %v8318_v32  ;;  %v8661_v51 = vadd.f32 %v6388_v13, %v6311_v23  ;;  %v5352_v13 = vld [vmem:[%s7764_s9 + $0x82] sm:$0xff] }
 0x11b   : > { %6780 = vmatprep.mubr.f32.mxu0 %v8326_v38  ;;  %v8665_v22 = vpop.f32.mrf.mxu0  ;;  %v8667_v10 = vpop.f32.mrf.mxu1  ;;  %v5328_v38 = vld [vmem:[%s7764_s9 + $0x169] sm:$0xff] }
 0x11c   : > { %6855 = vmatmul.mubr.f32.gmra.mxu1 %v8482_v42  ;;  %v5346_v42 = vld [vmem:[%s7764_s9 + $0x42] sm:$0xff] }
 0x11d   : > { %6857 = vmatprep.mubr.f32.mxu1 %v8485_v18  ;;  %v6314_v48 = vpop.f32.mrf.mxu0  ;;  %v6391_v32 = vpop.f32.mrf.mxu1 }
 0x11e   : > { %6781 = vmatmul.mubr.f32.gmra.mxu0 %v5281_v62  ;;  %v8673_v58 = vadd.f32 %v6391_v32, %v6314_v48  ;;  %v5353_v48 = vld [vmem:[%s7764_s9 + $0x8a] sm:$0xff] }
 0x11f   : > { %6783 = vmatprep.mubr.f32.mxu0 %v5282_v57  ;;  %v8677_v2 = vpop.f32.mrf.mxu0  ;;  %v8679_v6 = vpop.f32.mrf.mxu1 }
 0x120   : > { %6858 = vmatmul.mubr.f32.gmra.mxu1 %v5327_v46 }
 0x121   : > { %6860 = vmatprep.mubr.f32.mxu1 %v5328_v38  ;;  %v6317_v18 = vpop.f32.mrf.mxu0  ;;  %v6394_v19 = vpop.f32.mrf.mxu1 }
 0x122   : > { %6784 = vmatmul.mubr.f32.gmra.mxu0 %v5283_v0  ;;  %v8683_v21 = vadd.f32 %v6394_v19, %v6317_v18 }
 0x123   : > { %6895 = vmatprep.mubr.f32.mxu0 %v5346_v42  ;;  %v8686_v37 = vpop.f32.mrf.mxu0  ;;  %v8688_v39 = vpop.f32.mrf.mxu1  ;;  %v5354_v42 = vld [vmem:[%s7764_s9 + $0x92] sm:$0xff] }
 0x124   : > { %6861 = vmatmul.mubr.f32.gmra.mxu1 %v5329_v8 }
 0x125   : > { %v6320_v11 = vpop.f32.mrf.mxu0  ;;  %v6397_v30 = vpop.f32.mrf.mxu1 }
 0x126   : > { %6896 = vmatmul.mubr.f32.vlgmr.msra.gmra.mxu0 %v5347_v31  ;;  %v8691_v61 = vadd.f32 %v6397_v30, %v6320_v11  ;;  %v5355_v31 = vld [vmem:[%s7764_s9 + $0xa2] sm:$0xff]  ;;  %v5356_v30 = vld [vmem:[%s7764_s9 + $0xaa] sm:$0xff] }
 0x127   : > { %6898 = vmatprep.mubr.f32.mxu0 %v5348_v50  ;;  %v8694_v7 = vpop.f32.mrf.mxu0  ;;  %v8696_v47 = vpop.f32.mrf.mxu1 }
 0x129   : > { %v6323_v20 = vpop.f32.mrf.mxu0  ;;  %v6400_v3 = vpop.f32.mrf.mxu1 }
 0x12a   : > { %6899 = vmatmul.mubr.f32.gmra.mxu0 %v5349_v1  ;;  %v8699_v44 = vadd.f32 %v6400_v3, %v6323_v20 }
 0x12b   : > { %6901 = vmatprep.mubr.f32.mxu0 %v5350_v16  ;;  %v8702_v23 = vpop.f32.mrf.mxu0  ;;  %v8705_v57 = vpop.f32.mrf.mxu1 }
 0x12d   : > { %v6435_v62 = vpop.f32.mrf.mxu0 }
 0x12e   : > { %6902 = vmatmul.mubr.f32.gmra.mxu0 %v5351_v9  ;;  %v1093_v46 = vadd.f32 %v6435_v62, %v8538_v34  ;;  %v5357_v9 = vld [vmem:[%s7764_s9 + $0xb2] sm:$0xff]  ;;  %v5358_v62 = vld [vmem:[%s7764_s9 + $0xc2] sm:$0xff] }
 0x12f   : > { %6904 = vmatprep.mubr.f32.mxu0 %v5352_v13  ;;  %v943_v32 = vpop.f32.mrf.mxu0 }
 0x130   : > { %v8710_v38 = vadd.f32 %v943_v32, %v8545_v43  ;;  %v6512_v0 = vpop.f32.mrf.mxu1 }
 0x131   : > { %v8713_v8 = vadd.f32 %v6512_v0, %v1093_v46  ;;  %v6438_v18 = vpop.f32.mrf.mxu0 }
 0x132   : > { %6905 = vmatmul.mubr.f32.gmra.mxu0 %v5353_v48  ;;  %v8715_v19 = vpop.f32.mrf.mxu1  ;;  %v1095_v34 = vadd.f32 %v6438_v18, %v8552_v60 }
 0x133   : > { %6907 = vmatprep.mubr.f32.mxu0 %v5354_v42  ;;  %v953_v50 = vpop.f32.mrf.mxu0  ;;  %v5359_v42 = vld [vmem:[%s7764_s9 + $0xca] sm:$0xff] }
 0x134   : > { %v6515_v11 = vpop.f32.mrf.mxu1  ;;  %v8721_v43 = vadd.f32 %v953_v50, %v8559_v15 }
 0x135   : > { %v8723_v1 = vadd.f32 %v6515_v11, %v1095_v34  ;;  %v6441_v16 = vpop.f32.mrf.mxu0  ;;  %v5360_v34 = vld [vmem:[%s7764_s9 + $0xd2] sm:$0xff] }
 0x136   : > { %6908 = vmatmul.mubr.f32.gmra.mxu0 %v5355_v31  ;;  %v8725_v20 = vpop.f32.mrf.mxu1  ;;  %v1097_v3 = vadd.f32 %v6441_v16, %v8566_v33  ;;  %v5361_v16 = vld [vmem:[%s7764_s9 + $0xe2] sm:$0xff] }
 0x137   : > { %6910 = vmatprep.mubr.f32.mxu0 %v5356_v30  ;;  %v963_v60 = vpop.f32.mrf.mxu0 }
 0x138   : > { %v6518_v13 = vpop.f32.mrf.mxu1  ;;  %v8731_v46 = vadd.f32 %v963_v60, %v8573_v24 }
 0x139   : > { %v8733_v15 = vadd.f32 %v6518_v13, %v1097_v3 }
 0x13a   : > { %6911 = vmatmul.mubr.f32.gmra.mxu0 %v5357_v9  ;;  %v6444_v48 = vpop.f32.mrf.mxu0  ;;  %v8735_v32 = vpop.f32.mrf.mxu1  ;;  %v5362_v9 = vld [vmem:[%s7764_s9 + $0xea] sm:$0xff] }
 0x13b   : > { %6913 = vmatprep.mubr.f32.mxu0 %v5358_v62  ;;  %v1099_v0 = vadd.f32 %v6444_v48, %v8580_v29  ;;  %v5363_v48 = vld [vmem:[%s7764_s9 + $0xf2] sm:$0xff] }
 0x13c   : > { %v973_v33 = vpop.f32.mrf.mxu0  ;;  %v6521_v18 = vpop.f32.mrf.mxu1 }
 0x13d   : > { %v8741_v31 = vadd.f32 %v973_v33, %v8587_v56  ;;  %v8743_v24 = vadd.f32 %v6521_v18, %v1099_v0 }
 0x13e   : > { %6914 = vmatmul.mubr.f32.gmra.mxu0 %v5359_v42  ;;  %v6447_v50 = vpop.f32.mrf.mxu0  ;;  %v8745_v11 = vpop.f32.mrf.mxu1  ;;  %v5364_v42 = vld [vmem:[%s7764_s9 + $0x102] sm:$0xff] }
 0x13f   : > { %11085 = vst [vmem:[#allocation3_spill] sm:$0xff] %v8745_v11  ;;  %6916 = vmatprep.mubr.f32.mxu0 %v5360_v34  ;;  %v1101_v30 = vadd.f32 %v6447_v50, %v8594_v40 }
 0x140   : > { %v8749_v29 = vpop.f32.mrf.mxu0  ;;  %v6524_v3 = vpop.f32.mrf.mxu1 }
 0x141   : > { %v8752_v60 = vadd.f32 %v6524_v3, %v1101_v30  ;;  %v5365_v30 = vld [vmem:[%s7764_s9 + $0x10a] sm:$0xff]  ;;  %v5366_v3 = vld [vmem:[%s7764_s9 + $0x112] sm:$0xff] }
 0x142   : > { %6917 = vmatmul.mubr.f32.gmra.mxu0 %v5361_v16  ;;  %v6450_v56 = vpop.f32.mrf.mxu0  ;;  %v8754_v13 = vpop.f32.mrf.mxu1 }
 0x143   : > { %11086 = vst [vmem:[#allocation4_spill] sm:$0xff] %v8754_v13  ;;  %6919 = vmatprep.mubr.f32.mxu0 %v5362_v9  ;;  %v1103_v62 = vadd.f32 %v6450_v56, %v8610_v41 }
 0x144   : > { %v8758_v0 = vpop.f32.mrf.mxu0  ;;  %v6527_v40 = vpop.f32.mrf.mxu1 }
 0x145   : > { %v8761_v33 = vadd.f32 %v6527_v40, %v1103_v62  ;;  %v5367_v40 = vld [vmem:[%s7764_s9 + $0x122] sm:$0xff] }
 0x146   : > { %6920 = vmatmul.mubr.f32.gmra.mxu0 %v5363_v48  ;;  %v6453_v18 = vpop.f32.mrf.mxu0  ;;  %v8763_v34 = vpop.f32.mrf.mxu1 }
 0x147   : > { %11087 = vst [vmem:[#allocation5_spill] sm:$0xff] %v8763_v34  ;;  %6922 = vmatprep.mubr.f32.mxu0 %v5364_v42  ;;  %v1105_v50 = vadd.f32 %v6453_v18, %v8623_v12  ;;  %v5368_v12 = vld [vmem:[%s7764_s9 + $0x12a] sm:$0xff] }
 0x148   : > { %v8767_v16 = vpop.f32.mrf.mxu0  ;;  %v6530_v41 = vpop.f32.mrf.mxu1 }
 0x149   : > { %v8770_v9 = vadd.f32 %v6530_v41, %v1105_v50  ;;  %v5409_v41 = vld [vmem:[%s11040_s2 + $0xf8] sm:$0xff] }
 0x14a   : > { %6923 = vmatmul.mubr.f32.gmra.mxu0 %v5365_v30  ;;  %v6456_v56 = vpop.f32.mrf.mxu0  ;;  %v8772_v62 = vpop.f32.mrf.mxu1  ;;  %v5369_v30 = vld [vmem:[%s7764_s9 + $0x132] sm:$0xff]  ;;  %6940 = vmatprep.subr.mxu1 %v5409_v41 }
 0x14b   : > { %11088 = vst [vmem:[#allocation6_spill] sm:$0xff] %v8772_v62  ;;  %6925 = vmatprep.mubr.f32.mxu0 %v5366_v3  ;;  %v1107_v48 = vadd.f32 %v6456_v56, %v8633_v5  ;;  %6941 = vmatpush3.msra.mxu1 %v5409_v41 }
 0x14c   : > { %v8776_v34 = vpop.f32.mrf.mxu0  ;;  %v6533_v42 = vpop.f32.mrf.mxu1 }
 0x14d   : > { %v8779_v18 = vadd.f32 %v6533_v42, %v1107_v48 }
 0x14e   : > { %6926 = vmatmul.mubr.f32.gmra.mxu0 %v5367_v40  ;;  %v6459_v13 = vpop.f32.mrf.mxu0  ;;  %v8781_v11 = vpop.f32.mrf.mxu1 }
 0x14f   : > { %11089 = vst [vmem:[#allocation7_spill] sm:$0xff] %v8781_v11  ;;  %6928 = vmatprep.mubr.f32.mxu0 %v5368_v12  ;;  %v1109_v50 = vadd.f32 %v6459_v13, %v8643_v49  ;;  %v5408_v13 = vld [vmem:[%s11040_s2 + $0xf0] sm:$0xff] }
 0x150   : > { %v8788_v5 = vpop.f32.mrf.mxu0  ;;  %v6536_v3 = vpop.f32.mrf.mxu1  ;;  %6942 = vmatprep.subr.mxu1 %v5408_v13 }
 0x151   : > { %v8790_v56 = vadd.f32 %v6536_v3, %v1109_v50  ;;  %6943 = vmatpush3.msra.mxu1 %v5408_v13  ;;  %v5407_v3 = vld [vmem:[%s11040_s2 + $0xe8] sm:$0xff] }
 0x152   : > { %6929 = vmatmul.mubr.f32.gmra.mxu0 %v5369_v30  ;;  %v6462_v48 = vpop.f32.mrf.mxu0  ;;  %v8792_v40 = vpop.f32.mrf.mxu1  ;;  %6944 = vmatprep.subr.mxu1 %v5407_v3 }
 0x153   : > { %11090 = vst [vmem:[#allocation8_spill] sm:$0xff] %v8792_v40  ;;  %6931 = vmatprep.mubr.f32.mxu0 %v8475_v14  ;;  %v1111_v49 = vadd.f32 %v6462_v48, %v8652_v36  ;;  %v5373_v36 = vld [vmem:[%s7764_s9 + $0x162] sm:$0xff]  ;;  %6945 = vmatpush3.msra.mxu1 %v5407_v3 }
 0x154   : > { %v8799_v42 = vpop.f32.mrf.mxu0  ;;  %v6539_v12 = vpop.f32.mrf.mxu1 }
 0x155   : > { %v8801_v50 = vadd.f32 %v6539_v12, %v1111_v49  ;;  %v5374_v12 = vld [vmem:[%s7764_s9 + $0x16a] sm:$0xff] }
 0x156   : > { %6932 = vmatmul.mubr.f32.gmra.mxu0 %v8492_v35  ;;  %v6465_v30 = vpop.f32.mrf.mxu0  ;;  %v8804_v41 = vpop.f32.mrf.mxu1 }
 0x157   : > { %11091 = vst [vmem:[#allocation9_spill] sm:$0xff] %v8804_v41  ;;  %6934 = vmatprep.mubr.f32.mxu0 %v8500_v45  ;;  %v1113_v14 = vadd.f32 %v6465_v30, %v8661_v51  ;;  %v5375_v51 = vld [vmem:[%s7764_s9 + $0x172] sm:$0xff]  ;;  %v5406_v30 = vld [vmem:[%s11040_s2 + $0xe0] sm:$0xff] }
 0x158   : > { %v8812_v48 = vpop.f32.mrf.mxu0  ;;  %v6542_v49 = vpop.f32.mrf.mxu1  ;;  %6946 = vmatprep.subr.mxu1 %v5406_v30 }
 0x159   : > { %v8815_v13 = vadd.f32 %v6542_v49, %v1113_v14  ;;  %6947 = vmatpush3.msra.mxu1 %v5406_v30  ;;  %v5425_v14 = vld [vmem:[%s11040_s2 + $0x178] sm:$0xff] }
 0x15a   : > { %6935 = vmatmul.mubr.f32.gmra.mxu0 %v5373_v36  ;;  %v6468_v35 = vpop.f32.mrf.mxu0  ;;  %v8817_v41 = vpop.f32.mrf.mxu1  ;;  %7052 = vmatprep.subr.mxu0 %v5425_v14  ;;  %v5405_v49 = vld [vmem:[%s11040_s2 + $0xd8] sm:$0xff] }
 0x15b   : > { %11092 = vst [vmem:[#allocation10_spill] sm:$0xff] %v8817_v41  ;;  %6937 = vmatprep.mubr.f32.mxu0 %v5374_v12  ;;  %v1115_v45 = vadd.f32 %v6468_v35, %v8673_v58  ;;  %7053 = vmatpush3.msra.mxu0 %v5425_v14 }
 0x15c   : > { %v8824_v40 = vpop.f32.mrf.mxu0  ;;  %v6545_v11 = vpop.f32.mrf.mxu1  ;;  %6948 = vmatprep.subr.mxu1 %v5405_v49 }
 0x15d   : > { %v8826_v62 = vadd.f32 %v6545_v11, %v1115_v45  ;;  %v5424_v11 = vld [vmem:[%s11040_s2 + $0x170] sm:$0xff]  ;;  %6949 = vmatpush3.msra.mxu1 %v5405_v49 }
 0x15e   : > { %6938 = vmatmul.mubr.f32.gmra.mxu0 %v5375_v51  ;;  %v6471_v36 = vpop.f32.mrf.mxu0  ;;  %v8831_v3 = vpop.f32.mrf.mxu1  ;;  %7054 = vmatprep.subr.mxu0 %v5424_v11 }
 0x15f   : > { %11093 = vst [vmem:[#allocation11_spill] sm:$0xff] %v8831_v3  ;;  %v1117_v58 = vadd.f32 %v6471_v36, %v8683_v21  ;;  %7055 = vmatpush3.msra.mxu0 %v5424_v11  ;;  %v5423_v21 = vld [vmem:[%s11040_s2 + $0x168] sm:$0xff]  ;;  %v5404_v36 = vld [vmem:[%s11040_s2 + $0xd0] sm:$0xff] }
 0x160   : > { %v8840_v12 = vpop.f32.mrf.mxu0  ;;  %v6548_v35 = vpop.f32.mrf.mxu1  ;;  %7056 = vmatprep.subr.mxu0 %v5423_v21  ;;  %6950 = vmatprep.subr.mxu1 %v5404_v36  ;;  %v5420_v3 = vld [vmem:[%s11040_s2 + $0x150] sm:$0xff] }
 0x161   : > { %v8842_v45 = vadd.f32 %v6548_v35, %v1117_v58  ;;  %7057 = vmatpush3.msra.mxu0 %v5423_v21  ;;  %v5422_v58 = vld [vmem:[%s11040_s2 + $0x160] sm:$0xff]  ;;  %6951 = vmatpush3.msra.mxu1 %v5404_v36  ;;  %v5403_v36 = vld [vmem:[%s11040_s2 + $0xc8] sm:$0xff] }
 0x162   : > { %v6474_v51 = vpop.f32.mrf.mxu0  ;;  %v8847_v30 = vpop.f32.mrf.mxu1  ;;  %7058 = vmatprep.subr.mxu0 %v5422_v58  ;;  %6952 = vmatprep.subr.mxu1 %v5403_v36 }
 0x163   : > { %11094 = vst [vmem:[#allocation12_spill] sm:$0xff] %v8847_v30  ;;  %v1119_v14 = vadd.f32 %v6474_v51, %v8691_v61  ;;  %7059 = vmatpush3.msra.mxu0 %v5422_v58  ;;  %v5421_v61 = vld [vmem:[%s11040_s2 + $0x158] sm:$0xff]  ;;  %v5419_v58 = vld [vmem:[%s11040_s2 + $0x148] sm:$0xff]  ;;  %6953 = vmatpush3.msra.mxu1 %v5403_v36 }
 0x164   : > { %v8856_v49 = vpop.f32.mrf.mxu0  ;;  %v6551_v11 = vpop.f32.mrf.mxu1  ;;  %7060 = vmatprep.subr.mxu0 %v5421_v61 }
 0x165   : > { %v8858_v35 = vadd.f32 %v6551_v11, %v1119_v14  ;;  %7061 = vmatpush3.msra.mxu0 %v5421_v61 }
 0x166   : > { %v6477_v51 = vpop.f32.mrf.mxu0  ;;  %v8863_v30 = vpop.f32.mrf.mxu1  ;;  %7062 = vmatprep.subr.mxu0 %v5420_v3 }
 0x167   : > { %11095 = vst [vmem:[#allocation13_spill] sm:$0xff] %v8863_v30  ;;  %v1121_v21 = vadd.f32 %v6477_v51, %v8699_v44  ;;  %7063 = vmatpush3.msra.mxu0 %v5420_v3  ;;  %v5402_v51 = vld [vmem:[%s11040_s2 + $0xc0] sm:$0xff] }
 0x168   : > { %v8869_v41 = vpop.f32.mrf.mxu0  ;;  %7064 = vmatprep.subr.mxu0 %v5419_v58  ;;  %v5418_v3 = vld [vmem:[%s11040_s2 + $0x140] sm:$0xff]  ;;  %6954 = vmatprep.subr.mxu1 %v5402_v51 }
 0x169   : > { %v6554_v14 = vpop.f32.mrf.mxu1  ;;  %7065 = vmatpush3.msra.mxu0 %v5419_v58  ;;  %6955 = vmatpush3.msra.mxu1 %v5402_v51  ;;  %v5417_v58 = vld [vmem:[%s11040_s2 + $0x138] sm:$0xff]  ;;  %v5400_v51 = vld [vmem:[%s11040_s2 + $0xb0] sm:$0xff] }
 0x16a   : > { %v8877_v11 = vadd.f32 %v6554_v14, %v1121_v21  ;;  %7066 = vmatprep.subr.mxu0 %v5418_v3  ;;  %v5401_v14 = vld [vmem:[%s11040_s2 + $0xb8] sm:$0xff] }
 0x16b   : > { %v8879_v44 = vpop.f32.mrf.mxu1  ;;  %v6589_v61 = vpop.f32.mrf.mxu0  ;;  %7067 = vmatpush3.msra.mxu0 %v5418_v3  ;;  %6956 = vmatprep.subr.mxu1 %v5401_v14  ;;  %v5416_v3 = vld [vmem:[%s11040_s2 + $0x130] sm:$0xff] }
 0x16c   : > { %11096 = vst [vmem:[#allocation14_spill] sm:$0xff] %v8879_v44  ;;  %v8888_v30 = vadd.f32 %v6589_v61, %v8713_v8  ;;  %6957 = vmatpush3.msra.mxu1 %v5401_v14  ;;  %7068 = vmatprep.subr.mxu0 %v5417_v58 }
 0x16d   : > { %v8890_v21 = vpop.f32.mrf.mxu0  ;;  %7069 = vmatpush3.msra.mxu0 %v5417_v58  ;;  %6958 = vmatprep.subr.mxu1 %v5400_v51  ;;  %v5399_v58 = vld [vmem:[%s11040_s2 + $0xa8] sm:$0xff] }
 0x16e   : > { %v8895_v36 = vpop.f32.mrf.mxu1  ;;  %7070 = vmatprep.subr.mxu0 %v5416_v3  ;;  %6959 = vmatpush3.msra.mxu1 %v5400_v51  ;;  %v5398_v51 = vld [vmem:[%s11040_s2 + $0xa0] sm:$0xff] }
 0x16f   : > { %11097 = vst [vmem:[#allocation15_spill] sm:$0xff] %v8895_v36  ;;  %v6592_v8 = vpop.f32.mrf.mxu0  ;;  %7071 = vmatpush3.msra.mxu0 %v5416_v3  ;;  %6960 = vmatprep.subr.mxu1 %v5399_v58  ;;  %v5414_v3 = vld [vmem:[%s11040_s2 + $0x120] sm:$0xff] }
 0x170   : > { %v8900_v61 = vpop.f32.mrf.mxu1  ;;  %v8909_v44 = vadd.f32 %v6592_v8, %v8723_v1  ;;  %6961 = vmatpush3.msra.mxu1 %v5399_v58  ;;  %v5413_v58 = vld [vmem:[%s11040_s2 + $0x118] sm:$0xff] }
 0x171   : > { %11098 = vst [vmem:[#allocation16_spill] sm:$0xff] %v8900_v61  ;;  %v8911_v36 = vpop.f32.mrf.mxu0  ;;  %v5415_v61 = vld [vmem:[%s11040_s2 + $0x128] sm:$0xff]  ;;  %6962 = vmatprep.subr.mxu1 %v5398_v51 }
 0x172   : > { %11099 = vst [vmem:[#allocation17_spill] sm:$0xff] %v8909_v44  ;;  %11100 = vst [vmem:[#allocation18_spill] sm:$0xff] %v8911_v36  ;;  %v8913_v14 = vpop.f32.mrf.mxu1  ;;  %7072 = vmatprep.subr.mxu0 %v5415_v61  ;;  %6963 = vmatpush3.msra.mxu1 %v5398_v51  ;;  %v5396_v51 = vld [vmem:[%s11040_s2 + $0x90] sm:$0xff] }
 0x173   : > { %11101 = vst [vmem:[#allocation19_spill] sm:$0xff] %v8913_v14  ;;  %v6595_v1 = vpop.f32.mrf.mxu0  ;;  %7073 = vmatpush3.msra.mxu0 %v5415_v61  ;;  %v5397_v61 = vld [vmem:[%s11040_s2 + $0x98] sm:$0xff] }
 0x174   : > { %v8921_v8 = vpop.f32.mrf.mxu1  ;;  %v8930_v14 = vadd.f32 %v6595_v1, %v8733_v15  ;;  %7074 = vmatprep.subr.mxu0 %v5414_v3  ;;  %6964 = vmatprep.subr.mxu1 %v5397_v61 }
 0x175   : > { %11102 = vst [vmem:[#allocation20_spill] sm:$0xff] %v8921_v8  ;;  %v8932_v44 = vpop.f32.mrf.mxu0  ;;  %7075 = vmatpush3.msra.mxu0 %v5414_v3  ;;  %6965 = vmatpush3.msra.mxu1 %v5397_v61  ;;  %v5412_v3 = vld [vmem:[%s11040_s2 + $0x110] sm:$0xff]  ;;  %v5395_v61 = vld [vmem:[%s11040_s2 + $0x88] sm:$0xff] }
 0x176   : > { %11103 = vst [vmem:[#allocation21_spill] sm:$0xff] %v8930_v14  ;;  %11104 = vst [vmem:[#allocation22_spill] sm:$0xff] %v8932_v44  ;;  %v8934_v36 = vpop.f32.mrf.mxu1  ;;  %7076 = vmatprep.subr.mxu0 %v5413_v58  ;;  %6966 = vmatprep.subr.mxu1 %v5396_v51 }
 0x177   : > { %11105 = vst [vmem:[#allocation23_spill] sm:$0xff] %v8934_v36  ;;  %7077 = vmatpush3.msra.mxu0 %v5413_v58  ;;  %6967 = vmatpush3.msra.mxu1 %v5396_v51  ;;  %v5411_v58 = vld [vmem:[%s11040_s2 + $0x108] sm:$0xff]  ;;  %v5394_v51 = vld [vmem:[%s11040_s2 + $0x80] sm:$0xff] }
 0x178   : > { %v6598_v15 = vpop.f32.mrf.mxu0  ;;  %v8942_v1 = vpop.f32.mrf.mxu1  ;;  %7078 = vmatprep.subr.mxu0 %v5412_v3  ;;  %6968 = vmatprep.subr.mxu1 %v5395_v61 }
 0x179   : > { %11106 = vst [vmem:[#allocation24_spill] sm:$0xff] %v8942_v1  ;;  %v8951_v36 = vadd.f32 %v6598_v15, %v8743_v24  ;;  %7079 = vmatpush3.msra.mxu0 %v5412_v3  ;;  %6969 = vmatpush3.msra.mxu1 %v5395_v61  ;;  %v5410_v3 = vld [vmem:[%s11040_s2 + $0x100] sm:$0xff] }
 0x17a   : > { %v8953_v14 = vpop.f32.mrf.mxu0  ;;  %v8955_v8 = vpop.f32.mrf.mxu1  ;;  %7080 = vmatprep.subr.mxu0 %v5411_v58  ;;  %6970 = vmatprep.subr.mxu1 %v5394_v51 }
 0x17b   : > { %11107 = vst [vmem:[#allocation25_spill] sm:$0xff] %v8951_v36  ;;  %11108 = vst [vmem:[#allocation26_spill] sm:$0xff] %v8953_v14  ;;  %7081 = vmatpush3.msra.mxu0 %v5411_v58  ;;  %6971 = vmatpush3.msra.mxu1 %v5394_v51 }
 0x17c   : > { %11109 = vst [vmem:[#allocation27_spill] sm:$0xff] %v8955_v8  ;;  %v6601_v24 = vpop.f32.mrf.mxu0  ;;  %v8963_v15 = vpop.f32.mrf.mxu1  ;;  %7082 = vmatprep.subr.mxu0 %v5410_v3 }
 0x17d   : > { %11110 = vst [vmem:[#allocation28_spill] sm:$0xff] %v8963_v15  ;;  %v8972_v8 = vadd.f32 %v6601_v24, %v8752_v60  ;;  %7083 = vmatpush3.msra.mxu0 %v5410_v3 }
 0x17e   : > { %v8974_v36 = vpop.f32.mrf.mxu0  ;;  %v8976_v1 = vpop.f32.mrf.mxu1 }
 0x17f   : > { %11111 = vst [vmem:[#allocation29_spill] sm:$0xff] %v8972_v8  ;;  %11112 = vst [vmem:[#allocation30_spill] sm:$0xff] %v8974_v36 }
 0x180   : > { %11113 = vst [vmem:[#allocation31_spill] sm:$0xff] %v8976_v1  ;;  %v6604_v61 = vpop.f32.mrf.mxu0  ;;  %v8978_v58 = vpop.f32.mrf.mxu1 }
 0x181   : > { %11114 = vst [vmem:[#allocation32_spill] sm:$0xff] %v8978_v58  ;;  %v8981_v15 = vadd.f32 %v6604_v61, %v8761_v33 }
 0x182   : > { %v8983_v14 = vpop.f32.mrf.mxu0  ;;  %v8985_v44 = vpop.f32.mrf.mxu1 }
 0x183   : > { %11115 = vst [vmem:[#allocation33_spill] sm:$0xff] %v8981_v15  ;;  %11116 = vst [vmem:[#allocation34_spill] sm:$0xff] %v8985_v44 }
 0x184   : > { %v6607_v60 = vpop.f32.mrf.mxu0  ;;  %v8987_v24 = vpop.f32.mrf.mxu1 }
 0x185   : > { %11117 = vst [vmem:[#allocation35_spill] sm:$0xff] %v8987_v24  ;;  %v8990_v8 = vadd.f32 %v6607_v60, %v8770_v9  ;;  %v9008_v24 = vld [vmem:[%s11040_s2 + $0x78] sm:$0xff] }
 0x186   : > { %v8992_v36 = vpop.f32.mrf.mxu0  ;;  %v8994_v51 = vpop.f32.mrf.mxu1  ;;  %11123 = vst [vmem:[#allocation41_spill] sm:$0xff] %v9008_v24  ;;  %v9013_v9 = vld [vmem:[%s11040_s2 + $0x278] sm:$0xff]  ;;  %6996 = vmatprep.subr.mxu1 %v9008_v24 }
 0x187   : > { %11118 = vst [vmem:[#allocation36_spill] sm:$0xff] %v8990_v8  ;;  %11119 = vst [vmem:[#allocation37_spill] sm:$0xff] %v8994_v51  ;;  %7164 = vmatprep.subr.mxu0 %v9013_v9 }
 0x188   : > { %v6610_v3 = vpop.f32.mrf.mxu0  ;;  %v8996_v1 = vpop.f32.mrf.mxu1  ;;  %11124 = vst [vmem:[#allocation42_spill] sm:$0xff] %v9013_v9 }
 0x189   : > { %11120 = vst [vmem:[#allocation38_spill] sm:$0xff] %v8996_v1  ;;  %v8999_v33 = vadd.f32 %v6610_v3, %v8779_v18 }
 0x18a   : > { %v9001_v61 = vpop.f32.mrf.mxu0  ;;  %v9003_v15 = vpop.f32.mrf.mxu1 }
 0x18b   : > { %11121 = vst [vmem:[#allocation39_spill] sm:$0xff] %v8999_v33  ;;  %11122 = vst [vmem:[#allocation40_spill] sm:$0xff] %v9003_v15 }
 0x18c   : > { %v6613_v60 = vpop.f32.mrf.mxu0  ;;  %v9015_v51 = vpop.f32.mrf.mxu1 }
 0x18d   : > { %11125 = vst [vmem:[#allocation43_spill] sm:$0xff] %v9015_v51  ;;  %v9020_v18 = vadd.f32 %v6613_v60, %v8790_v56 }
 0x18e   : > { %v9022_v3 = vpop.f32.mrf.mxu0  ;;  %v9024_v15 = vpop.f32.mrf.mxu1 }
 0x18f   : > { %11126 = vst [vmem:[#allocation44_spill] sm:$0xff] %v9020_v18  ;;  %11127 = vst [vmem:[#allocation45_spill] sm:$0xff] %v9024_v15 }
 0x190   : > { %v6616_v33 = vpop.f32.mrf.mxu0  ;;  %v9026_v1 = vpop.f32.mrf.mxu1 }
 0x191   : > { %11128 = vst [vmem:[#allocation46_spill] sm:$0xff] %v9026_v1  ;;  %v9029_v8 = vadd.f32 %v6616_v33, %v8801_v50 }
 0x192   : > { %v9031_v44 = vpop.f32.mrf.mxu0  ;;  %v9033_v51 = vpop.f32.mrf.mxu1 }
 0x193   : > { %11129 = vst [vmem:[#allocation47_spill] sm:$0xff] %v9029_v8  ;;  %11130 = vst [vmem:[#allocation48_spill] sm:$0xff] %v9033_v51 }
 0x194   : > { %v6619_v24 = vpop.f32.mrf.mxu0  ;;  %v9035_v58 = vpop.f32.mrf.mxu1 }
 0x195   : > { %11131 = vst [vmem:[#allocation49_spill] sm:$0xff] %v9035_v58  ;;  %v9038_v56 = vadd.f32 %v6619_v24, %v8815_v13 }
 0x196   : > { %v9040_v60 = vpop.f32.mrf.mxu0  ;;  %v9042_v9 = vpop.f32.mrf.mxu1 }
 0x197   : > { %11132 = vst [vmem:[#allocation50_spill] sm:$0xff] %v9038_v56  ;;  %11133 = vst [vmem:[#allocation51_spill] sm:$0xff] %v9040_v60 }
 0x198   : > { %11134 = vst [vmem:[#allocation52_spill] sm:$0xff] %v9042_v9  ;;  %v6622_v15 = vpop.f32.mrf.mxu0  ;;  %v9044_v18 = vpop.f32.mrf.mxu1 }
 0x199   : > { %11135 = vst [vmem:[#allocation53_spill] sm:$0xff] %v9044_v18  ;;  %v9047_v50 = vadd.f32 %v6622_v15, %v8826_v62 }
 0x19a   : > { %v9049_v33 = vpop.f32.mrf.mxu0  ;;  %v9051_v8 = vpop.f32.mrf.mxu1 }
 0x19b   : > { %11136 = vst [vmem:[#allocation54_spill] sm:$0xff] %v9047_v50  ;;  %11137 = vst [vmem:[#allocation55_spill] sm:$0xff] %v9049_v33 }
 0x19c   : > { %11138 = vst [vmem:[#allocation56_spill] sm:$0xff] %v9051_v8  ;;  %v6625_v51 = vpop.f32.mrf.mxu0  ;;  %v9053_v1 = vpop.f32.mrf.mxu1 }
 0x19d   : > { %11139 = vst [vmem:[#allocation57_spill] sm:$0xff] %v9053_v1  ;;  %v9056_v13 = vadd.f32 %v6625_v51, %v8842_v45 }
 0x19e   : > { %v9058_v24 = vpop.f32.mrf.mxu0  ;;  %v9060_v56 = vpop.f32.mrf.mxu1 }
 0x19f   : > { %11140 = vst [vmem:[#allocation58_spill] sm:$0xff] %v9056_v13  ;;  %11141 = vst [vmem:[#allocation59_spill] sm:$0xff] %v9058_v24 }
 0x1a0   : > { %11142 = vst [vmem:[#allocation60_spill] sm:$0xff] %v9060_v56  ;;  %v6628_v9 = vpop.f32.mrf.mxu0  ;;  %v9062_v60 = vpop.f32.mrf.mxu1 }
 0x1a1   : > { %11143 = vst [vmem:[#allocation61_spill] sm:$0xff] %v9062_v60  ;;  %v9065_v62 = vadd.f32 %v6628_v9, %v8858_v35 }
 0x1a2   : > { %v9067_v15 = vpop.f32.mrf.mxu0  ;;  %v9069_v50 = vpop.f32.mrf.mxu1 }
 0x1a3   : > { %11144 = vst [vmem:[#allocation62_spill] sm:$0xff] %v9065_v62  ;;  %11145 = vst [vmem:[#allocation63_spill] sm:$0xff] %v9067_v15 }
 0x1a4   : > { %11146 = vst [vmem:[#allocation64_spill] sm:$0xff] %v9069_v50  ;;  %v6631_v8 = vpop.f32.mrf.mxu0  ;;  %v9071_v33 = vpop.f32.mrf.mxu1 }
 0x1a5   : > { %11147 = vst [vmem:[#allocation65_spill] sm:$0xff] %v9071_v33  ;;  %v9074_v45 = vadd.f32 %v6631_v8, %v8877_v11 }
 0x1a6   : > { %v9076_v51 = vpop.f32.mrf.mxu0 }
 0x1a7   : > { %11148 = vst [vmem:[#allocation66_spill] sm:$0xff] %v9074_v45  ;;  %11149 = vst [vmem:[#allocation67_spill] sm:$0xff] %v9076_v51  ;;  %v9078_v13 = vpop.f32.mrf.mxu1 }
 0x1a8   : > { %11150 = vst [vmem:[#allocation68_spill] sm:$0xff] %v9078_v13 }
 0x1a9   : > { %v9080_v56 = vpop.f32.mrf.mxu1  ;;  %v9082_v60 = vpop.f32.mrf.mxu0 }
 0x1aa   : > { %11151 = vst [vmem:[#allocation69_spill] sm:$0xff] %v9080_v56 }
 0x1ab   : > { %v9084_v35 = vpop.f32.mrf.mxu0 }
 0x1ac   : > { %v9086_v9 = vpop.f32.mrf.mxu1 }
 0x1ae   : > { %v9088_v62 = vpop.f32.mrf.mxu0  ;;  %v9090_v50 = vpop.f32.mrf.mxu1 }
 0x1b0   : > { %v9092_v33 = vpop.f32.mrf.mxu0  ;;  %v9094_v11 = vpop.f32.mrf.mxu1 }
 0x1b1   : > { %11152 = vst [vmem:[#allocation70_spill] sm:$0xff] %v9094_v11 }
 0x1b2   : > { %v9096_v8 = vpop.f32.mrf.mxu0  ;;  %v9100_v13 = vpop.f32.mrf.mxu1 }
 0x1b3   : > { %11153 = vst [vmem:[#allocation71_spill] sm:$0xff] %v9096_v8  ;;  %11155 = vst [vmem:[#allocation73_spill] sm:$0xff] %v9100_v13 }
 0x1b4   : > { %v9098_v45 = vpop.f32.mrf.mxu0  ;;  %v9106_v15 = vpop.f32.mrf.mxu1 }
 0x1b5   : > { %11154 = vst [vmem:[#allocation72_spill] sm:$0xff] %v9098_v45  ;;  %11158 = vst [vmem:[#allocation76_spill] sm:$0xff] %v9106_v15 }
 0x1b6   : > { %v9102_v56 = vpop.f32.mrf.mxu0  ;;  %v9112_v18 = vpop.f32.mrf.mxu1 }
 0x1b7   : > { %11156 = vst [vmem:[#allocation74_spill] sm:$0xff] %v9102_v56 }
 0x1b8   : > { %v9104_v51 = vpop.f32.mrf.mxu0  ;;  %v9118_v8 = vpop.f32.mrf.mxu1 }
 0x1b9   : > { %11157 = vst [vmem:[#allocation75_spill] sm:$0xff] %v9104_v51  ;;  %11163 = vst [vmem:[#allocation81_spill] sm:$0xff] %v9118_v8 }
 0x1ba   : > { %v9108_v24 = vpop.f32.mrf.mxu0  ;;  %v9124_v56 = vpop.f32.mrf.mxu1 }
 0x1bb   : > { %11159 = vst [vmem:[#allocation77_spill] sm:$0xff] %v9108_v24  ;;  %11166 = vst [vmem:[#allocation84_spill] sm:$0xff] %v9124_v56 }
 0x1bc   : > { %v9110_v1 = vpop.f32.mrf.mxu0  ;;  %v9130_v24 = vpop.f32.mrf.mxu1 }
 0x1bd   : > { %11160 = vst [vmem:[#allocation78_spill] sm:$0xff] %v9110_v1 }
 0x1be   : > { %v9114_v58 = vpop.f32.mrf.mxu0 }
 0x1bf   : > { %11161 = vst [vmem:[#allocation79_spill] sm:$0xff] %v9114_v58 }
 0x1c0   : > { %v9116_v11 = vpop.f32.mrf.mxu0 }
 0x1c1   : > { %11162 = vst [vmem:[#allocation80_spill] sm:$0xff] %v9116_v11  ;;  %v9136_v11 = vpop.f32.mrf.mxu1 }
 0x1c2   : > { %v9120_v45 = vpop.f32.mrf.mxu0 }
 0x1c3   : > { %11164 = vst [vmem:[#allocation82_spill] sm:$0xff] %v9120_v45 }
 0x1c4   : > { %v9122_v13 = vpop.f32.mrf.mxu0 }
 0x1c5   : > { %11165 = vst [vmem:[#allocation83_spill] sm:$0xff] %v9122_v13  ;;  %v9142_v13 = vpop.f32.mrf.mxu1 }
 0x1c6   : > { %v9126_v51 = vpop.f32.mrf.mxu0  ;;  %11173 = vst [vmem:[#allocation91_spill] sm:$0xff] %v9142_v13  ;;  %v762_v13 = vadd.f32 %v8649_v4, %v8647_v26  ;;  %v1387_v4 = vadd.f32 %v8715_v19, %v8710_v38  ;;  %v11177_v38 = vld [vmem:[#allocation4_spill] sm:$0xff] }
 0x1c7   : > { %11167 = vst [vmem:[#allocation85_spill] sm:$0xff] %v9126_v51 }
 0x1c8   : > { %v9128_v15 = vpop.f32.mrf.mxu0 }
 0x1c9   : > { %11168 = vst [vmem:[#allocation86_spill] sm:$0xff] %v9128_v15  ;;  %v722_v15 = vadd.f32 %v8600_v63, %v8598_v17  ;;  %v782_v17 = vadd.f32 %v8667_v10, %v8665_v22  ;;  %v792_v63 = vadd.f32 %v8679_v6, %v8677_v2  ;;  %v1389_v2 = vadd.f32 %v8725_v20, %v8721_v43  ;;  %v11178_v43 = vld [vmem:[#allocation5_spill] sm:$0xff] }
 0x1ca   : > { %v9132_v1 = vpop.f32.mrf.mxu0 }
 0x1cb   : > { %11169 = vst [vmem:[#allocation87_spill] sm:$0xff] %v9132_v1  ;;  %v732_v1 = vadd.f32 %v8616_v54, %v8614_v52  ;;  %v802_v52 = vadd.f32 %v8688_v39, %v8686_v37  ;;  %v1100_v54 = vadd.f32 %v8749_v29, %v722_v15  ;;  %v1112_v6 = vadd.f32 %v8812_v48, %v782_v17  ;;  %v11182_v48 = vld [vmem:[#allocation9_spill] sm:$0xff]  ;;  %v11183_v15 = vld [vmem:[#allocation10_spill] sm:$0xff] }
 0x1cc   : > { %v9134_v58 = vpop.f32.mrf.mxu0  ;;  %v1114_v37 = vadd.f32 %v8824_v40, %v792_v63  ;;  %v11185_v63 = vld [vmem:[#allocation12_spill] sm:$0xff] }
 0x1cd   : > { %11170 = vst [vmem:[#allocation88_spill] sm:$0xff] %v9134_v58  ;;  %v9152_v58 = vpop.f32.mrf.mxu1  ;;  %v1395_v19 = vadd.f32 %v11177_v38, %v1100_v54  ;;  %v1116_v29 = vadd.f32 %v8840_v12, %v802_v52  ;;  %v1679_v12 = vadd.f32 %v8890_v21, %v1387_v4  ;;  %v11186_v54 = vld [vmem:[#allocation15_spill] sm:$0xff] }
 0x1ce   : > { %v9138_v8 = vpop.f32.mrf.mxu0  ;;  %v1972_v21 = vadd.f32 %v11186_v54, %v8888_v30  ;;  %v11192_v30 = vld [vmem:[#allocation26_spill] sm:$0xff] }
 0x1cf   : > { %11171 = vst [vmem:[#allocation89_spill] sm:$0xff] %v9138_v8  ;;  %v742_v8 = vadd.f32 %v8629_v27, %v8627_v25  ;;  %v812_v25 = vadd.f32 %v8696_v47, %v8694_v7  ;;  %v822_v27 = vadd.f32 %v8705_v57, %v8702_v23  ;;  %v9186_v10 = vpop.f32.mrf.mxu1  ;;  %v2984_v7 = vlaneseq  ;;  %v11176_v23 = vld [vmem:[#allocation3_spill] sm:$0xff] }
 0x1d0   : > { %v9140_v45 = vpop.f32.mrf.mxu0  ;;  %v1391_v47 = vadd.f32 %v8735_v32, %v8731_v46  ;;  %v1393_v57 = vadd.f32 %v11176_v23, %v8741_v31  ;;  %v11180_v46 = vld [vmem:[#allocation7_spill] sm:$0xff]  ;;  %v9229_v52 = vadd.f32 %v11185_v63, %v1116_v29  ;;  %v11191_v23 = vld [vmem:[#allocation16_spill] sm:$0xff] }
 0x1d1   : > { %11172 = vst [vmem:[#allocation90_spill] sm:$0xff] %v9140_v45  ;;  %v752_v45 = vadd.f32 %v8639_v59, %v8637_v53  ;;  %v1102_v53 = vadd.f32 %v8758_v0, %v732_v1  ;;  %v1104_v59 = vadd.f32 %v8767_v16, %v742_v8  ;;  %v11179_v0 = vld [vmem:[#allocation6_spill] sm:$0xff]  ;;  %v1118_v16 = vadd.f32 %v8856_v49, %v812_v25  ;;  %v11199_v63 = vld [vmem:[#allocation24_spill] sm:$0xff] }
 0x1d2   : > { %v9144_v56 = vpop.f32.mrf.mxu0  ;;  %v9226_v17 = vshrl.u32 %v2984_v7, 7  ;;  %v11187_v25 = vld [vmem:[#allocation18_spill] sm:$0xff]  ;;  %v1971_v38 = vadd.f32 %v11191_v23, %v1679_v12  ;;  %v1685_v29 = vadd.f32 %v11192_v30, %v1393_v57  ;;  %v11196_v57 = vld [vmem:[#allocation20_spill] sm:$0xff]  ;;  %v11204_v30 = vld [vmem:[#allocation31_spill] sm:$0xff] }
 0x1d3   : > { %11174 = vst [vmem:[#allocation92_spill] sm:$0xff] %v9144_v56  ;;  %v1397_v20 = vadd.f32 %v11178_v43, %v1102_v53  ;;  %v9234_v53 = vstv %s2991_s23  ;;  %v11202_v23 = vld [vmem:[#allocation28_spill] sm:$0xff]  ;;  %s5074_s23 = sshll.u32 %s7573_s24, 3 }
 0x1d4   : > { %v9146_v51 = vpop.f32.mrf.mxu0  ;;  %v9246_v7 = vadd.s32 16, %v9226_v17  ;;  %vm3043_vm1 = vcmp.ge.s32.totalorder %v9234_v53, 0  ;;  %vm11063_vm2 = vcmp.ge.s32.totalorder %v9226_v17, 1  ;;  %v2266_v12 = vadd.f32 %v9084_v35, %v1971_v38  ;;  %p296_p8 = scmp.lt.s32.totalorder %s5074_s23, 15 }
 0x1d5   : > { %11175 = vst [vmem:[#allocation93_spill] sm:$0xff] %v9146_v51  ;;  %v772_v51 = vadd.f32 %v8657_v28, %v8655_v55  ;;  %v1106_v55 = vadd.f32 %v8776_v34, %v752_v45  ;;  %v1108_v28 = vadd.f32 %v8788_v5, %v762_v13  ;;  %v1399_v34 = vadd.f32 %v11179_v0, %v1104_v59  ;;  %v9214_v13 = vpop.f32.mrf.mxu1  ;;  %v11188_v59 = vld [vmem:[#allocation13_spill] sm:$0xff]  ;;  %v11193_v0 = vld [vmem:[#allocation30_spill] sm:$0xff] }
 0x1d6   : > { %v9162_v56 = vpop.f32.mrf.mxu0  ;;  %v1120_v5 = vadd.f32 %v8869_v41, %v822_v27  ;;  %v9217_v45 = vadd.f32 %v11183_v15, %v1112_v6  ;;  %v9224_v41 = vstv %s2989_s22  ;;  %v1681_v27 = vadd.f32 %v11187_v25, %v1389_v2  ;;  %v11197_v15 = vld [vmem:[#allocation21_spill] sm:$0xff]  ;;  %v11201_v25 = vld [vmem:[#allocation27_spill] sm:$0xff]  ;;  %s11485_s23 = smov (!%p296_p8, %s5074_s23), 15 }
 0x1d7   : > { %v1110_v22 = vadd.f32 %v8799_v42, %v772_v51  ;;  %v1401_v32 = vadd.f32 %v11180_v46, %v1106_v55  ;;  %v11181_v42 = vld [vmem:[#allocation8_spill] sm:$0xff]  ;;  %v11184_v51 = vld [vmem:[#allocation11_spill] sm:$0xff]  ;;  %v9237_v4 = vadd.f32 %v11188_v59, %v1118_v16  ;;  %v11189_v55 = vld [vmem:[#allocation14_spill] sm:$0xff]  ;;  %v2267_v2 = vadd.f32 %v9082_v60, %v1972_v21  ;;  %v9251_v43 = vpop.f32.mrf.mxu1  ;;  %s5075_s24 = sshll.u32 %s11485_s23, 1 }
 0x1d8   : > { %v9179_v26 = vpop.f32.mrf.mxu0  ;;  %v1403_v31 = vadd.f32 %v11181_v42, %v1108_v28  ;;  %v9220_v8 = vadd.f32 %v11184_v51, %v1114_v37  ;;  %v9240_v28 = vadd.f32 %v11189_v55, %v1120_v5  ;;  %vm3002_vm0 = vcmp.le.s32.totalorder %v9224_v41, 0  ;;  %v11195_v46 = vld [vmem:[#allocation19_spill] sm:$0xff]  ;;  %v11200_v21 = vld [vmem:[#allocation25_spill] sm:$0xff]  ;;  %s10915_s25 = sadd.s32 %s5076_s20, %s5075_s24 }
 0x1d9   : > { %v1405_v1 = vadd.f32 %v11182_v48, %v1110_v22  ;;  %v11190_v22 = vld [vmem:[#allocation22_spill] sm:$0xff]  ;;  %v1687_v16 = vadd.f32 %v11193_v0, %v1395_v19  ;;  %vm3003_vm3 = vcmp.le.s32.totalorder %v9224_v41, 1  ;;  %v1973_v48 = vadd.f32 %v11196_v57, %v1681_v27  ;;  %v11198_v51 = vld [vmem:[#allocation23_spill] sm:$0xff]  ;;  %v9278_v38 = vpop.f32.mrf.mxu1  ;;  %vm9343_vm6 = vmand %vm11063_vm2, %vm3002_vm0  ;;  %s5077_s13 = sshll.u32 %s10915_s25, 3 }
 0x1da   : > { %v9192_v39 = vpop.f32.mrf.mxu0  ;;  %v1683_v6 = vadd.f32 %v11190_v22, %v1391_v47  ;;  %v11194_v47 = vld [vmem:[#allocation17_spill] sm:$0xff]  ;;  %v1689_v60 = vadd.f32 %v8983_v14, %v1397_v20  ;;  %v1976_v19 = vadd.f32 %v11198_v51, %v11197_v15  ;;  %v1978_v59 = vadd.f32 %v11201_v25, %v11200_v21  ;;  %v11209_v15 = vld [vmem:[#allocation36_spill] sm:$0xff]  ;;  %v11211_v21 = vld [vmem:[#allocation38_spill] sm:$0xff]  ;;  %s10940_s16 = scalar_lea.vmem %s11045_s7, %s5077_s13 }
 0x1db   : > { %v1974_v42 = vadd.f32 %v11195_v46, %v11194_v47  ;;  %v1691_v55 = vadd.f32 %v8992_v36, %v1399_v34  ;;  %vm11058_vm4 = vcmp.le.s32.totalorder %v9246_v7, 16  ;;  %v1977_v27 = vadd.f32 %v11202_v23, %v1685_v29  ;;  %v11205_v36 = vld [vmem:[#allocation32_spill] sm:$0xff]  ;;  %v11206_v47 = vld [vmem:[#allocation33_spill] sm:$0xff]  ;;  %v11207_v46 = vld [vmem:[#allocation34_spill] sm:$0xff] }
 0x1dc   : > { %v9208_v40 = vpop.f32.mrf.mxu0  ;;  %v1975_v54 = vadd.f32 %v11199_v63, %v1683_v6  ;;  %v1693_v14 = vadd.f32 %v9001_v61, %v1401_v32  ;;  %v2559_v35 = vadd.f32 %v9086_v9, %v2267_v2  ;;  %vm3044_vm5 = vcmp.ge.s32.totalorder %v9234_v53, 1  ;;  %v11203_v6 = vld [vmem:[#allocation29_spill] sm:$0xff]  ;;  %v11208_v9 = vld [vmem:[#allocation35_spill] sm:$0xff]  ;;  %v11213_v25 = vld [vmem:[#allocation40_spill] sm:$0xff] }
 0x1dd   : > { %v2269_v20 = vadd.f32 %v9088_v62, %v1974_v42  ;;  %v1980_v0 = vadd.f32 %v11204_v30, %v11203_v6  ;;  %v9284_v34 = vadd.f32 %v11205_v36, %v1687_v16  ;;  %v9288_v57 = vadd.f32 %v11207_v46, %v11206_v47  ;;  %v9294_v62 = vld [vmem:[%s11041_s3] ss:$0 sm:$0xff]  ;;  %v9322_v30 = vpop.f32.mrf.mxu1  ;;  %v11216_v47 = vld [vmem:[#allocation44_spill] sm:$0xff]  ;;  %vm9362_vm8 = vmand %vm3002_vm0, %vm3043_vm1 }
 0x1de   : > { %v9222_v49 = vpop.f32.mrf.mxu0  ;;  %v1695_v61 = vadd.f32 %v9022_v3, %v1403_v31  ;;  %v9297_v29 = vadd.f32 %v11208_v9, %v1689_v60  ;;  %v2558_v2 = vadd.f32 %v9090_v50, %v2266_v12  ;;  %v2268_v16 = vadd.f32 %v9092_v33, %v1973_v48  ;;  %v11210_v51 = vld [vmem:[#allocation37_spill] sm:$0xff]  ;;  %v11212_v31 = vld [vmem:[#allocation39_spill] sm:$0xff]  ;;  %v11215_v12 = vld [vmem:[#allocation70_spill] sm:$0xff] }
 0x1df   : > { %v9303_v63 = vadd.f32 %v11210_v51, %v11209_v15  ;;  %v9306_v3 = vadd.f32 %v11211_v21, %v1691_v55  ;;  %v9310_v23 = vadd.f32 %v11213_v25, %v11212_v31  ;;  %v1697_v6 = vadd.f32 %v9031_v44, %v1405_v1  ;;  %v9316_v50 = vld [vmem:[%s11042_s4] ss:$0 sm:$0xff]  ;;  %v11214_v48 = vld [vmem:[#allocation43_spill] sm:$0xff]  ;;  %v11218_v44 = vld [vmem:[#allocation46_spill] sm:$0xff] }
 0x1e0   : > { %v9243_v37 = vpop.f32.mrf.mxu0  ;;  %v9319_v60 = vadd.f32 %v11214_v48, %v1693_v14  ;;  %v11217_v46 = vld [vmem:[#allocation45_spill] sm:$0xff]  ;;  %v9330_v1 = vadd.f32 %v11218_v44, %v1695_v61  ;;  %v11219_v9 = vld [vmem:[#allocation71_spill] sm:$0xff]  ;;  %v11220_v51 = vld [vmem:[#allocation72_spill] sm:$0xff]  ;;  %vm3004_vm7 = vcmp.le.s32.totalorder %v9224_v41, 2  ;;  %vm3005_vm9 = vcmp.le.s32.totalorder %v9224_v41, 3  ;;  %v9367_v44 = vpop.f32.mrf.mxu1 }
 0x1e1   : > { %v2271_v15 = vadd.f32 %v11219_v9, %v1976_v19  ;;  %v2270_v21 = vadd.f32 %v11220_v51, %v1975_v54  ;;  %v11221_v31 = vld [vmem:[#allocation73_spill] sm:$0xff]  ;;  %v11225_v19 = vld [vmem:[#allocation47_spill] sm:$0xff]  ;;  %v11226_v54 = vld [vmem:[#allocation48_spill] sm:$0xff]  ;;  %vm3045_vm11 = vcmp.ge.s32.totalorder %v9234_v53, 2  ;;  %vm3046_vm14 = vcmp.ge.s32.totalorder %v9234_v53, 3 }
 0x1e2   : > { %v9255_v5 = vpop.f32.mrf.mxu0  ;;  %v2560_v25 = vadd.f32 %v11221_v31, %v2268_v16  ;;  %v11227_v16 = vld [vmem:[#allocation49_spill] sm:$0xff]  ;;  %vm9378_vm10 = vmand %vm11063_vm2, %vm3003_vm3  ;;  %v11236_v31 = vld [vmem:[#allocation52_spill] sm:$0xff] }
 0x1e3   : > { %v9353_v48 = vadd.f32 %v11227_v16, %v1697_v6  ;;  %v2562_v16 = vadd.f32 %v9112_v18, %v2270_v21  ;;  %vm9394_vm12 = vmand %vm9343_vm6, %vm3043_vm1  ;;  %v11258_v21 = vld [vmem:[#allocation79_spill] sm:$0xff] }
 0x1e4   : > { %v9271_v22 = vpop.f32.mrf.mxu0  ;;  %vm9411_vm13 = vmand %vm11058_vm4, %vm3002_vm0 }
 0x1e5   : > { %vm9425_vm15 = vmand %vm9378_vm10, %vm3044_vm5 }
 0x1e6   : > { %v6897_v32 = vpop.f32.mrf.mxu0  ;;  %vm9441_vm0 = vmand %vm11058_vm4, %vm3003_vm3 }
 0x1e7   : > { %v2851_v42 = vadd.f32 %v6897_v32, %v2559_v35  ;;  %v2561_v35 = vadd.f32 %v11215_v12, %v2269_v20  ;;  %v9327_v32 = vadd.f32 %v11217_v46, %v11216_v47  ;;  %v11228_v12 = vld [vmem:[#allocation51_spill] sm:$0xff]  ;;  %vm3055_vm6 = vmand %vm9411_vm13, %vm3043_vm1  ;;  %vm3006_vm13 = vcmp.le.s32.totalorder %v9224_v41, 4 }
 0x1e8   : > { %v2701_v33 = vpop.f32.mrf.mxu0  ;;  %vm9472_vm1 = vmand %vm9441_vm0, %vm3044_vm5 }
 0x1e9   : > { %v2888_v55 = vmul.f32 %v9294_v62, %v2851_v42  ;;  %v2850_v36 = vadd.f32 %v2701_v33, %v2558_v2  ;;  %v9350_v33 = vadd.f32 %v11226_v54, %v11225_v19  ;;  %v11237_v54 = vld [vmem:[#allocation76_spill] sm:$0xff]  ;;  %v11244_v2 = vld [vmem:[#allocation53_spill] sm:$0xff]  ;;  %vm9485_vm10 = vmand %vm3003_vm3, %vm3044_vm5 }
 0x1ea   : > { %v6900_v14 = vpop.f32.mrf.mxu0  ;;  %vm9503_vm3 = vmand %vm11063_vm2, %vm3004_vm7 }
 0x1eb   : > { %v9336_v20 = vadd.f32 %v9316_v50, %v2888_v55  ;;  %v2887_v42 = vmul.f32 %v9294_v62, %v2850_v36  ;;  %v2853_v61 = vadd.f32 %v6900_v14, %v2561_v35  ;;  %v1699_v55 = vadd.f32 %v11228_v12, %v9217_v45  ;;  %v11229_v36 = vld [vmem:[#allocation74_spill] sm:$0xff]  ;;  %vm9516_vm5 = vmand %vm11063_vm2, %vm3005_vm9 }
 0x1ec   : > { %v2273_v47 = vadd.f32 %v11229_v36, %v1978_v59  ;;  %v11230_v35 = vmov 0  ;;  %v2711_v46 = vpop.f32.mrf.mxu0  ;;  %v11235_v14 = vld [vmem:[#allocation50_spill] sm:$0xff]  ;;  %v11239_v36 = vmov 0  ;;  %vm9531_vm0 = vmand %vm3004_vm7, %vm3045_vm11 }
 0x1ed   : > { %11222 = vst [vmem:[#allocation3_spill] sm:$0xff] %v9336_v20  ;;  %v11231_v35 = vsel %vm9362_vm8, 4294967295, %v11230_v35  ;;  %v11048_v6 = vmax.f32 %v9336_v20, 0.0  ;;  %v9371_v9 = vadd.f32 %v9316_v50, %v2887_v42  ;;  %v2890_v45 = vmul.f32 %v9294_v62, %v2853_v61  ;;  %v11238_v61 = vld [vmem:[#allocation75_spill] sm:$0xff] }
 0x1ee   : > { %11232 = vst [vmem:[#allocation4_spill] sm:$0xff] %v11231_v35  ;;  %v2852_v51 = vadd.f32 %v2711_v46, %v2560_v25  ;;  %v9385_v19 = vadd.f32 %v11236_v31, %v11235_v14  ;;  %v2563_v42 = vadd.f32 %v11237_v54, %v2271_v15  ;;  %v2272_v12 = vadd.f32 %v11238_v61, %v1977_v27  ;;  %v6903_v25 = vpop.f32.mrf.mxu0  ;;  %v11245_v31 = vld [vmem:[#allocation81_spill] sm:$0xff]  ;;  %v9429_v35 = vpop.f32.mrf.mxu1 }
 0x1ef   : > { %v11240_v36 = vsel %vm9394_vm12, 4294967295, %v11239_v36  ;;  %v3084_v46 = vsel %vm9362_vm8, %v11048_v6, 0.0  ;;  %v9404_v18 = vadd.f32 %v9316_v50, %v2890_v45  ;;  %v9417_v14 = vadd.f32 %v11244_v2, %v1699_v55  ;;  %v11246_v61 = vld [vmem:[#allocation77_spill] sm:$0xff] }
 0x1f0   : > { %11241 = vst [vmem:[#allocation5_spill] sm:$0xff] %v11240_v36  ;;  %v2889_v27 = vmul.f32 %v9294_v62, %v2852_v51  ;;  %v2565_v54 = vadd.f32 %v11245_v31, %v2273_v47  ;;  %v2275_v45 = vadd.f32 %v11246_v61, %v1980_v0  ;;  %3114 = vst [vmem:[#allocation2 + $0x8] sm:$0xff] %v3084_v46  ;;  %v2721_v15 = vpop.f32.mrf.mxu0  ;;  %v11249_v55 = vmax.f32 %v9371_v9, 0.0  ;;  %v11253_v31 = vld [vmem:[#allocation54_spill] sm:$0xff]  ;;  %v11254_v61 = vld [vmem:[#allocation56_spill] sm:$0xff] }
 0x1f1   : > { %v2855_v6 = vadd.f32 %v6903_v25, %v2563_v42  ;;  %v2854_v42 = vadd.f32 %v2721_v15, %v2562_v16  ;;  %v11252_v25 = vld [vmem:[#allocation55_spill] sm:$0xff]  ;;  %v9449_v20 = vadd.f32 %v11254_v61, %v11253_v31  ;;  %v11256_v16 = vmax.f32 %v9404_v18, 0.0  ;;  %v5478_v51 = vld [vmem:[%s11040_s2 + $0x320] sm:$0xff] }
 0x1f2   : > { %v3083_v47 = vsel %vm9394_vm12, %v11249_v55, 0.0  ;;  %v2926_v46 = vadd.f32 %v9316_v50, %v2889_v27  ;;  %v1701_v2 = vadd.f32 %v11252_v25, %v9220_v8  ;;  %v11255_v55 = vld [vmem:[#allocation84_spill] sm:$0xff]  ;;  %v6906_v36 = vpop.f32.mrf.mxu0  ;;  %v2567_v61 = vadd.f32 %v9130_v24, %v2275_v45 }
 0x1f3   : > { %v2564_v0 = vadd.f32 %v11255_v55, %v2272_v12  ;;  %3113 = vst [vmem:[#allocation2] sm:$0xff] %v3083_v47  ;;  %v2892_v27 = vmul.f32 %v9294_v62, %v2855_v6  ;;  %v3086_v8 = vsel %vm9425_vm15, %v11256_v16, 0.0  ;;  %v2891_v25 = vmul.f32 %v9294_v62, %v2854_v42  ;;  %v11257_v12 = vld [vmem:[#allocation78_spill] sm:$0xff]  ;;  %v11265_v42 = vld [vmem:[#allocation57_spill] sm:$0xff]  ;;  %v11266_v16 = vld [vmem:[#allocation59_spill] sm:$0xff] }
 0x1f4   : > { %v2956_v15 = vmax.f32 %v2926_v46, 0.0  ;;  %v2857_v31 = vadd.f32 %v6906_v36, %v2565_v54  ;;  %v2274_v47 = vadd.f32 %v11257_v12, %v9284_v34  ;;  %v2277_v55 = vadd.f32 %v11258_v21, %v9288_v57  ;;  %3116 = vst [vmem:[#allocation2 + $0x18] sm:$0xff] %v3086_v8  ;;  %v2731_v36 = vpop.f32.mrf.mxu0  ;;  %v9476_v54 = vpop.f32.mrf.mxu1 }
 0x1f5   : > { %v2929_v6 = vadd.f32 %v9316_v50, %v2892_v27  ;;  %v9479_v24 = vadd.f32 %v9316_v50, %v2891_v25  ;;  %v11262_v57 = vmov 0  ;;  %v2856_v59 = vadd.f32 %v2731_v36, %v2564_v0 }
 0x1f6   : > { %v3085_v34 = vsel %vm3055_vm6, %v2956_v15, 0.0  ;;  %v11263_v57 = vsel %vm9485_vm10, 4294967295, %v11262_v57  ;;  %v2894_v45 = vmul.f32 %v9294_v62, %v2857_v31  ;;  %v9491_v27 = vadd.f32 %v11265_v42, %v1701_v2  ;;  %v11267_v15 = vld [vmem:[#allocation80_spill] sm:$0xff]  ;;  %v6909_v0 = vpop.f32.mrf.mxu0  ;;  %vm9549_vm6 = vmand %vm9503_vm3, %vm3045_vm11 }
 0x1f7   : > { %11261 = vst [vmem:[#allocation6_spill] sm:$0xff] %v9479_v24  ;;  %11264 = vst [vmem:[#allocation7_spill] sm:$0xff] %v11263_v57  ;;  %v9495_v8 = vadd.f32 %v11266_v16, %v9229_v52  ;;  %v2276_v25 = vadd.f32 %v11267_v15, %v9297_v29  ;;  %v2959_v12 = vmax.f32 %v2929_v6, 0.0  ;;  %v11052_v2 = vmax.f32 %v9479_v24, 0.0  ;;  %v11294_v57 = vld [vmem:[#allocation86_spill] sm:$0xff] }
 0x1f8   : > { %3115 = vst [vmem:[#allocation2 + $0x10] sm:$0xff] %v3085_v34  ;;  %v9509_v31 = vadd.f32 %v9316_v50, %v2894_v45  ;;  %v2893_v52 = vmul.f32 %v9294_v62, %v2856_v59  ;;  %v2859_v36 = vadd.f32 %v6909_v0, %v2567_v61  ;;  %v2566_v6 = vadd.f32 %v9136_v11, %v2274_v47  ;;  %v11273_v34 = vld [vmem:[#allocation91_spill] sm:$0xff]  ;;  %v11274_v45 = vld [vmem:[#allocation82_spill] sm:$0xff]  ;;  %v2741_v15 = vpop.f32.mrf.mxu0  ;;  %v9535_v0 = vpop.f32.mrf.mxu1 }
 0x1f9   : > { %v2569_v42 = vadd.f32 %v11273_v34, %v2277_v55  ;;  %v2279_v16 = vadd.f32 %v11274_v45, %v9303_v63  ;;  %v3088_v61 = vsel %vm9472_vm1, %v2959_v12, 0.0  ;;  %v11275_v59 = vmov 0  ;;  %vm9561_vm1 = vmand %vm9516_vm5, %vm3046_vm14 }
 0x1fa   : > { %11270 = vst [vmem:[#allocation8_spill] sm:$0xff] %v9509_v31  ;;  %v11276_v59 = vsel %vm9531_vm0, 4294967295, %v11275_v59  ;;  %3118 = vst [vmem:[#allocation2 + $0x28] sm:$0xff] %v3088_v61  ;;  %v3087_v11 = vsel %vm9485_vm10, %v11052_v2, 0.0  ;;  %v9543_v47 = vadd.f32 %v9316_v50, %v2893_v52  ;;  %v11278_v55 = vmov 0  ;;  %v3175_v12 = vld [vmem:[#allocation2 + $0x1] sm:$0xff]  ;;  %v6912_v63 = vpop.f32.mrf.mxu0 }
 0x1fb   : > { %11277 = vst [vmem:[#allocation9_spill] sm:$0xff] %v11276_v59  ;;  %v11279_v55 = vsel %vm9549_vm6, 4294967295, %v11278_v55  ;;  %v2896_v46 = vmul.f32 %v9294_v62, %v2859_v36  ;;  %v3498_v34 = vld [vmem:[#allocation2 + $0x2] sm:$0xff]  ;;  %v2568_v45 = vadd.f32 %v9152_v58, %v2276_v25  ;;  %v11281_v61 = vld [vmem:[#allocation83_spill] sm:$0xff]  ;;  %3117 = vst [vmem:[#allocation2 + $0x20] sm:$0xff] %v3087_v11  ;;  %v11282_v21 = vmov 0  ;;  %6972 = vmatprep.mubr.f32.mxu1 %v3175_v12 }
 0x1fc   : > { %11280 = vst [vmem:[#allocation10_spill] sm:$0xff] %v11279_v55  ;;  %v2278_v2 = vadd.f32 %v11281_v61, %v9306_v3  ;;  %v11283_v21 = vsel %vm9561_vm1, 4294967295, %v11282_v21  ;;  %v2858_v52 = vadd.f32 %v2741_v15, %v2566_v6  ;;  %7084 = vmatprep.mubr.f32.mxu0 %v3498_v34  ;;  %v11285_v58 = vmax.f32 %v9509_v31, 0.0  ;;  %vm9578_vm5 = vmand %vm11058_vm4, %vm3004_vm7  ;;  %v11289_v15 = vld [vmem:[#allocation58_spill] sm:$0xff]  ;;  %v11290_v11 = vld [vmem:[#allocation60_spill] sm:$0xff] }
 0x1fd   : > { %11284 = vst [vmem:[#allocation11_spill] sm:$0xff] %v11283_v21  ;;  %v11060_v25 = vmax.f32 %v9543_v47, 0.0  ;;  %v9572_v36 = vadd.f32 %v9316_v50, %v2896_v46  ;;  %v2861_v6 = vadd.f32 %v6912_v63, %v2569_v42  ;;  %v9585_v12 = vadd.f32 %v11290_v11, %v11289_v15  ;;  %v11291_v46 = vld [vmem:[#allocation85_spill] sm:$0xff]  ;;  %vm9595_vm7 = vmand %vm11058_vm4, %vm3005_vm9  ;;  %v2751_v63 = vpop.f32.mrf.mxu0  ;;  %v3173_v15 = vld [vmem:[%s11040_s2 + $0x70] sm:$0xff] }
 0x1fe   : > { %v3090_v3 = vsel %vm9531_vm0, %v11285_v58, 0.0  ;;  %v2571_v34 = vadd.f32 %v9186_v10, %v2279_v16  ;;  %v2281_v61 = vadd.f32 %v11291_v46, %v9310_v23  ;;  %v2895_v58 = vmul.f32 %v9294_v62, %v2858_v52  ;;  %v9602_v10 = vpop.f32.mrf.mxu1  ;;  %v5456_v59 = vld [vmem:[%s11040_s2 + $0x270] sm:$0xff]  ;;  %vm9621_vm4 = vmand %vm9578_vm5, %vm3045_vm11 }
 0x1ff   : > { %11286 = vst [vmem:[#allocation12_spill] sm:$0xff] %v9572_v36  ;;  %3120 = vst [vmem:[#allocation2 + $0x38] sm:$0xff] %v3090_v3  ;;  %v3089_v23 = vsel %vm9549_vm6, %v11060_v25, 0.0  ;;  %v11059_v16 = vmax.f32 %v9572_v36, 0.0  ;;  %v2898_v52 = vmul.f32 %v9294_v62, %v2861_v6  ;;  %v2860_v3 = vadd.f32 %v2751_v63, %v2568_v45  ;;  %v3176_v11 = vld [vmem:[#allocation2 + $0x9] sm:$0xff]  ;;  %v6915_v6 = vpop.f32.mrf.mxu0  ;;  %v11306_v36 = vld [vmem:[#allocation88_spill] sm:$0xff] }
 0x200   : > { %v3499_v46 = vld [vmem:[#allocation2 + $0xa] sm:$0xff]  ;;  %v2570_v31 = vadd.f32 %v9214_v13, %v2278_v2  ;;  %v2280_v24 = vadd.f32 %v11294_v57, %v9319_v60  ;;  %3119 = vst [vmem:[#allocation2 + $0x30] sm:$0xff] %v3089_v23  ;;  %v2932_v55 = vadd.f32 %v9316_v50, %v2895_v58  ;;  %6973 = vmatmul.mubr.f32.vlgmr.msra.gmra.mxu1 %v3176_v11  ;;  %vm9635_vm11 = vmand %vm9595_vm7, %vm3046_vm14  ;;  %v11299_v58 = vld [vmem:[#allocation41_spill] sm:$0xff]  ;;  %v11311_v45 = vmov 0 }
 0x201   : > { %7085 = vmatmul.mubr.f32.vlgmr.msra.gmra.mxu0 %v3499_v46  ;;  %v3092_v13 = vsel %vm9561_vm1, %v11059_v16, 0.0  ;;  %v2935_v60 = vadd.f32 %v9316_v50, %v2898_v52  ;;  %v2897_v2 = vmul.f32 %v9294_v62, %v2860_v3  ;;  %v2863_v29 = vadd.f32 %v6915_v6, %v2571_v34  ;;  %6997 = vmatpush3.msra.mxu1 %v11299_v58  ;;  %v11300_v63 = vld [vmem:[#allocation42_spill] sm:$0xff]  ;;  %v11301_v23 = vld [vmem:[#allocation61_spill] sm:$0xff]  ;;  %v11302_v52 = vld [vmem:[#allocation63_spill] sm:$0xff]  ;;  %v2761_v3 = vpop.f32.mrf.mxu0 }
 0x202   : > { %7165 = vmatpush3.msra.mxu0 %v11300_v63  ;;  %v9644_v11 = vadd.f32 %v11301_v23, %v9495_v8  ;;  %v9648_v46 = vadd.f32 %v11302_v52, %v9237_v4  ;;  %v11303_v42 = vld [vmem:[#allocation87_spill] sm:$0xff]  ;;  %3122 = vst [vmem:[#allocation2 + $0x48] sm:$0xff] %v3092_v13  ;;  %v2962_v25 = vmax.f32 %v2932_v55, 0.0  ;;  %vm9656_vm5 = vmand %vm3005_vm9, %vm3046_vm14  ;;  %v11304_v34 = vmov 0  ;;  %6998 = vmatprep.subr.mxu1 %v3173_v15  ;;  %v3172_v4 = vld [vmem:[%s11040_s2 + $0x68] sm:$0xff]  ;;  %v9666_v8 = vpop.f32.mrf.mxu1 }
 0x203   : > { %v2283_v16 = vadd.f32 %v11303_v42, %v9327_v32  ;;  %v11305_v34 = vsel %vm9656_vm5, 4294967295, %v11304_v34  ;;  %7166 = vmatprep.subr.mxu0 %v5456_v59  ;;  %v5455_v32 = vld [vmem:[%s11040_s2 + $0x268] sm:$0xff]  ;;  %v2965_v55 = vmax.f32 %v2935_v60, 0.0  ;;  %v9669_v6 = vadd.f32 %v9316_v50, %v2897_v2  ;;  %v9672_v63 = vld [vmem:[#allocation2 + $0x19] sm:$0xff]  ;;  %6999 = vmatpush3.msra.mxu1 %v3173_v15  ;;  %vm9686_vm9 = vmand %vm11063_vm2, %vm3006_vm13  ;;  %v6918_v15 = vpop.f32.mrf.mxu0 }
 0x204   : > { %v2900_v13 = vmul.f32 %v9294_v62, %v2863_v29  ;;  %v2862_v58 = vadd.f32 %v2761_v3, %v2570_v31  ;;  %v3500_v23 = vld [vmem:[#allocation2 + $0x1a] sm:$0xff]  ;;  %7167 = vmatpush3.msra.mxu0 %v5456_v59  ;;  %v2573_v42 = vadd.f32 %v9251_v43, %v2281_v61  ;;  %v2572_v21 = vadd.f32 %v9278_v38, %v2280_v24  ;;  %v3501_v43 = vld [vmem:[#allocation2 + $0x22] sm:$0xff] }
 0x205   : > { %v9674_v52 = vld [vmem:[#allocation2 + $0x21] sm:$0xff]  ;;  %v2282_v60 = vadd.f32 %v11306_v36, %v9330_v1  ;;  %v3091_v2 = vsel %vm9621_vm4, %v2962_v25, 0.0  ;;  %6975 = vmatprep.mubr.f32.mxu1 %v9672_v63  ;;  %7087 = vmatprep.mubr.f32.mxu0 %v3500_v23  ;;  %v3094_v38 = vsel %vm9635_vm11, %v2965_v55, 0.0  ;;  %v11067_v1 = vmax.f32 %v9669_v6, 0.0  ;;  %v2771_v29 = vpop.f32.mrf.mxu0 }
 0x206   : > { %3121 = vst [vmem:[#allocation2 + $0x40] sm:$0xff] %v3091_v2  ;;  %v9695_v24 = vadd.f32 %v9316_v50, %v2900_v13  ;;  %v2899_v59 = vmul.f32 %v9294_v62, %v2862_v58  ;;  %6976 = vmatmul.mubr.f32.gmra.mxu1 %v9674_v52  ;;  %7088 = vmatmul.mubr.f32.gmra.mxu0 %v3501_v43  ;;  %v11309_v36 = vld [vmem:[#allocation89_spill] sm:$0xff]  ;;  %3124 = vst [vmem:[#allocation2 + $0x58] sm:$0xff] %v3094_v38  ;;  %vm11310_vm4 = vcmp.ge.s32.totalorder %v9234_v53, 4  ;;  %v11317_v43 = vld [vmem:[#allocation90_spill] sm:$0xff] }
 0x207   : > { %v2575_v25 = vadd.f32 %v9322_v30, %v2283_v16  ;;  %v2285_v61 = vadd.f32 %v11309_v36, %v9350_v33  ;;  %vm9706_vm14 = vmand %vm3006_vm13, %vm11310_vm4  ;;  %v2865_v57 = vadd.f32 %v6918_v15, %v2573_v42  ;;  %7000 = vmatprep.subr.mxu1 %v3172_v4  ;;  %7168 = vmatprep.subr.mxu0 %v5455_v32  ;;  %v3171_v30 = vld [vmem:[%s11040_s2 + $0x60] sm:$0xff]  ;;  %v9717_v16 = vpop.f32.mrf.mxu1  ;;  %v3093_v3 = vsel %vm9656_vm5, %v11067_v1, 0.0  ;;  %v9733_v42 = vld [vmem:[#allocation2 + $0x31] sm:$0xff] }
 0x208   : > { %v11312_v45 = vsel %vm9706_vm14, 4294967295, %v11311_v45  ;;  %v5454_v33 = vld [vmem:[%s11040_s2 + $0x260] sm:$0xff]  ;;  %v11066_v55 = vmax.f32 %v9695_v24, 0.0  ;;  %v2936_v13 = vadd.f32 %v9316_v50, %v2899_v59  ;;  %vm11314_vm11 = vmmov %vm11310_vm4  ;;  %v2864_v23 = vadd.f32 %v2771_v29, %v2572_v21  ;;  %v3502_v2 = vld [vmem:[#allocation2 + $0x32] sm:$0xff]  ;;  %7001 = vmatpush3.msra.mxu1 %v3172_v4  ;;  %7169 = vmatpush3.msra.mxu0 %v5455_v32  ;;  %3123 = vst [vmem:[#allocation2 + $0x50] sm:$0xff] %v3093_v3  ;;  %v6921_v21 = vpop.f32.mrf.mxu0 }
 0x209   : > { %11313 = vst [vmem:[#allocation15_spill] sm:$0xff] %v11312_v45  ;;  %vm9729_vm4 = vmand %vm9686_vm9, %vm11314_vm11  ;;  %v2574_v15 = vadd.f32 %v9367_v44, %v2282_v60  ;;  %v2284_v38 = vadd.f32 %v11317_v43, %v9353_v48  ;;  %v2902_v59 = vmul.f32 %v9294_v62, %v2865_v57  ;;  %vm11318_vm7 = vcmp.le.s32.totalorder %v9224_v41, 5  ;;  %6978 = vmatprep.mubr.f32.mxu1 %v9733_v42  ;;  %v3170_v48 = vld [vmem:[%s11040_s2 + $0x58] sm:$0xff]  ;;  %v11332_v31 = vld [vmem:[#allocation62_spill] sm:$0xff] }
 0x20a   : > { %vm9743_vm9 = vmand %vm11063_vm2, %vm11318_vm7  ;;  %7090 = vmatprep.mubr.f32.mxu0 %v3502_v2  ;;  %v5453_v44 = vld [vmem:[%s11040_s2 + $0x258] sm:$0xff]  ;;  %v3096_v4 = vsel %vm9706_vm14, %v11066_v55, 0.0  ;;  %v9759_v32 = vmax.f32 %v2936_v13, 0.0  ;;  %v2901_v60 = vmul.f32 %v9294_v62, %v2864_v23  ;;  %vm11321_vm7 = vcmp.le.s32.totalorder %v9246_v7, 16  ;;  %7002 = vmatprep.subr.mxu1 %v3171_v30  ;;  %v2781_v43 = vpop.f32.mrf.mxu0  ;;  %v11334_v55 = vld [vmem:[#allocation65_spill] sm:$0xff] }
 0x20b   : > { %vm9766_vm11 = vmand %vm11321_vm7, %vm3006_vm13  ;;  %v2867_v57 = vadd.f32 %v6921_v21, %v2575_v25  ;;  %7170 = vmatprep.subr.mxu0 %v5454_v33  ;;  %v2577_v29 = vadd.f32 %v9429_v35, %v2285_v61  ;;  %v11324_v3 = vld [vmem:[#allocation92_spill] sm:$0xff]  ;;  %3126 = vst [vmem:[#allocation2 + $0x68] sm:$0xff] %v3096_v4  ;;  %v2939_v13 = vadd.f32 %v9316_v50, %v2902_v59  ;;  %vm11325_vm2 = vcmp.le.s32.totalorder %v9224_v41, 5  ;;  %v9783_v35 = vpop.f32.mrf.mxu1  ;;  %v5452_v21 = vld [vmem:[%s11040_s2 + $0x250] sm:$0xff] }
 0x20c   : > { %v2287_v2 = vadd.f32 %v11324_v3, %v9385_v19  ;;  %vm11326_vm3 = vmmov %vm11321_vm7  ;;  %vm11071_vm13 = vcmp.le.s32.totalorder %v9224_v41, 7  ;;  %7003 = vmatpush3.msra.mxu1 %v3171_v30  ;;  %7171 = vmatpush3.msra.mxu0 %v5454_v33  ;;  %v3095_v19 = vsel %vm9729_vm4, %v9759_v32, 0.0  ;;  %vm11329_vm7 = vcmp.ge.s32.totalorder %v9234_v53, 5  ;;  %v3169_v33 = vld [vmem:[%s11040_s2 + $0x50] sm:$0xff]  ;;  %v11333_v4 = vld [vmem:[#allocation64_spill] sm:$0xff] }
 0x20d   : > { %vm9778_vm14 = vmand %vm11326_vm3, %vm11325_vm2  ;;  %v11330_v25 = vmov 0  ;;  %v2938_v61 = vadd.f32 %v9316_v50, %v2901_v60  ;;  %v2904_v59 = vmul.f32 %v9294_v62, %v2867_v57  ;;  %v2866_v30 = vadd.f32 %v2781_v43, %v2574_v15  ;;  %7004 = vmatprep.subr.mxu1 %v3170_v48  ;;  %7172 = vmatprep.subr.mxu0 %v5453_v44  ;;  %v11335_v15 = vld [vmem:[#allocation93_spill] sm:$0xff] }
 0x20e   : > { %vm9792_vm5 = vmand %vm9743_vm9, %vm11329_vm7  ;;  %v9806_v3 = vadd.f32 %v11333_v4, %v11332_v31  ;;  %v9810_v60 = vadd.f32 %v11334_v55, %v9648_v46  ;;  %v2286_v57 = vadd.f32 %v11335_v15, %v9417_v14  ;;  %3125 = vst [vmem:[#allocation2 + $0x60] sm:$0xff] %v3095_v19  ;;  %v9814_v43 = vmax.f32 %v2939_v13, 0.0  ;;  %v6924_v31 = vpop.f32.mrf.mxu0  ;;  %v9824_v4 = vld [vmem:[#allocation2 + $0x39] sm:$0xff]  ;;  %7005 = vmatpush3.msra.mxu1 %v3170_v48 }
 0x20f   : > { %v11331_v25 = vsel %vm9792_vm5, 4294967295, %v11330_v25  ;;  %vm11336_vm2 = vcmp.ge.s32.totalorder %v9234_v53, 4  ;;  %v3503_v45 = vld [vmem:[#allocation2 + $0x3a] sm:$0xff]  ;;  %7173 = vmatpush3.msra.mxu0 %v5453_v44  ;;  %v2968_v46 = vmax.f32 %v2938_v61, 0.0  ;;  %v2941_v14 = vadd.f32 %v9316_v50, %v2904_v59  ;;  %vm11339_vm9 = vmmov %vm11329_vm7  ;;  %6979 = vmatmul.mubr.f32.gmra.mxu1 %v9824_v4  ;;  %v9864_v59 = vld [vmem:[#allocation2 + $0x49] sm:$0xff] }
 0x210   : > { %vm9820_vm3 = vmand %vm9766_vm11, %vm11336_vm2  ;;  %v2903_v36 = vmul.f32 %v9294_v62, %v2866_v30  ;;  %v2869_v13 = vadd.f32 %v6924_v31, %v2577_v29  ;;  %7091 = vmatmul.mubr.f32.gmra.mxu0 %v3503_v45  ;;  %v2576_v48 = vadd.f32 %v9476_v54, %v2284_v38  ;;  %v2579_v44 = vadd.f32 %v9535_v0, %v2287_v2  ;;  %v2791_v45 = vpop.f32.mrf.mxu0  ;;  %v3168_v54 = vld [vmem:[%s11040_s2 + $0x48] sm:$0xff]  ;;  %v9866_v15 = vld [vmem:[#allocation2 + $0x51] sm:$0xff] }
 0x211   : > { %vm9831_vm7 = vmand %vm9778_vm14, %vm11339_vm9  ;;  %v2289_v19 = vadd.f32 %v9162_v56, %v9449_v20  ;;  %v3098_v23 = vsel %vm9792_vm5, %v9814_v43, 0.0  ;;  %vm11343_vm11 = vcmp.le.s32.totalorder %v9224_v41, 5  ;;  %v11344_v29 = vmov 0  ;;  %7006 = vmatprep.subr.mxu1 %v3169_v33  ;;  %7174 = vmatprep.subr.mxu0 %v5452_v21  ;;  %v5451_v56 = vld [vmem:[%s11040_s2 + $0x248] sm:$0xff]  ;;  %v9858_v20 = vpop.f32.mrf.mxu1 }
 0x212   : > { %vm11342_vm14 = vmmov %vm11339_vm9  ;;  %3128 = vst [vmem:[#allocation2 + $0x78] sm:$0xff] %v3098_v23  ;;  %v3097_v0 = vsel %vm9820_vm3, %v2968_v46, 0.0  ;;  %v2971_v38 = vmax.f32 %v2941_v14, 0.0  ;;  %v2940_v2 = vadd.f32 %v9316_v50, %v2903_v36  ;;  %v2906_v61 = vmul.f32 %v9294_v62, %v2869_v13  ;;  %v3504_v30 = vld [vmem:[#allocation2 + $0x4a] sm:$0xff]  ;;  %7007 = vmatpush3.msra.mxu1 %v3169_v33  ;;  %7175 = vmatpush3.msra.mxu0 %v5452_v21  ;;  %v6927_v14 = vpop.f32.mrf.mxu0 }
 0x213   : > { %vm9848_vm2 = vmand %vm11343_vm11, %vm11342_vm14  ;;  %v2578_v31 = vadd.f32 %v9602_v10, %v2286_v57  ;;  %v2288_v23 = vadd.f32 %v9179_v26, %v9491_v27  ;;  %3127 = vst [vmem:[#allocation2 + $0x70] sm:$0xff] %v3097_v0  ;;  %v2868_v1 = vadd.f32 %v2791_v45, %v2576_v48  ;;  %vm11346_vm3 = vcmp.le.s32.totalorder %v9224_v41, 6  ;;  %6981 = vmatprep.mubr.f32.mxu1 %v9864_v59  ;;  %v3505_v10 = vld [vmem:[#allocation2 + $0x52] sm:$0xff]  ;;  %v11368_v57 = vld [vmem:[#allocation66_spill] sm:$0xff] }
 0x214   : > { %v11345_v29 = vsel %vm9848_vm2, 4294967295, %v11344_v29  ;;  %vm11347_vm9 = vcmp.ge.s32.totalorder %v9226_v17, 1  ;;  %7093 = vmatprep.mubr.f32.mxu0 %v3504_v30  ;;  %v3100_v26 = vsel %vm9831_vm7, %v2971_v38, 0.0  ;;  %v9883_v27 = vmax.f32 %v2940_v2, 0.0  ;;  %6982 = vmatmul.mubr.f32.gmra.mxu1 %v9866_v15  ;;  %v4281_v58 = vld [vmem:[#allocation2 + $0x68] sm:$0xff] }
 0x215   : > { %vm9875_vm14 = vmand %vm11347_vm9, %vm11346_vm3  ;;  %v2943_v33 = vadd.f32 %v9316_v50, %v2906_v61  ;;  %v2871_v21 = vadd.f32 %v6927_v14, %v2579_v44  ;;  %7094 = vmatmul.mubr.f32.gmra.mxu0 %v3505_v10  ;;  %v2581_v36 = vadd.f32 %v9666_v8, %v2289_v19  ;;  %v2291_v55 = vadd.f32 %v9192_v39, %v9585_v12  ;;  %v2801_v44 = vpop.f32.mrf.mxu0  ;;  %v3167_v8 = vld [vmem:[%s11040_s2 + $0x40] sm:$0xff]  ;;  %v9913_v12 = vpop.f32.mrf.mxu1 }
 0x216   : > { %vm11350_vm3 = vmmov %vm11347_vm9  ;;  %3130 = vst [vmem:[#allocation2 + $0x88] sm:$0xff] %v3100_v26  ;;  %vm11353_vm7 = vcmp.ge.s32.totalorder %v9234_v53, 6  ;;  %vm11354_vm11 = vcmp.le.s32.totalorder %v9224_v41, 6  ;;  %v11355_v13 = vmov 0  ;;  %v2905_v48 = vmul.f32 %v9294_v62, %v2868_v1  ;;  %7008 = vmatprep.subr.mxu1 %v3168_v54  ;;  %7176 = vmatprep.subr.mxu0 %v5451_v56  ;;  %v5450_v39 = vld [vmem:[%s11040_s2 + $0x240] sm:$0xff] }
 0x217   : > { %vm9890_vm9 = vmand %vm11350_vm3, %vm11071_vm13  ;;  %v3099_v19 = vsel %vm9848_vm2, %v9883_v27, 0.0  ;;  %v9918_v45 = vmax.f32 %v2943_v33, 0.0  ;;  %v11358_v0 = vmov 0  ;;  %v2908_v38 = vmul.f32 %v9294_v62, %v2871_v21  ;;  %v9929_v61 = vld [vmem:[#allocation2 + $0x61] sm:$0xff]  ;;  %7009 = vmatpush3.msra.mxu1 %v3168_v54  ;;  %7177 = vmatpush3.msra.mxu0 %v5451_v56  ;;  %v11367_v33 = vld [vmem:[#allocation67_spill] sm:$0xff] }
 0x218   : > { %vm9902_vm5 = vmand %vm11354_vm11, %vm11353_vm7  ;;  %v2870_v2 = vadd.f32 %v2801_v44, %v2578_v31  ;;  %v3506_v30 = vld [vmem:[#allocation2 + $0x62] sm:$0xff]  ;;  %v2580_v1 = vadd.f32 %v9717_v16, %v2288_v23  ;;  %v2290_v14 = vadd.f32 %v9208_v40, %v9644_v11  ;;  %3129 = vst [vmem:[#allocation2 + $0x80] sm:$0xff] %v3099_v19  ;;  %v2942_v46 = vadd.f32 %v9316_v50, %v2905_v48  ;;  %v6930_v31 = vpop.f32.mrf.mxu0  ;;  %v3166_v40 = vld [vmem:[%s11040_s2 + $0x38] sm:$0xff] }
 0x219   : > { %v11356_v13 = vsel %vm9902_vm5, 4294967295, %v11355_v13  ;;  %vm11357_vm11 = vmmov %vm11353_vm7  ;;  %v11361_v10 = vmov 0  ;;  %6984 = vmatprep.mubr.f32.mxu1 %v9929_v61  ;;  %7096 = vmatprep.mubr.f32.mxu0 %v3506_v30  ;;  %v5449_v11 = vld [vmem:[%s11040_s2 + $0x238] sm:$0xff]  ;;  %v3102_v16 = vsel %vm9902_vm5, %v9918_v45, 0.0  ;;  %v2945_v54 = vadd.f32 %v9316_v50, %v2908_v38  ;;  %v2539_v30 = vpop.f32.mrf.mxu1 }
 0x21a   : > { %vm9924_vm3 = vmand %vm9875_vm14, %vm11357_vm11  ;;  %vm11360_vm14 = vcmp.ge.s32.totalorder %v9234_v53, 7  ;;  %v2907_v56 = vmul.f32 %v9294_v62, %v2870_v2  ;;  %v2873_v26 = vadd.f32 %v6930_v31, %v2581_v36  ;;  %7010 = vmatprep.subr.mxu1 %v3167_v8  ;;  %7178 = vmatprep.subr.mxu0 %v5450_v39  ;;  %v1707_v21 = vadd.f32 %v11367_v33, %v9240_v28  ;;  %v11369_v48 = vld [vmem:[#allocation68_spill] sm:$0xff]  ;;  %v2811_v2 = vpop.f32.mrf.mxu0  ;;  %v3165_v28 = vld [vmem:[%s11040_s2 + $0x30] sm:$0xff] }
 0x21b   : > { %v11359_v0 = vsel %vm9924_vm3, 4294967295, %v11358_v0  ;;  %vm9939_vm7 = vmand %vm9890_vm9, %vm11360_vm14  ;;  %vm11363_vm9 = vcmp.le.s32.totalorder %v9224_v41, 6  ;;  %vm11364_vm14 = vcmp.le.s32.totalorder %v9246_v7, 16  ;;  %v2000_v44 = vadd.f32 %v11369_v48, %v11368_v57  ;;  %3132 = vst [vmem:[#allocation2 + $0x98] sm:$0xff] %v3102_v16  ;;  %7011 = vmatpush3.msra.mxu1 %v3167_v8  ;;  %7179 = vmatpush3.msra.mxu0 %v5450_v39  ;;  %v9987_v16 = vld [vmem:[#allocation2 + $0x69] sm:$0xff] }
 0x21c   : > { %v11362_v10 = vsel %vm9939_vm7, 4294967295, %v11361_v10  ;;  %vm9960_vm11 = vmand %vm11364_vm14, %vm11363_vm9  ;;  %v2293_v19 = vadd.f32 %v9222_v49, %v9806_v3  ;;  %v9970_v38 = vmax.f32 %v2942_v46, 0.0  ;;  %v9983_v49 = vmax.f32 %v2945_v54, 0.0  ;;  %v9989_v33 = vld [vmem:[#allocation2 + $0x6a] sm:$0xff]  ;;  %7012 = vmatprep.subr.mxu1 %v3166_v40  ;;  %7180 = vmatprep.subr.mxu0 %v5449_v11  ;;  %v6933_v57 = vpop.f32.mrf.mxu0 }
 0x21d   : > { %vm11370_vm9 = vmmov %vm11364_vm14  ;;  %v2944_v3 = vadd.f32 %v9316_v50, %v2907_v56  ;;  %v2910_v46 = vmul.f32 %v9294_v62, %v2873_v26  ;;  %v2872_v31 = vadd.f32 %v2811_v2, %v2580_v1  ;;  %v5448_v8 = vld [vmem:[%s11040_s2 + $0x230] sm:$0xff]  ;;  %v2583_v39 = vadd.f32 %v9783_v35, %v2291_v55  ;;  %6985 = vmatmul.mubr.f32.gmra.mxu1 %v9987_v16 }
 0x21e   : > { %vm9976_vm14 = vmand %vm11370_vm9, %vm11071_vm13  ;;  %v2582_v54 = vadd.f32 %v9858_v20, %v2290_v14  ;;  %v2292_v56 = vadd.f32 %v9243_v37, %v9810_v60  ;;  %v3101_v1 = vsel %vm9924_vm3, %v9970_v38, 0.0  ;;  %vm11373_vm9 = vcmp.ge.s32.totalorder %v9234_v53, 6  ;;  %7097 = vmatmul.mubr.f32.gmra.mxu0 %v9989_v33  ;;  %7013 = vmatpush3.msra.mxu1 %v3166_v40  ;;  %v2821_v2 = vpop.f32.mrf.mxu0  ;;  %v6862_v40 = vpop.f32.mrf.mxu1  ;;  %v3163_v20 = vld [vmem:[%s11040_s2 + $0x20] sm:$0xff] }
 0x21f   : > { %vm10005_vm13 = vmand %vm9960_vm11, %vm11373_vm9  ;;  %3131 = vst [vmem:[#allocation2 + $0x90] sm:$0xff] %v3101_v1  ;;  %v3104_v37 = vsel %vm9939_vm7, %v9983_v49, 0.0  ;;  %v2974_v35 = vmax.f32 %v2944_v3, 0.0  ;;  %v2947_v60 = vadd.f32 %v9316_v50, %v2910_v46  ;;  %vm11376_vm5 = vcmp.ge.s32.totalorder %v9234_v53, 7  ;;  %7181 = vmatpush3.msra.mxu0 %v5449_v11  ;;  %7014 = vmatprep.subr.mxu1 %v3165_v28  ;;  %v10044_v46 = vld [vmem:[#allocation2 + $0x79] sm:$0xff] }
 0x220   : > { %vm10019_vm11 = vmand %vm9976_vm14, %vm11376_vm5  ;;  %v2909_v55 = vmul.f32 %v9294_v62, %v2872_v31  ;;  %v2585_v14 = vadd.f32 %v9913_v12, %v2293_v19  ;;  %v2295_v23 = vadd.f32 %v9255_v5, %v2000_v44  ;;  %3134 = vst [vmem:[#allocation2 + $0xa8] sm:$0xff] %v3104_v37  ;;  %v2875_v48 = vadd.f32 %v6933_v57, %v2583_v39  ;;  %v3164_v12 = vld [vmem:[%s11040_s2 + $0x28] sm:$0xff]  ;;  %v10046_v31 = vld [vmem:[#allocation2 + $0x7a] sm:$0xff] }
 0x221   : > { %vm11379_vm7 = vcmp.le.s32.totalorder %v9224_v41, 8  ;;  %vm11380_vm5 = vcmp.ge.s32.totalorder %v9226_v17, 1  ;;  %7182 = vmatprep.subr.mxu0 %v5448_v8  ;;  %v5447_v5 = vld [vmem:[%s11040_s2 + $0x228] sm:$0xff]  ;;  %v3103_v11 = vsel %vm10005_vm13, %v2974_v35, 0.0  ;;  %v2977_v44 = vmax.f32 %v2947_v60, 0.0  ;;  %7015 = vmatpush3.msra.mxu1 %v3165_v28  ;;  %v11383_v1 = vld [vmem:[#allocation69_spill] sm:$0xff]  ;;  %v6936_v35 = vpop.f32.mrf.mxu0 }
 0x222   : > { %vm10031_vm14 = vmand %vm11380_vm5, %vm11379_vm7  ;;  %v2946_v19 = vadd.f32 %v9316_v50, %v2909_v55  ;;  %v2874_v3 = vadd.f32 %v2821_v2, %v2582_v54  ;;  %v10048_v39 = vld [vmem:[#allocation2 + $0x81] sm:$0xff]  ;;  %7183 = vmatpush3.msra.mxu0 %v5448_v8  ;;  %v1999_v57 = vadd.f32 %v11383_v1, %v1707_v21  ;;  %v2584_v37 = vadd.f32 %v2539_v30, %v2292_v56  ;;  %v3162_v1 = vld [vmem:[%s11040_s2 + $0x18] sm:$0xff] }
 0x223   : > { %3133 = vst [vmem:[#allocation2 + $0xa0] sm:$0xff] %v3103_v11  ;;  %vm11384_vm7 = vcmp.ge.s32.totalorder %v9234_v53, 7  ;;  %vm11385_vm13 = vcmp.le.s32.totalorder %v9224_v41, 7  ;;  %v11386_v26 = vmov 0  ;;  %v2912_v54 = vmul.f32 %v9294_v62, %v2875_v48  ;;  %6987 = vmatprep.mubr.f32.mxu1 %v10044_v46  ;;  %7099 = vmatprep.mubr.f32.mxu0 %v10046_v31  ;;  %v10063_v21 = vld [vmem:[#allocation2 + $0x82] sm:$0xff] }
 0x224   : > { %vm10055_vm5 = vmand %vm11385_vm13, %vm11384_vm7  ;;  %vm11078_vm9 = vcmp.le.s32.totalorder %v9224_v41, 9  ;;  %v3106_v28 = vsel %vm10019_vm11, %v2977_v44, 0.0  ;;  %v10067_v30 = vmax.f32 %v2946_v19, 0.0  ;;  %vm11388_vm7 = vcmp.ge.s32.totalorder %v9234_v53, 8  ;;  %6988 = vmatmul.mubr.f32.gmra.mxu1 %v10048_v39  ;;  %7100 = vmatmul.mubr.f32.gmra.mxu0 %v10063_v21  ;;  %v5446_v55 = vld [vmem:[%s11040_s2 + $0x220] sm:$0xff]  ;;  %v2831_v44 = vpop.f32.mrf.mxu0  ;;  %v2549_v19 = vpop.f32.mrf.mxu1 }
 0x225   : > { %v11387_v26 = vsel %vm10055_vm5, 4294967295, %v11386_v26  ;;  %vm11389_vm13 = vcmp.le.s32.totalorder %v9224_v41, 8  ;;  %v11390_v8 = vmov 0  ;;  %v2911_v56 = vmul.f32 %v9294_v62, %v2874_v3  ;;  %3136 = vst [vmem:[#allocation2 + $0xb8] sm:$0xff] %v3106_v28  ;;  %vm11392_vm11 = vmmov %vm11388_vm7  ;;  %7016 = vmatprep.subr.mxu1 %v3164_v12  ;;  %7184 = vmatprep.subr.mxu0 %v5447_v5 }
 0x226   : > { %vm10073_vm3 = vmand %vm11389_vm13, %vm11388_vm7  ;;  %v2877_v60 = vadd.f32 %v6936_v35, %v2585_v14  ;;  %v2294_v48 = vadd.f32 %v9271_v22, %v1999_v57  ;;  %v2587_v2 = vadd.f32 %v6862_v40, %v2295_v23  ;;  %v2949_v11 = vadd.f32 %v9316_v50, %v2912_v54  ;;  %7017 = vmatpush3.msra.mxu1 %v3164_v12  ;;  %v6939_v54 = vpop.f32.mrf.mxu0  ;;  %v10115_v35 = vld [vmem:[#allocation2 + $0x91] sm:$0xff]  ;;  %v4081_v14 = vld [vmem:[#allocation2 + $0x1a] sm:$0xff] }
 0x227   : > { %v11391_v8 = vsel %vm10073_vm3, 4294967295, %v11390_v8  ;;  %vm10092_vm7 = vmand %vm10031_vm14, %vm11392_vm11  ;;  %v3105_v22 = vsel %vm10055_vm5, %v10067_v30, 0.0  ;;  %v2948_v23 = vadd.f32 %v9316_v50, %v2911_v56  ;;  %vm11395_vm14 = vcmp.ge.s32.totalorder %v9226_v17, 1  ;;  %7185 = vmatpush3.msra.mxu0 %v5447_v5  ;;  %v10117_v28 = vld [vmem:[#allocation2 + $0x92] sm:$0xff]  ;;  %7018 = vmatprep.subr.mxu1 %v3163_v20 }
 0x228   : > { %v2914_v40 = vmul.f32 %v9294_v62, %v2877_v60  ;;  %vm10106_vm11 = vmand %vm11395_vm14, %vm11078_vm9  ;;  %v2876_v3 = vadd.f32 %v2831_v44, %v2584_v37  ;;  %3135 = vst [vmem:[#allocation2 + $0xb0] sm:$0xff] %v3105_v22  ;;  %v10113_v57 = vmax.f32 %v2949_v11, 0.0  ;;  %7186 = vmatprep.subr.mxu0 %v5446_v55  ;;  %v5445_v17 = vld [vmem:[%s11040_s2 + $0x218] sm:$0xff]  ;;  %vm11399_vm9 = vcmp.le.s32.totalorder %v9246_v7, 16  ;;  %6990 = vmatprep.mubr.f32.mxu1 %v10115_v35  ;;  %v4082_v22 = vld [vmem:[#allocation2 + $0x22] sm:$0xff] }
 0x229   : > { %v10122_v12 = vmax.f32 %v2948_v23, 0.0  ;;  %vm11398_vm14 = vmmov %vm11389_vm13  ;;  %v2879_v60 = vadd.f32 %v6939_v54, %v2587_v2  ;;  %7102 = vmatprep.mubr.f32.mxu0 %v10117_v28  ;;  %v2586_v11 = vadd.f32 %v2549_v19, %v2294_v48  ;;  %vm11402_vm5 = vcmp.ge.s32.totalorder %v9234_v53, 9  ;;  %v2841_v23 = vpop.f32.mrf.mxu0  ;;  %7019 = vmatpush3.msra.mxu1 %v3163_v20  ;;  %v3161_v2 = vld [vmem:[%s11040_s2 + $0x10] sm:$0xff]  ;;  %v5441_v56 = vld [vmem:[%s11040_s2 + $0x1f8] sm:$0xff] }
 0x22a   : > { %v10125_v5 = vadd.f32 %v9316_v50, %v2914_v40  ;;  %v2913_v37 = vmul.f32 %v9294_v62, %v2876_v3  ;;  %vm10132_vm13 = vmand %vm11399_vm9, %vm11398_vm14  ;;  %v3108_v44 = vsel %vm10073_vm3, %v10113_v57, 0.0  ;;  %7187 = vmatpush3.msra.mxu0 %v5446_v55  ;;  %v5444_v48 = vld [vmem:[%s11040_s2 + $0x210] sm:$0xff]  ;;  %vm11405_vm9 = vcmp.le.s32.totalorder %v9224_v41, 9  ;;  %v10169_v3 = vld [vmem:[#allocation2 + $0x99] sm:$0xff]  ;;  %7020 = vmatprep.subr.mxu1 %v3162_v1 }
 0x22b   : > { %vm10145_vm2 = vmand %vm10106_vm11, %vm11402_vm5  ;;  %3138 = vst [vmem:[#allocation2 + $0xc8] sm:$0xff] %v3108_v44  ;;  %v3107_v19 = vsel %vm10092_vm7, %v10122_v12, 0.0  ;;  %v2916_v20 = vmul.f32 %v9294_v62, %v2879_v60  ;;  %vm11406_vm5 = vcmp.le.s32.totalorder %v9246_v7, 16  ;;  %v10171_v54 = vld [vmem:[#allocation2 + $0x9a] sm:$0xff]  ;;  %7188 = vmatprep.subr.mxu0 %v5445_v17  ;;  %vm11409_vm14 = vcmp.ge.s32.totalorder %v9234_v53, 8  ;;  %6991 = vmatmul.mubr.f32.gmra.mxu1 %v10169_v3 }
 0x22c   : > { %v2981_v40 = vmax.f32 %v10125_v5, 0.0  ;;  %v2950_v36 = vadd.f32 %v9316_v50, %v2913_v37  ;;  %vm10165_vm11 = vmand %vm11406_vm5, %vm11405_vm9  ;;  %3137 = vst [vmem:[#allocation2 + $0xc0] sm:$0xff] %v3107_v19  ;;  %v2878_v7 = vadd.f32 %v2841_v23, %v2586_v11  ;;  %7103 = vmatmul.mubr.f32.gmra.mxu0 %v10171_v54  ;;  %7021 = vmatpush3.msra.mxu1 %v3162_v1  ;;  %v3160_v23 = vld [vmem:[%s11040_s2 + $0x8] sm:$0xff]  ;;  %vm11416_vm5 = vcmp.le.s32.totalorder %v9224_v41, 9  ;;  %v5442_v41 = vld [vmem:[%s11040_s2 + $0x200] sm:$0xff] }
 0x22d   : > { %vm10177_vm3 = vmand %vm10132_vm13, %vm11409_vm14  ;;  %v2953_v19 = vadd.f32 %v9316_v50, %v2916_v20  ;;  %7189 = vmatpush3.msra.mxu0 %v5445_v17  ;;  %vm11412_vm13 = vcmp.ge.s32.totalorder %v9234_v53, 9  ;;  %7022 = vmatprep.subr.mxu1 %v3161_v2  ;;  %v5443_v1 = vld [vmem:[%s11040_s2 + $0x208] sm:$0xff]  ;;  %v11419_v53 = vmax.f32 %v9371_v9, 0.0  ;;  %v5489_v9 = vld [vmem:[%s11040_s2 + $0x378] sm:$0xff]  ;;  %vm11446_vm14 = vnez %v11387_v26 }
 0x22e   : > { %v3110_v60 = vsel %vm10145_vm2, %v2981_v40, 0.0  ;;  %v2980_v44 = vmax.f32 %v2950_v36, 0.0  ;;  %vm10192_vm9 = vmand %vm10165_vm11, %vm11412_vm13  ;;  %v2915_v11 = vmul.f32 %v9294_v62, %v2878_v7  ;;  %7190 = vmatprep.subr.mxu0 %v5444_v48  ;;  %7023 = vmatpush3.msra.mxu1 %v3161_v2  ;;  %v5459_v26 = vld [vmem:[%s11040_s2 + $0x288] sm:$0xff]  ;;  %v10625_v5 = vld [vmem:[%s11040_s2 + $0x400] sm:$0xff] }
 0x22f   : > { %3140 = vst [vmem:[#allocation2 + $0xd8] sm:$0xff] %v3110_v60  ;;  %v2983_v36 = vmax.f32 %v2953_v19, 0.0  ;;  %v10205_v20 = vld [vmem:[#allocation2 + $0xa9] sm:$0xff]  ;;  %7191 = vmatpush3.msra.mxu0 %v5444_v48  ;;  %v10209_v62 = vld [vmem:[#allocation2 + $0xb1] sm:$0xff]  ;;  %7024 = vmatprep.subr.mxu1 %v3160_v23  ;;  %v3159_v48 = vld [vmem:[%s11040_s2] sm:$0xff] }
 0x230   : > { %v3109_v17 = vsel %vm10177_vm3, %v2980_v44, 0.0  ;;  %v10207_v55 = vld [vmem:[#allocation2 + $0xaa] sm:$0xff]  ;;  %v10212_v7 = vadd.f32 %v9316_v50, %v2915_v11  ;;  %6993 = vmatprep.mubr.f32.mxu1 %v10205_v20  ;;  %v10216_v60 = vld [vmem:[#allocation2 + $0xb2] sm:$0xff]  ;;  %vm11415_vm3 = vmmov %vm11412_vm13  ;;  %7192 = vmatprep.subr.mxu0 %v5443_v1 }
 0x231   : > { %3139 = vst [vmem:[#allocation2 + $0xd0] sm:$0xff] %v3109_v17  ;;  %7105 = vmatprep.mubr.f32.mxu0 %v10207_v55  ;;  %v3112_v37 = vsel %vm10192_vm9, %v2983_v36, 0.0  ;;  %vm10224_vm11 = vmand %vm11416_vm5, %vm11415_vm3  ;;  %6994 = vmatmul.mubr.f32.gmra.mxu1 %v10209_v62  ;;  %v11421_v11 = vld [vmem:[#allocation3_spill] sm:$0xff]  ;;  %v11424_v36 = vmax.f32 %v9404_v18, 0.0  ;;  %v11425_v18 = vld [vmem:[#allocation6_spill] sm:$0xff] }
 0x232   : > { %3142 = vst [vmem:[#allocation2 + $0xe8] sm:$0xff] %v3112_v37  ;;  %v2982_v50 = vmax.f32 %v10212_v7, 0.0  ;;  %7106 = vmatmul.mubr.f32.gmra.mxu0 %v10216_v60  ;;  %7025 = vmatpush3.msra.mxu1 %v3160_v23  ;;  %v11422_v23 = vmax.f32 %v11421_v11, 0.0  ;;  %v5487_v37 = vld [vmem:[%s11040_s2 + $0x368] sm:$0xff]  ;;  %v5484_v11 = vld [vmem:[%s11040_s2 + $0x350] sm:$0xff] }
 0x233   : > { %7517 = vmatprep.mubr.msk.f32.mxu1 %vm9394_vm12, %v11419_v53  ;;  %7193 = vmatpush3.msra.mxu0 %v5443_v1  ;;  %v5488_v1 = vld [vmem:[%s11040_s2 + $0x370] sm:$0xff]  ;;  %v11428_v53 = vmax.f32 %v9543_v47, 0.0  ;;  %v11430_v47 = vld [vmem:[#allocation8_spill] sm:$0xff] }
 0x234   : > { %v3111_v19 = vsel %vm10224_vm11, %v2982_v50, 0.0  ;;  %7196 = vmatprep.mubr.f32.mxu0 %v9672_v63  ;;  %7026 = vmatprep.subr.mxu1 %v3159_v48  ;;  %v5440_v63 = vld [vmem:[%s11040_s2 + $0x1f0] sm:$0xff] }
 0x235   : > { %3141 = vst [vmem:[#allocation2 + $0xe0] sm:$0xff] %v3111_v19  ;;  %7194 = vmatprep.subr.mxu0 %v5442_v41  ;;  %7027 = vmatpush3.msra.mxu1 %v3159_v48  ;;  %v11426_v48 = vmax.f32 %v11425_v18, 0.0  ;;  %v5485_v19 = vld [vmem:[%s11040_s2 + $0x358] sm:$0xff]  ;;  %v5480_v18 = vld [vmem:[%s11040_s2 + $0x330] sm:$0xff] }
 0x236   : > { %7195 = vmatpush3.msra.mxu0 %v5442_v41  ;;  %7518 = vmatmul.mubr.msk.f32.vlgmr.msra.gmra.mxu1 %vm9362_vm8, %v11422_v23  ;;  %v5486_v41 = vld [vmem:[%s11040_s2 + $0x360] sm:$0xff]  ;;  %v11433_v23 = vld [vmem:[#allocation12_spill] sm:$0xff]  ;;  %vm11437_vm8 = vnez %v11305_v34  ;;  %v5476_v44 = vld [vmem:[%s11040_s2 + $0x310] sm:$0xff] }
 0x237   : > { %7108 = vmatprep.subr.mxu1 %v5441_v56  ;;  %7197 = vmatmul.mubr.f32.vlgmr.msra.gmra.mxu0 %v9674_v52  ;;  %v5439_v52 = vld [vmem:[%s11040_s2 + $0x1e8] sm:$0xff]  ;;  %v11434_v17 = vmax.f32 %v11433_v23, 0.0  ;;  %v5433_v34 = vld [vmem:[%s11040_s2 + $0x1b8] sm:$0xff]  ;;  %v4276_v23 = vld [vmem:[#allocation2 + $0x30] sm:$0xff] }
 0x238   : > { %7276 = vmatprep.subr.mxu0 %v5489_v9  ;;  %7519 = vmatprep.mubr.msk.f32.mxu1 %vm9425_vm15, %v11424_v36  ;;  %v11436_v36 = vmax.f32 %v9669_v6, 0.0  ;;  %v5481_v6 = vld [vmem:[%s11040_s2 + $0x338] sm:$0xff]  ;;  %vm11441_vm15 = vnez %v11331_v25  ;;  %v5504_v7 = vld [vmem:[%s11040_s2 + $0x3f0] sm:$0xff] }
 0x239   : > { %7109 = vmatpush3.msra.mxu1 %v5441_v56  ;;  %7199 = vmatprep.mubr.f32.mxu0 %v9733_v42  ;;  %v5438_v42 = vld [vmem:[%s11040_s2 + $0x1e0] sm:$0xff]  ;;  %v11431_v56 = vmax.f32 %v11430_v47, 0.0  ;;  %v5475_v47 = vld [vmem:[%s11040_s2 + $0x308] sm:$0xff]  ;;  %v3701_v25 = vld [vmem:[#allocation2 + $0x78] sm:$0xff] }
 0x23a   : > { %7277 = vmatpush3.msra.mxu0 %v5489_v9  ;;  %7110 = vmatprep.subr.mxu1 %v5440_v63  ;;  %v3693_v9 = vld [vmem:[#allocation2 + $0x18] sm:$0xff]  ;;  %v4666_v2 = vld [vmem:[#allocation2 + $0x4a] sm:$0xff] }
 0x23b   : > { %7278 = vmatprep.subr.mxu0 %v5488_v1  ;;  %7111 = vmatpush3.msra.mxu1 %v5440_v63  ;;  %v10420_v63 = vld [vmem:[%s11040_s2 + $0x478] sm:$0xff] }
 0x23c   : > { %7279 = vmatpush3.msra.mxu0 %v5488_v1  ;;  %7520 = vmatmul.mubr.msk.f32.gmra.mxu1 %vm9485_vm10, %v11426_v48  ;;  %v5483_v1 = vld [vmem:[%s11040_s2 + $0x348] sm:$0xff]  ;;  %vm11442_vm10 = vnez %v11345_v29  ;;  %v5430_v48 = vld [vmem:[%s11040_s2 + $0x1a0] sm:$0xff] }
 0x23d   : > { %7112 = vmatprep.subr.mxu1 %v5439_v52  ;;  %7200 = vmatmul.mubr.f32.gmra.mxu0 %v9824_v4  ;;  %v5437_v4 = vld [vmem:[%s11040_s2 + $0x1d8] sm:$0xff]  ;;  %v5463_v29 = vld [vmem:[%s11040_s2 + $0x2a8] sm:$0xff] }
 0x23e   : > { %7280 = vmatprep.subr.mxu0 %v5487_v37  ;;  %7521 = vmatprep.mubr.msk.f32.mxu1 %vm9549_vm6, %v11428_v53  ;;  %vm11444_vm6 = vnez %v11356_v13  ;;  %v5428_v53 = vld [vmem:[%s11040_s2 + $0x190] sm:$0xff]  ;;  %v5461_v13 = vld [vmem:[%s11040_s2 + $0x298] sm:$0xff] }
 0x23f   : > { %7113 = vmatpush3.msra.mxu1 %v5439_v52  ;;  %7202 = vmatprep.mubr.f32.mxu0 %v9864_v59  ;;  %v5436_v59 = vld [vmem:[%s11040_s2 + $0x1d0] sm:$0xff]  ;;  %v5482_v52 = vld [vmem:[%s11040_s2 + $0x340] sm:$0xff] }
 0x240   : > { %7281 = vmatpush3.msra.mxu0 %v5487_v37  ;;  %7114 = vmatprep.subr.mxu1 %v5438_v42  ;;  %v11439_v37 = vld [vmem:[#allocation15_spill] sm:$0xff] }
 0x241   : > { %7282 = vmatprep.subr.mxu0 %v5486_v41  ;;  %7115 = vmatpush3.msra.mxu1 %v5438_v42  ;;  %vm11440_vm12 = vnez %v11439_v37  ;;  %v5429_v42 = vld [vmem:[%s11040_s2 + $0x198] sm:$0xff]  ;;  %v5470_v37 = vld [vmem:[%s11040_s2 + $0x2e0] sm:$0xff] }
 0x242   : > { %7283 = vmatpush3.msra.mxu0 %v5486_v41  ;;  %7522 = vmatmul.mubr.msk.f32.gmra.mxu1 %vm9531_vm0, %v11431_v56  ;;  %vm11443_vm0 = vnez %v11359_v0  ;;  %v5477_v41 = vld [vmem:[%s11040_s2 + $0x318] sm:$0xff]  ;;  %v10405_v56 = vld [vmem:[#allocation2 + $0xc9] sm:$0xff]  ;;  %v5462_v0 = vld [vmem:[%s11040_s2 + $0x2a0] sm:$0xff] }
 0x243   : > { %7116 = vmatprep.subr.mxu1 %v5437_v4  ;;  %7203 = vmatmul.mubr.f32.gmra.mxu0 %v9866_v15  ;;  %v5435_v15 = vld [vmem:[%s11040_s2 + $0x1c8] sm:$0xff] }
 0x244   : > { %7284 = vmatprep.subr.mxu0 %v5485_v19  ;;  %7523 = vmatprep.mubr.msk.f32.mxu1 %vm9561_vm1, %v11434_v17  ;;  %vm11445_vm1 = vnez %v11362_v10  ;;  %v5473_v17 = vld [vmem:[%s11040_s2 + $0x2f8] sm:$0xff]  ;;  %v5460_v10 = vld [vmem:[%s11040_s2 + $0x290] sm:$0xff] }
 0x245   : > { %7117 = vmatpush3.msra.mxu1 %v5437_v4  ;;  %7205 = vmatprep.mubr.f32.mxu0 %v9929_v61  ;;  %v5434_v61 = vld [vmem:[%s11040_s2 + $0x1c0] sm:$0xff] }
 0x246   : > { %7285 = vmatpush3.msra.mxu0 %v5485_v19  ;;  %7118 = vmatprep.subr.mxu1 %v5436_v59  ;;  %v10393_v4 = vld [vmem:[#allocation2 + $0xc1] sm:$0xff] }
 0x247   : > { %7286 = vmatprep.subr.mxu0 %v5484_v11  ;;  %7119 = vmatpush3.msra.mxu1 %v5436_v59  ;;  %v5427_v19 = vld [vmem:[%s11040_s2 + $0x188] sm:$0xff]  ;;  %v5426_v59 = vld [vmem:[%s11040_s2 + $0x180] sm:$0xff] }
 0x248   : > { %7287 = vmatpush3.msra.mxu0 %v5484_v11  ;;  %7524 = vmatmul.mubr.msk.f32.gmra.mxu1 %vm11437_vm8, %v11436_v36  ;;  %v5474_v11 = vld [vmem:[%s11040_s2 + $0x300] sm:$0xff]  ;;  %v5472_v36 = vld [vmem:[%s11040_s2 + $0x2f0] sm:$0xff] }
 0x249   : > { %7120 = vmatprep.subr.mxu1 %v5435_v15  ;;  %7206 = vmatmul.mubr.f32.gmra.mxu0 %v9987_v16  ;;  %v11438_v16 = vmax.f32 %v9695_v24, 0.0  ;;  %v5431_v24 = vld [vmem:[%s11040_s2 + $0x1a8] sm:$0xff] }
 0x24a   : > { %7288 = vmatprep.subr.mxu0 %v5483_v1  ;;  %7525 = vmatprep.mubr.msk.f32.mxu1 %vm9729_vm4, %v9759_v32 }
 0x24b   : > { %7121 = vmatpush3.msra.mxu1 %v5435_v15  ;;  %7208 = vmatprep.mubr.f32.mxu0 %v10044_v46  ;;  %v5432_v46 = vld [vmem:[%s11040_s2 + $0x1b0] sm:$0xff]  ;;  %v3694_v15 = vld [vmem:[#allocation2 + $0x20] sm:$0xff] }
 0x24c   : > { %7289 = vmatpush3.msra.mxu0 %v5483_v1  ;;  %7122 = vmatprep.subr.mxu1 %v5434_v61  ;;  %v4277_v1 = vld [vmem:[#allocation2 + $0x38] sm:$0xff] }
 0x24d   : > { %7290 = vmatprep.subr.mxu0 %v5482_v52  ;;  %7123 = vmatpush3.msra.mxu1 %v5434_v61  ;;  %v10429_v61 = vld [vmem:[%s11040_s2 + $0x470] sm:$0xff] }
 0x24e   : > { %7291 = vmatpush3.msra.mxu0 %v5482_v52  ;;  %7526 = vmatmul.mubr.msk.f32.gmra.mxu1 %vm11440_vm12, %v11438_v16  ;;  %v4278_v52 = vld [vmem:[#allocation2 + $0x48] sm:$0xff]  ;;  %v4279_v16 = vld [vmem:[#allocation2 + $0x50] sm:$0xff] }
 0x24f   : > { %7124 = vmatprep.subr.mxu1 %v5433_v34  ;;  %7209 = vmatmul.mubr.f32.gmra.mxu0 %v10048_v39  ;;  %v5479_v39 = vld [vmem:[%s11040_s2 + $0x328] sm:$0xff] }
 0x250   : > { %7292 = vmatprep.subr.mxu0 %v5481_v6  ;;  %7527 = vmatprep.mubr.msk.f32.mxu1 %vm11441_vm15, %v9814_v43 }
 0x251   : > { %7125 = vmatpush3.msra.mxu1 %v5433_v34  ;;  %7211 = vmatprep.mubr.f32.mxu0 %v10115_v35  ;;  %v5471_v34 = vld [vmem:[%s11040_s2 + $0x2e8] sm:$0xff] }
 0x252   : > { %7293 = vmatpush3.msra.mxu0 %v5481_v6  ;;  %7126 = vmatprep.subr.mxu1 %v5432_v46  ;;  %v10439_v6 = vld [vmem:[%s11040_s2 + $0x468] sm:$0xff] }
 0x253   : > { %7294 = vmatprep.subr.mxu0 %v5480_v18  ;;  %7127 = vmatpush3.msra.mxu1 %v5432_v46  ;;  %v10449_v46 = vld [vmem:[%s11040_s2 + $0x460] sm:$0xff] }
 0x254   : > { %7295 = vmatpush3.msra.mxu0 %v5480_v18  ;;  %7528 = vmatmul.mubr.msk.f32.gmra.mxu1 %vm11442_vm10, %v9883_v27  ;;  %v5469_v18 = vld [vmem:[%s11040_s2 + $0x2d8] sm:$0xff] }
 0x255   : > { %7128 = vmatprep.subr.mxu1 %v5431_v24  ;;  %7212 = vmatmul.mubr.f32.gmra.mxu0 %v10169_v3 }
 0x256   : > { %7296 = vmatprep.subr.mxu0 %v5479_v39  ;;  %7529 = vmatprep.mubr.msk.f32.mxu1 %vm11443_vm0, %v9970_v38 }
 0x257   : > { %7129 = vmatpush3.msra.mxu1 %v5431_v24  ;;  %7214 = vmatprep.mubr.f32.mxu0 %v10205_v20  ;;  %v10462_v24 = vld [vmem:[%s11040_s2 + $0x458] sm:$0xff] }
 0x258   : > { %7297 = vmatpush3.msra.mxu0 %v5479_v39  ;;  %7130 = vmatprep.subr.mxu1 %v5430_v48  ;;  %v5468_v39 = vld [vmem:[%s11040_s2 + $0x2d0] sm:$0xff] }
 0x259   : > { %7298 = vmatprep.subr.mxu0 %v5478_v51  ;;  %7131 = vmatpush3.msra.mxu1 %v5430_v48  ;;  %v10472_v48 = vld [vmem:[%s11040_s2 + $0x450] sm:$0xff] }
 0x25a   : > { %7299 = vmatpush3.msra.mxu0 %v5478_v51  ;;  %7530 = vmatmul.mubr.msk.f32.gmra.mxu1 %vm11444_vm6, %v9918_v45  ;;  %v5467_v51 = vld [vmem:[%s11040_s2 + $0x2c8] sm:$0xff] }
 0x25b   : > { %7132 = vmatprep.subr.mxu1 %v5429_v42  ;;  %7215 = vmatmul.mubr.f32.gmra.mxu0 %v10209_v62 }
 0x25c   : > { %7300 = vmatprep.subr.mxu0 %v5477_v41  ;;  %7531 = vmatprep.mubr.msk.f32.mxu1 %vm11445_vm1, %v9983_v49 }
 0x25d   : > { %7133 = vmatpush3.msra.mxu1 %v5429_v42  ;;  %7217 = vmatprep.mubr.f32.mxu0 %v10393_v4  ;;  %v10485_v42 = vld [vmem:[%s11040_s2 + $0x448] sm:$0xff] }
 0x25e   : > { %7301 = vmatpush3.msra.mxu0 %v5477_v41  ;;  %7134 = vmatprep.subr.mxu1 %v5428_v53  ;;  %v10498_v41 = vld [vmem:[%s11040_s2 + $0x440] sm:$0xff] }
 0x25f   : > { %7302 = vmatprep.subr.mxu0 %v5476_v44  ;;  %7135 = vmatpush3.msra.mxu1 %v5428_v53  ;;  %v5465_v53 = vld [vmem:[%s11040_s2 + $0x2b8] sm:$0xff] }
 0x260   : > { %7303 = vmatpush3.msra.mxu0 %v5476_v44  ;;  %7532 = vmatmul.mubr.msk.f32.gmra.mxu1 %vm11446_vm14, %v10067_v30  ;;  %v10511_v44 = vld [vmem:[%s11040_s2 + $0x438] sm:$0xff] }
 0x261   : > { %7136 = vmatprep.subr.mxu1 %v5427_v19  ;;  %7218 = vmatmul.mubr.f32.gmra.mxu0 %v10405_v56 }
 0x262   : > { %7304 = vmatprep.subr.mxu0 %v5475_v47  ;;  %7137 = vmatpush3.msra.mxu1 %v5427_v19  ;;  %v5464_v19 = vld [vmem:[%s11040_s2 + $0x2b0] sm:$0xff] }
 0x263   : > { %7140 = vmatprep.mubr.f32.mxu1 %v3693_v9  ;;  %7305 = vmatpush3.msra.mxu0 %v5475_v47  ;;  %v10527_v47 = vld [vmem:[%s11040_s2 + $0x430] sm:$0xff] }
 0x264   : > { %7308 = vmatprep.mubr.f32.mxu0 %v4276_v23  ;;  %7138 = vmatprep.subr.mxu1 %v5426_v59  ;;  %v4667_v9 = vld [vmem:[#allocation2 + $0x52] sm:$0xff] }
 0x265   : > { %7306 = vmatprep.subr.mxu0 %v5474_v11  ;;  %7139 = vmatpush3.msra.mxu1 %v5426_v59  ;;  %v5502_v59 = vld [vmem:[%s11040_s2 + $0x3e0] sm:$0xff] }
 0x266   : > { %7307 = vmatpush3.msra.mxu0 %v5474_v11  ;;  %7141 = vmatmul.mubr.f32.vlgmr.msra.gmra.mxu1 %v3694_v15  ;;  %v4668_v11 = vld [vmem:[#allocation2 + $0x62] sm:$0xff] }
 0x267   : > { %7220 = vmatprep.subr.mxu1 %v5473_v17  ;;  %7309 = vmatmul.mubr.f32.vlgmr.msra.gmra.mxu0 %v4277_v1  ;;  %v5499_v15 = vld [vmem:[%s11040_s2 + $0x3c8] sm:$0xff] }
 0x268   : > { %7388 = vmatprep.subr.mxu0 %v10420_v63  ;;  %7143 = vmatprep.mubr.f32.mxu1 %v4276_v23  ;;  %v5501_v23 = vld [vmem:[%s11040_s2 + $0x3d8] sm:$0xff] }
 0x269   : > { %7221 = vmatpush3.msra.mxu1 %v5473_v17  ;;  %7311 = vmatprep.mubr.f32.mxu0 %v4278_v52  ;;  %v5500_v17 = vld [vmem:[%s11040_s2 + $0x3d0] sm:$0xff] }
 0x26a   : > { %7389 = vmatpush3.msra.mxu0 %v10420_v63  ;;  %7222 = vmatprep.subr.mxu1 %v5472_v36 }
 0x26b   : > { %7390 = vmatprep.subr.mxu0 %v10429_v61  ;;  %7223 = vmatpush3.msra.mxu1 %v5472_v36  ;;  %v5497_v36 = vld [vmem:[%s11040_s2 + $0x3b8] sm:$0xff] }
 0x26c   : > { %7391 = vmatpush3.msra.mxu0 %v10429_v61  ;;  %7144 = vmatmul.mubr.f32.gmra.mxu1 %v4277_v1  ;;  %v5498_v1 = vld [vmem:[%s11040_s2 + $0x3c0] sm:$0xff] }
 0x26d   : > { %7224 = vmatprep.subr.mxu1 %v5471_v34  ;;  %7312 = vmatmul.mubr.f32.gmra.mxu0 %v4279_v16 }
 0x26e   : > { %7392 = vmatprep.subr.mxu0 %v10439_v6  ;;  %7146 = vmatprep.mubr.f32.mxu1 %v4278_v52  ;;  %v5492_v52 = vld [vmem:[%s11040_s2 + $0x390] sm:$0xff] }
 0x26f   : > { %7225 = vmatpush3.msra.mxu1 %v5471_v34  ;;  %7533 = vmatprep.mubr.msk.f32.mxu0 %vm9729_vm4, %v9759_v32  ;;  %v3699_v32 = vld [vmem:[#allocation2 + $0x60] sm:$0xff]  ;;  %vm11447_vm4 = vnez %v11391_v8  ;;  %v4664_v8 = vld [vmem:[#allocation2 + $0x32] sm:$0xff] }
 0x270   : > { %7393 = vmatpush3.msra.mxu0 %v10439_v6  ;;  %7226 = vmatprep.subr.mxu1 %v5470_v37  ;;  %v10684_v34 = vld [vmem:[#allocation2 + $0xc2] sm:$0xff] }
 0x271   : > { %7394 = vmatprep.subr.mxu0 %v10449_v46  ;;  %7227 = vmatpush3.msra.mxu1 %v5470_v37  ;;  %v5490_v37 = vld [vmem:[%s11040_s2 + $0x380] sm:$0xff] }
 0x272   : > { %7395 = vmatpush3.msra.mxu0 %v10449_v46  ;;  %7147 = vmatmul.mubr.f32.gmra.mxu1 %v4279_v16  ;;  %v10690_v16 = vld [vmem:[#allocation2 + $0xca] sm:$0xff] }
 0x273   : > { %7228 = vmatprep.subr.mxu1 %v5469_v18  ;;  %7315 = vmatmul.mubr.f32.gmra.mxu0 %v4281_v58 }
 0x274   : > { %7396 = vmatprep.subr.mxu0 %v10462_v24  ;;  %7149 = vmatprep.mubr.f32.mxu1 %v3699_v32  ;;  %v4472_v32 = vld [vmem:[#allocation2 + $0x49] sm:$0xff] }
 0x275   : > { %7229 = vmatpush3.msra.mxu1 %v5469_v18  ;;  %7534 = vmatprep.mubr.msk.f32.mxu0 %vm11441_vm15, %v9814_v43  ;;  %v5466_v43 = vld [vmem:[%s11040_s2 + $0x2c0] sm:$0xff]  ;;  %v4470_v18 = vld [vmem:[#allocation2 + $0x31] sm:$0xff] }
 0x276   : > { %7397 = vmatpush3.msra.mxu0 %v10462_v24  ;;  %7230 = vmatprep.subr.mxu1 %v5468_v39 }
 0x277   : > { %7398 = vmatprep.subr.mxu0 %v10472_v48  ;;  %7231 = vmatpush3.msra.mxu1 %v5468_v39  ;;  %v4473_v39 = vld [vmem:[#allocation2 + $0x51] sm:$0xff] }
 0x278   : > { %7399 = vmatpush3.msra.mxu0 %v10472_v48  ;;  %7150 = vmatmul.mubr.f32.gmra.mxu1 %v4281_v58  ;;  %v4471_v58 = vld [vmem:[#allocation2 + $0x39] sm:$0xff] }
 0x279   : > { %7232 = vmatprep.subr.mxu1 %v5467_v51  ;;  %7535 = vmatmul.mubr.msk.f32.gmra.mxu0 %vm11442_vm10, %v9883_v27 }
 0x27a   : > { %7400 = vmatprep.subr.mxu0 %v10485_v42  ;;  %7152 = vmatprep.mubr.f32.mxu1 %v3701_v25  ;;  %v4475_v25 = vld [vmem:[#allocation2 + $0x69] sm:$0xff] }
 0x27b   : > { %7233 = vmatpush3.msra.mxu1 %v5467_v51  ;;  %7536 = vmatprep.mubr.msk.f32.mxu0 %vm11443_vm0, %v9970_v38  ;;  %v4474_v51 = vld [vmem:[#allocation2 + $0x61] sm:$0xff] }
 0x27c   : > { %7401 = vmatpush3.msra.mxu0 %v10485_v42  ;;  %7234 = vmatprep.subr.mxu1 %v5466_v43 }
 0x27d   : > { %7402 = vmatprep.subr.mxu0 %v10498_v41  ;;  %7235 = vmatpush3.msra.mxu1 %v5466_v43 }
 0x27e   : > { %7403 = vmatpush3.msra.mxu0 %v10498_v41  ;;  %7537 = vmatmul.mubr.msk.f32.gmra.mxu1 %vm11442_vm10, %v9883_v27  ;;  %v10543_v27 = vld [vmem:[%s11040_s2 + $0x428] sm:$0xff] }
 0x27f   : > { %7236 = vmatprep.subr.mxu1 %v5465_v53  ;;  %7538 = vmatmul.mubr.msk.f32.gmra.mxu0 %vm11444_vm6, %v9918_v45 }
 0x280   : > { %7404 = vmatprep.subr.mxu0 %v10511_v44  ;;  %7539 = vmatprep.mubr.msk.f32.mxu1 %vm11443_vm0, %v9970_v38  ;;  %v10559_v38 = vld [vmem:[%s11040_s2 + $0x420] sm:$0xff] }
 0x281   : > { %7237 = vmatpush3.msra.mxu1 %v5465_v53  ;;  %7540 = vmatprep.mubr.msk.f32.mxu0 %vm11445_vm1, %v9983_v49 }
 0x282   : > { %7405 = vmatpush3.msra.mxu0 %v10511_v44  ;;  %7238 = vmatprep.subr.mxu1 %v5464_v19 }
 0x283   : > { %7406 = vmatprep.subr.mxu0 %v10527_v47  ;;  %7239 = vmatpush3.msra.mxu1 %v5464_v19 }
 0x284   : > { %7407 = vmatpush3.msra.mxu0 %v10527_v47  ;;  %7541 = vmatmul.mubr.msk.f32.gmra.mxu1 %vm11444_vm6, %v9918_v45  ;;  %v10575_v45 = vld [vmem:[%s11040_s2 + $0x418] sm:$0xff] }
 0x285   : > { %7240 = vmatprep.subr.mxu1 %v5463_v29  ;;  %7542 = vmatmul.mubr.msk.f32.gmra.mxu0 %vm11446_vm14, %v10067_v30 }
 0x286   : > { %7408 = vmatprep.subr.mxu0 %v10543_v27  ;;  %7543 = vmatprep.mubr.msk.f32.mxu1 %vm11445_vm1, %v9983_v49  ;;  %v10591_v49 = vld [vmem:[%s11040_s2 + $0x410] sm:$0xff] }
 0x287   : > { %7241 = vmatpush3.msra.mxu1 %v5463_v29  ;;  %7544 = vmatprep.mubr.msk.f32.mxu0 %vm10092_vm7, %v10122_v12 }
 0x288   : > { %7409 = vmatpush3.msra.mxu0 %v10543_v27  ;;  %7242 = vmatprep.subr.mxu1 %v5462_v0 }
 0x289   : > { %7410 = vmatprep.subr.mxu0 %v10559_v38  ;;  %7243 = vmatpush3.msra.mxu1 %v5462_v0 }
 0x28a   : > { %7411 = vmatpush3.msra.mxu0 %v10559_v38  ;;  %7545 = vmatmul.mubr.msk.f32.gmra.mxu1 %vm11446_vm14, %v10067_v30  ;;  %v10608_v30 = vld [vmem:[%s11040_s2 + $0x408] sm:$0xff] }
 0x28b   : > { %7244 = vmatprep.subr.mxu1 %v5461_v13  ;;  %7546 = vmatmul.mubr.msk.f32.gmra.mxu0 %vm11447_vm4, %v10113_v57 }
 0x28c   : > { %7412 = vmatprep.subr.mxu0 %v10575_v45  ;;  %7547 = vmatprep.mubr.msk.f32.mxu1 %vm10092_vm7, %v10122_v12  ;;  %v5458_v12 = vld [vmem:[%s11040_s2 + $0x280] sm:$0xff] }
 0x28d   : > { %7245 = vmatpush3.msra.mxu1 %v5461_v13  ;;  %7548 = vmatprep.mubr.msk.f32.mxu0 %vm10145_vm2, %v2981_v40  ;;  %v4665_v40 = vld [vmem:[#allocation2 + $0x3a] sm:$0xff] }
 0x28e   : > { %7413 = vmatpush3.msra.mxu0 %v10575_v45  ;;  %7246 = vmatprep.subr.mxu1 %v5460_v10 }
 0x28f   : > { %7414 = vmatprep.subr.mxu0 %v10591_v49  ;;  %7247 = vmatpush3.msra.mxu1 %v5460_v10 }
 0x290   : > { %7415 = vmatpush3.msra.mxu0 %v10591_v49  ;;  %7549 = vmatmul.mubr.msk.f32.gmra.mxu1 %vm11447_vm4, %v10113_v57  ;;  %v5505_v57 = vld [vmem:[%s11040_s2 + $0x3f8] sm:$0xff] }
 0x291   : > { %7248 = vmatprep.subr.mxu1 %v5459_v26  ;;  %7550 = vmatmul.mubr.msk.f32.gmra.mxu0 %vm10224_vm11, %v2982_v50  ;;  %v5503_v50 = vld [vmem:[%s11040_s2 + $0x3e8] sm:$0xff] }
 0x292   : > { %7416 = vmatprep.subr.mxu0 %v10608_v30  ;;  %7249 = vmatpush3.msra.mxu1 %v5459_v26 }
 0x293   : > { %7252 = vmatprep.mubr.f32.mxu1 %v4081_v14  ;;  %7417 = vmatpush3.msra.mxu0 %v10608_v30 }
 0x294   : > { %7420 = vmatprep.mubr.f32.mxu0 %v4664_v8  ;;  %7250 = vmatprep.subr.mxu1 %v5458_v12 }
 0x295   : > { %7418 = vmatprep.subr.mxu0 %v10625_v5  ;;  %7251 = vmatpush3.msra.mxu1 %v5458_v12 }
 0x296   : > { %7419 = vmatpush3.msra.mxu0 %v10625_v5  ;;  %7253 = vmatmul.mubr.f32.vlgmr.msra.gmra.mxu1 %v4082_v22 }
 0x297   : > { %7332 = vmatprep.subr.mxu1 %v5505_v57  ;;  %7421 = vmatmul.mubr.f32.vlgmr.msra.gmra.mxu0 %v4665_v40 }
 0x298   : > { %7255 = vmatprep.mubr.f32.mxu1 %v4664_v8  ;;  %7333 = vmatpush3.msra.mxu1 %v5505_v57 }
 0x299   : > { %7423 = vmatprep.mubr.f32.mxu0 %v4666_v2  ;;  %7334 = vmatprep.subr.mxu1 %v5504_v7 }
 0x29a   : > { %7335 = vmatpush3.msra.mxu1 %v5504_v7 }
 0x29b   : > { %7256 = vmatmul.mubr.f32.gmra.mxu1 %v4665_v40  ;;  %7336 = vmatprep.subr.mxu1 %v5503_v50 }
 0x29c   : > { %7424 = vmatmul.mubr.f32.gmra.mxu0 %v4667_v9  ;;  %7258 = vmatprep.mubr.f32.mxu1 %v4666_v2 }
 0x29d   : > { %7337 = vmatpush3.msra.mxu1 %v5503_v50  ;;  %7426 = vmatprep.mubr.f32.mxu0 %v4668_v11 }
 0x29e   : > { %7338 = vmatprep.subr.mxu1 %v5502_v59 }
 0x29f   : > { %7339 = vmatpush3.msra.mxu1 %v5502_v59 }
 0x2a0   : > { %7259 = vmatmul.mubr.f32.gmra.mxu1 %v4667_v9  ;;  %7340 = vmatprep.subr.mxu1 %v5501_v23 }
 0x2a1   : > { %7427 = vmatmul.mubr.f32.gmra.mxu0 %v9989_v33  ;;  %7261 = vmatprep.mubr.f32.mxu1 %v4668_v11 }
 0x2a2   : > { %7341 = vmatpush3.msra.mxu1 %v5501_v23  ;;  %7429 = vmatprep.mubr.f32.mxu0 %v10046_v31 }
 0x2a3   : > { %7342 = vmatprep.subr.mxu1 %v5500_v17 }
 0x2a4   : > { %7343 = vmatpush3.msra.mxu1 %v5500_v17 }
 0x2a5   : > { %7262 = vmatmul.mubr.f32.gmra.mxu1 %v9989_v33  ;;  %7344 = vmatprep.subr.mxu1 %v5499_v15  ;;  %v5496_v33 = vld [vmem:[%s11040_s2 + $0x3b0] sm:$0xff] }
 0x2a6   : > { %7430 = vmatmul.mubr.f32.gmra.mxu0 %v10063_v21  ;;  %7264 = vmatprep.mubr.f32.mxu1 %v10046_v31  ;;  %v5495_v31 = vld [vmem:[%s11040_s2 + $0x3a8] sm:$0xff] }
 0x2a7   : > { %7345 = vmatpush3.msra.mxu1 %v5499_v15  ;;  %7432 = vmatprep.mubr.f32.mxu0 %v10117_v28 }
 0x2a8   : > { %7346 = vmatprep.subr.mxu1 %v5498_v1 }
 0x2a9   : > { %7347 = vmatpush3.msra.mxu1 %v5498_v1 }
 0x2aa   : > { %7265 = vmatmul.mubr.f32.gmra.mxu1 %v10063_v21  ;;  %7348 = vmatprep.subr.mxu1 %v5497_v36  ;;  %v5494_v21 = vld [vmem:[%s11040_s2 + $0x3a0] sm:$0xff] }
 0x2ab   : > { %7433 = vmatmul.mubr.f32.gmra.mxu0 %v10171_v54  ;;  %7267 = vmatprep.mubr.f32.mxu1 %v10117_v28  ;;  %v5493_v28 = vld [vmem:[%s11040_s2 + $0x398] sm:$0xff] }
 0x2ac   : > { %7349 = vmatpush3.msra.mxu1 %v5497_v36 }
 0x2ad   : > { %7350 = vmatprep.subr.mxu1 %v5496_v33 }
 0x2ae   : > { %7351 = vmatpush3.msra.mxu1 %v5496_v33 }
 0x2af   : > { %7268 = vmatmul.mubr.f32.gmra.mxu1 %v10171_v54  ;;  %7352 = vmatprep.subr.mxu1 %v5495_v31  ;;  %v5491_v54 = vld [vmem:[%s11040_s2 + $0x388] sm:$0xff] }
 0x2b0   : > { %7270 = vmatprep.mubr.f32.mxu1 %v10207_v55  ;;  %7353 = vmatpush3.msra.mxu1 %v5495_v31 }
 0x2b1   : > { %7354 = vmatprep.subr.mxu1 %v5494_v21 }
 0x2b2   : > { %7355 = vmatpush3.msra.mxu1 %v5494_v21 }
 0x2b3   : > { %7271 = vmatmul.mubr.f32.gmra.mxu1 %v10216_v60  ;;  %7356 = vmatprep.subr.mxu1 %v5493_v28 }
 0x2b4   : > { %7273 = vmatprep.mubr.f32.mxu1 %v10684_v34  ;;  %7357 = vmatpush3.msra.mxu1 %v5493_v28 }
 0x2b5   : > { %7358 = vmatprep.subr.mxu1 %v5492_v52 }
 0x2b6   : > { %7359 = vmatpush3.msra.mxu1 %v5492_v52 }
 0x2b7   : > { %7274 = vmatmul.mubr.f32.gmra.mxu1 %v10690_v16  ;;  %7360 = vmatprep.subr.mxu1 %v5491_v54 }
 0x2b8   : > { %7361 = vmatpush3.msra.mxu1 %v5491_v54  ;;  %7364 = vmatprep.mubr.f32.mxu1 %v4470_v18 }
 0x2b9   : > { %7362 = vmatprep.subr.mxu1 %v5490_v37 }
 0x2ba   : > { %7363 = vmatpush3.msra.mxu1 %v5490_v37 }
 0x2bb   : > { %7365 = vmatmul.mubr.f32.vlgmr.msra.gmra.mxu1 %v4471_v58  ;;  %7444 = vmatprep.subr.mxu1 %v10420_v63 }
 0x2bc   : > { %7367 = vmatprep.mubr.f32.mxu1 %v4472_v32  ;;  %7460 = vmatpush3.msra.mxu1 %v10420_v63  ;;  %v4476_v63 = vld [vmem:[#allocation2 + $0x79] sm:$0xff] }
 0x2bd   : > { %7445 = vmatprep.subr.mxu1 %v10429_v61 }
 0x2be   : > { %7461 = vmatpush3.msra.mxu1 %v10429_v61  ;;  %v4477_v61 = vld [vmem:[#allocation2 + $0x81] sm:$0xff] }
 0x2bf   : > { %7368 = vmatmul.mubr.f32.gmra.mxu1 %v4473_v39  ;;  %7446 = vmatprep.subr.mxu1 %v10439_v6 }
 0x2c0   : > { %7370 = vmatprep.mubr.f32.mxu1 %v4474_v51  ;;  %7462 = vmatpush3.msra.mxu1 %v10439_v6  ;;  %v10709_v6 = vpop.f32.mrf.mxu1 }
 0x2c1   : > { %7447 = vmatprep.subr.mxu1 %v10449_v46  ;;  %v10711_v43 = vpop.f32.mrf.mxu0 }
 0x2c2   : > { %7463 = vmatpush3.msra.mxu1 %v10449_v46  ;;  %v10717_v46 = vpop.f32.mrf.mxu1 }
 0x2c3   : > { %7371 = vmatmul.mubr.f32.gmra.mxu1 %v4475_v25  ;;  %7448 = vmatprep.subr.mxu1 %v10462_v24 }
 0x2c4   : > { %7373 = vmatprep.mubr.f32.mxu1 %v4476_v63  ;;  %7464 = vmatpush3.msra.mxu1 %v10462_v24  ;;  %v10719_v24 = vpop.f32.mrf.mxu0 }
 0x2c5   : > { %7449 = vmatprep.subr.mxu1 %v10472_v48 }
 0x2c6   : > { %7465 = vmatpush3.msra.mxu1 %v10472_v48  ;;  %v10729_v48 = vpop.f32.mrf.mxu0 }
 0x2c7   : > { %7374 = vmatmul.mubr.f32.gmra.mxu1 %v4477_v61  ;;  %7450 = vmatprep.subr.mxu1 %v10485_v42 }
 0x2c8   : > { %7376 = vmatprep.mubr.f32.mxu1 %v10115_v35  ;;  %7466 = vmatpush3.msra.mxu1 %v10485_v42  ;;  %v10727_v35 = vpop.f32.mrf.mxu1  ;;  %v4484_v42 = vld [vmem:[#allocation2 + $0xd9] sm:$0xff] }
 0x2c9   : > { %7451 = vmatprep.subr.mxu1 %v10498_v41 }
 0x2ca   : > { %7467 = vmatpush3.msra.mxu1 %v10498_v41 }
 0x2cb   : > { %7377 = vmatmul.mubr.f32.gmra.mxu1 %v10169_v3  ;;  %7452 = vmatprep.subr.mxu1 %v10511_v44  ;;  %v3284_v3 = vpop.f32.mrf.mxu1 }
 0x2cc   : > { %7379 = vmatprep.mubr.f32.mxu1 %v10205_v20  ;;  %7468 = vmatpush3.msra.mxu1 %v10511_v44  ;;  %v3607_v20 = vpop.f32.mrf.mxu0 }
 0x2cd   : > { %7453 = vmatprep.subr.mxu1 %v10527_v47 }
 0x2ce   : > { %7469 = vmatpush3.msra.mxu1 %v10527_v47 }
 0x2cf   : > { %7380 = vmatmul.mubr.f32.gmra.mxu1 %v10209_v62  ;;  %7454 = vmatprep.subr.mxu1 %v10543_v27  ;;  %v6980_v62 = vpop.f32.mrf.mxu1 }
 0x2d0   : > { %7382 = vmatprep.mubr.f32.mxu1 %v10393_v4  ;;  %7470 = vmatpush3.msra.mxu1 %v10543_v27  ;;  %v7092_v41 = vpop.f32.mrf.mxu0  ;;  %v4485_v4 = vld [vmem:[#allocation2 + $0xe1] sm:$0xff] }
 0x2d1   : > { %7455 = vmatprep.subr.mxu1 %v10559_v38  ;;  %v3294_v53 = vpop.f32.mrf.mxu1  ;;  %v4678_v27 = vld [vmem:[#allocation2 + $0xda] sm:$0xff] }
 0x2d2   : > { %7471 = vmatpush3.msra.mxu1 %v10559_v38  ;;  %v3617_v44 = vpop.f32.mrf.mxu0 }
 0x2d3   : > { %7383 = vmatmul.mubr.f32.gmra.mxu1 %v10405_v56  ;;  %7456 = vmatprep.subr.mxu1 %v10575_v45 }
 0x2d4   : > { %7385 = vmatprep.mubr.f32.mxu1 %v4484_v42  ;;  %7472 = vmatpush3.msra.mxu1 %v10575_v45  ;;  %v6983_v56 = vpop.f32.mrf.mxu1  ;;  %v4679_v45 = vld [vmem:[#allocation2 + $0xe2] sm:$0xff] }
 0x2d5   : > { %7457 = vmatprep.subr.mxu1 %v10591_v49  ;;  %v7095_v19 = vpop.f32.mrf.mxu0 }
 0x2d6   : > { %7473 = vmatpush3.msra.mxu1 %v10591_v49  ;;  %v3304_v47 = vpop.f32.mrf.mxu1 }
 0x2d7   : > { %7386 = vmatmul.mubr.f32.gmra.mxu1 %v4485_v4  ;;  %7458 = vmatprep.subr.mxu1 %v10608_v30  ;;  %v3627_v29 = vpop.f32.mrf.mxu0 }
 0x2d8   : > { %7474 = vmatpush3.msra.mxu1 %v10608_v30  ;;  %7435 = vmatprep.mubr.f32.mxu1 %v10207_v55 }
 0x2d9   : > { %7459 = vmatprep.subr.mxu1 %v10625_v5 }
 0x2da   : > { %7475 = vmatpush3.msra.mxu1 %v10625_v5 }
 0x2db   : > { %7436 = vmatmul.mubr.f32.vlgmr.msra.gmra.mxu1 %v10216_v60 }
 0x2dc   : > { %7438 = vmatprep.mubr.f32.mxu1 %v10684_v34 }
 0x2dd   : > { %v6986_v0 = vpop.f32.mrf.mxu1 }
 0x2de   : > { %v7098_v38 = vpop.f32.mrf.mxu0 }
 0x2df   : > { %7439 = vmatmul.mubr.f32.gmra.mxu1 %v10690_v16  ;;  %v3314_v13 = vpop.f32.mrf.mxu1 }
 0x2e0   : > { %7441 = vmatprep.mubr.f32.mxu1 %v4678_v27  ;;  %v3637_v55 = vpop.f32.mrf.mxu0 }
 0x2e3   : > { %7442 = vmatmul.mubr.f32.gmra.mxu1 %v4679_v45 }
 0x2e4   : > { %v6989_v10 = vpop.f32.mrf.mxu1  ;;  %v7101_v49 = vpop.f32.mrf.mxu0 }
 0x2e6   : > { %v3324_v26 = vpop.f32.mrf.mxu1  ;;  %v3647_v30 = vpop.f32.mrf.mxu0 }
 0x2eb   : > { %v6992_v14 = vpop.f32.mrf.mxu1 }
 0x2ec   : > { %v7104_v60 = vpop.f32.mrf.mxu0 }
 0x2ed   : > { %v3334_v12 = vpop.f32.mrf.mxu1 }
 0x2ee   : > { %v3657_v5 = vpop.f32.mrf.mxu0 }
 0x2f1   : > { %v6995_v8 = vpop.f32.mrf.mxu1 }
 0x2f2   : > { %v10750_v57 = vpop.f32.mrf.mxu0 }
 0x2f3   : > { %v3344_v22 = vpop.f32.mrf.mxu1 }
 0x2f4   : > { %v10752_v40 = vpop.f32.mrf.mxu0 }
 0x2f6   : > { %v7030_v7 = vpop.f32.mrf.mxu1 }
 0x2f7   : > { %v3425_v2 = vadd.f32 %v7030_v7, %v10709_v6  ;;  %v10755_v50 = vpop.f32.mrf.mxu0 }
 0x2f8   : > { %v3419_v9 = vpop.f32.mrf.mxu1 }
 0x2f9   : > { %v3420_v59 = vadd.f32 %v3419_v9, %v10717_v46  ;;  %v10758_v11 = vpop.f32.mrf.mxu0  ;;  %v10761_v23 = vadd.f32 %v10711_v43, %v3425_v2 }
 0x2fb   : > { %v10764_v17 = vadd.f32 %v10719_v24, %v3420_v59 }
 0x2fc   : > { %v7033_v15 = vpop.f32.mrf.mxu1 }
 0x2fd   : > { %v3435_v1 = vadd.f32 %v7033_v15, %v10727_v35  ;;  %v10767_v36 = vpop.f32.mrf.mxu0 }
 0x2fe   : > { %v3429_v33 = vpop.f32.mrf.mxu1 }
 0x2ff   : > { %v3430_v31 = vadd.f32 %v3429_v33, %v3284_v3  ;;  %v10769_v21 = vpop.f32.mrf.mxu0  ;;  %v10772_v28 = vadd.f32 %v10729_v48, %v3435_v1 }
 0x301   : > { %v10774_v52 = vadd.f32 %v3607_v20, %v3430_v31 }
 0x302   : > { %v7036_v34 = vpop.f32.mrf.mxu1 }
 0x303   : > { %v3445_v54 = vadd.f32 %v7036_v34, %v6980_v62  ;;  %v10776_v16 = vpop.f32.mrf.mxu0 }
 0x304   : > { %v3439_v37 = vpop.f32.mrf.mxu1 }
 0x305   : > { %v3440_v18 = vadd.f32 %v3439_v37, %v3294_v53  ;;  %v10778_v58 = vpop.f32.mrf.mxu0  ;;  %v10780_v32 = vadd.f32 %v7092_v41, %v3445_v54 }
 0x307   : > { %v10782_v39 = vadd.f32 %v3617_v44, %v3440_v18 }
 0x308   : > { %v7039_v51 = vpop.f32.mrf.mxu1 }
 0x309   : > { %v3455_v25 = vadd.f32 %v7039_v51, %v6983_v56  ;;  %v10784_v63 = vpop.f32.mrf.mxu0 }
 0x30a   : > { %v3449_v61 = vpop.f32.mrf.mxu1 }
 0x30b   : > { %v3450_v6 = vadd.f32 %v3449_v61, %v3304_v47  ;;  %v10786_v43 = vpop.f32.mrf.mxu0  ;;  %v10788_v46 = vadd.f32 %v7095_v19, %v3455_v25 }
 0x30d   : > { %v10790_v24 = vadd.f32 %v3627_v29, %v3450_v6 }
 0x30e   : > { %v7042_v35 = vpop.f32.mrf.mxu1 }
 0x30f   : > { %v3465_v48 = vadd.f32 %v7042_v35, %v6986_v0  ;;  %v10792_v3 = vpop.f32.mrf.mxu0 }
 0x310   : > { %v3459_v20 = vpop.f32.mrf.mxu1 }
 0x311   : > { %v3460_v42 = vadd.f32 %v3459_v20, %v3314_v13  ;;  %v10794_v62 = vpop.f32.mrf.mxu0  ;;  %v10796_v41 = vadd.f32 %v7098_v38, %v3465_v48 }
 0x313   : > { %v10798_v4 = vadd.f32 %v3637_v55, %v3460_v42 }
 0x314   : > { %v7045_v53 = vpop.f32.mrf.mxu1 }
 0x315   : > { %v3475_v44 = vadd.f32 %v7045_v53, %v6989_v10  ;;  %v7213_v56 = vpop.f32.mrf.mxu0 }
 0x316   : > { %v3469_v47 = vpop.f32.mrf.mxu1 }
 0x317   : > { %v3470_v19 = vadd.f32 %v3469_v47, %v3324_v26  ;;  %v4036_v27 = vpop.f32.mrf.mxu0  ;;  %v3687_v29 = vadd.f32 %v7101_v49, %v3475_v44 }
 0x319   : > { %v3686_v45 = vadd.f32 %v3647_v30, %v3470_v19 }
 0x31a   : > { %v7048_v7 = vpop.f32.mrf.mxu1 }
 0x31b   : > { %v3485_v0 = vadd.f32 %v7048_v7, %v6992_v14  ;;  %v7216_v2 = vpop.f32.mrf.mxu0 }
 0x31c   : > { %v3479_v9 = vpop.f32.mrf.mxu1 }
 0x31d   : > { %v3480_v59 = vadd.f32 %v3479_v9, %v3334_v12  ;;  %v3689_v13 = vadd.f32 %v7104_v60, %v3485_v0  ;;  %v4046_v15 = vpop.f32.mrf.mxu0 }
 0x31f   : > { %v3688_v1 = vadd.f32 %v3657_v5, %v3480_v59 }
 0x320   : > { %v7051_v38 = vpop.f32.mrf.mxu1 }
 0x321   : > { %v3495_v33 = vadd.f32 %v7051_v38, %v6995_v8  ;;  %v7219_v31 = vpop.f32.mrf.mxu0 }
 0x322   : > { %v3489_v55 = vpop.f32.mrf.mxu1 }
 0x323   : > { %v3490_v34 = vadd.f32 %v3489_v55, %v3344_v22  ;;  %v3691_v10 = vadd.f32 %v10750_v57, %v3495_v33  ;;  %v4056_v49 = vpop.f32.mrf.mxu0 }
 0x325   : > { %v3690_v26 = vadd.f32 %v10752_v40, %v3490_v34 }
 0x326   : > { %v7142_v54 = vpop.f32.mrf.mxu1 }
 0x327   : > { %v10802_v37 = vpop.f32.mrf.mxu0 }
 0x328   : > { %v3792_v30 = vpop.f32.mrf.mxu1 }
 0x329   : > { %v10806_v60 = vpop.f32.mrf.mxu0 }
 0x32c   : > { %v7145_v14 = vpop.f32.mrf.mxu1 }
 0x32d   : > { %v10810_v5 = vpop.f32.mrf.mxu0 }
 0x32e   : > { %v10804_v18 = vpop.f32.mrf.mxu1 }
 0x32f   : > { %v10814_v22 = vpop.f32.mrf.mxu0 }
 0x332   : > { %v10808_v12 = vpop.f32.mrf.mxu1 }
 0x333   : > { %v10820_v51 = vpop.f32.mrf.mxu0 }
 0x334   : > { %v10812_v8 = vpop.f32.mrf.mxu1 }
 0x335   : > { %v10824_v61 = vpop.f32.mrf.mxu0 }
 0x338   : > { %v10816_v57 = vpop.f32.mrf.mxu1 }
 0x339   : > { %v10828_v35 = vpop.f32.mrf.mxu0 }
 0x33a   : > { %v10818_v40 = vpop.f32.mrf.mxu1 }
 0x33b   : > { %v10830_v53 = vpop.f32.mrf.mxu0 }
 0x33c   : > { %11448 = vst [vmem:[#allocation18_spill] sm:$0xff] %v10830_v53 }
 0x33e   : > { %v10822_v25 = vpop.f32.mrf.mxu1 }
 0x33f   : > { %v10836_v0 = vpop.f32.mrf.mxu0 }
 0x340   : > { %v10826_v6 = vpop.f32.mrf.mxu1 }
 0x341   : > { %v10840_v55 = vpop.f32.mrf.mxu0 }
 0x344   : > { %v7157_v48 = vpop.f32.mrf.mxu1 }
 0x345   : > { %v3882_v20 = vadd.f32 %v7157_v48, %v3687_v29 }
 0x346   : > { %v3842_v42 = vpop.f32.mrf.mxu1 }
 0x347   : > { %v3881_v44 = vadd.f32 %v3842_v42, %v3686_v45  ;;  %v10832_v47 = vadd.f32 %v7213_v56, %v3882_v20  ;;  %v10844_v45 = vpop.f32.mrf.mxu0 }
 0x348   : > { %11451 = vst [vmem:[#allocation22_spill] sm:$0xff] %v10844_v45  ;;  %v3873_v45 = vadd.f32 %v10804_v18, %v10774_v52  ;;  %v3875_v52 = vadd.f32 %v10812_v8, %v10782_v39 }
 0x349   : > { %v10834_v19 = vadd.f32 %v4036_v27, %v3881_v44 }
 0x34a   : > { %v7160_v7 = vpop.f32.mrf.mxu1 }
 0x34b   : > { %v3884_v9 = vadd.f32 %v7160_v7, %v3689_v13  ;;  %v10850_v13 = vpop.f32.mrf.mxu0 }
 0x34c   : > { %v3852_v59 = vpop.f32.mrf.mxu1  ;;  %11454 = vst [vmem:[#allocation30_spill] sm:$0xff] %v10850_v13 }
 0x34d   : > { %v3883_v38 = vadd.f32 %v3852_v59, %v3688_v1  ;;  %v10838_v33 = vadd.f32 %v7216_v2, %v3884_v9  ;;  %v10852_v2 = vpop.f32.mrf.mxu0 }
 0x34e   : > { %11455 = vst [vmem:[#allocation17_spill] sm:$0xff] %v10852_v2 }
 0x34f   : > { %11449 = vst [vmem:[#allocation13_spill] sm:$0xff] %v10838_v33  ;;  %v10842_v34 = vadd.f32 %v4046_v15, %v3883_v38  ;;  %v10854_v7 = vpop.f32.mrf.mxu0 }
 0x350   : > { %v7163_v29 = vpop.f32.mrf.mxu1  ;;  %11456 = vst [vmem:[#allocation19_spill] sm:$0xff] %v10854_v7 }
 0x351   : > { %11450 = vst [vmem:[#allocation14_spill] sm:$0xff] %v10842_v34  ;;  %v3886_v48 = vadd.f32 %v7163_v29, %v3691_v10  ;;  %v10856_v59 = vpop.f32.mrf.mxu0 }
 0x352   : > { %v3862_v53 = vpop.f32.mrf.mxu1  ;;  %11457 = vst [vmem:[#allocation20_spill] sm:$0xff] %v10856_v59  ;;  %v3871_v59 = vadd.f32 %v3792_v30, %v10764_v17 }
 0x353   : > { %v3885_v56 = vadd.f32 %v3862_v53, %v3690_v26  ;;  %v10846_v27 = vadd.f32 %v7219_v31, %v3886_v48  ;;  %v10858_v31 = vpop.f32.mrf.mxu0 }
 0x354   : > { %11458 = vst [vmem:[#allocation21_spill] sm:$0xff] %v10858_v31  ;;  %v3874_v31 = vadd.f32 %v7145_v14, %v10772_v28 }
 0x355   : > { %11452 = vst [vmem:[#allocation16_spill] sm:$0xff] %v10846_v27  ;;  %v10848_v20 = vadd.f32 %v4056_v49, %v3885_v56 }
 0x356   : > { %v7254_v42 = vpop.f32.mrf.mxu1  ;;  %v4068_v30 = vadd.f32 %v10767_v36, %v3874_v31 }
 0x357   : > { %11453 = vst [vmem:[#allocation26_spill] sm:$0xff] %v10848_v20  ;;  %v7422_v38 = vpop.f32.mrf.mxu0  ;;  %v3872_v20 = vadd.f32 %v7142_v54, %v10761_v23  ;;  %v4065_v23 = vadd.f32 %v10758_v11, %v3871_v59  ;;  %v4067_v11 = vadd.f32 %v10769_v21, %v3873_v45  ;;  %v10906_v21 = vld [vmem:[%s11043_s5] ss:$0 sm:$0xff] }
 0x358   : > { %v4180_v1 = vpop.f32.mrf.mxu1 }
 0x359   : > { %v4763_v48 = vpop.f32.mrf.mxu0  ;;  %v4066_v13 = vadd.f32 %v10755_v50, %v3872_v20  ;;  %v4259_v17 = vadd.f32 %v4180_v1, %v4065_v23  ;;  %v3876_v50 = vadd.f32 %v10808_v12, %v10780_v32  ;;  %v3878_v20 = vadd.f32 %v10816_v57, %v10788_v46 }
 0x35a   : > { %v3877_v12 = vadd.f32 %v10818_v40, %v10790_v24  ;;  %v4069_v46 = vadd.f32 %v10778_v58, %v3875_v52  ;;  %v3879_v24 = vadd.f32 %v10826_v6, %v10798_v4  ;;  %v10920_v58 = vld [vmem:[%s11044_s6] ss:$0 sm:$0xff] }
 0x35b   : > { %v7257_v44 = vpop.f32.mrf.mxu1  ;;  %v4260_v33 = vadd.f32 %v7254_v42, %v4066_v13  ;;  %v4454_v32 = vadd.f32 %v10806_v60, %v4259_v17  ;;  %v4070_v39 = vadd.f32 %v10776_v16, %v3876_v50  ;;  %v3880_v60 = vadd.f32 %v10822_v25, %v10796_v41 }
 0x35c   : > { %v7425_v27 = vpop.f32.mrf.mxu0  ;;  %v4262_v14 = vadd.f32 %v7257_v44, %v4068_v30  ;;  %v4072_v45 = vadd.f32 %v10784_v63, %v3878_v20  ;;  %v4071_v63 = vadd.f32 %v10786_v43, %v3877_v12  ;;  %v5524_v12 = vld [vmem:[%s7764_s9 + $0x62] sm:$0xff] }
 0x35d   : > { %v4190_v15 = vpop.f32.mrf.mxu1  ;;  %v4455_v18 = vadd.f32 %v10802_v37, %v4260_v33  ;;  %v4074_v50 = vadd.f32 %v10792_v3, %v3880_v60  ;;  %v5525_v3 = vld [vmem:[%s7764_s9 + $0x6a] sm:$0xff] }
 0x35e   : > { %v4773_v54 = vpop.f32.mrf.mxu0  ;;  %v4261_v13 = vadd.f32 %v4190_v15, %v4067_v11  ;;  %v4457_v33 = vadd.f32 %v10810_v5, %v4262_v14 }
 0x360   : > { %v7260_v10 = vpop.f32.mrf.mxu1  ;;  %v4456_v4 = vadd.f32 %v10814_v22, %v4261_v13  ;;  %v4073_v22 = vadd.f32 %v10794_v62, %v3879_v24 }
 0x361   : > { %v7428_v36 = vpop.f32.mrf.mxu0  ;;  %v4264_v16 = vadd.f32 %v7260_v10, %v4070_v39  ;;  %v5523_v10 = vld [vmem:[%s7764_s9 + $0x4a] sm:$0xff] }
 0x362   : > { %v4200_v9 = vpop.f32.mrf.mxu1 }
 0x363   : > { %v4783_v40 = vpop.f32.mrf.mxu0  ;;  %v4263_v25 = vadd.f32 %v4200_v9, %v4069_v46  ;;  %v5522_v9 = vld [vmem:[%s7764_s9 + $0x42] sm:$0xff]  ;;  %v4459_v43 = vadd.f32 %v10820_v51, %v4264_v16 }
 0x365   : > { %v7263_v26 = vpop.f32.mrf.mxu1  ;;  %v4458_v51 = vadd.f32 %v10824_v61, %v4263_v25 }
 0x366   : > { %v4266_v6 = vadd.f32 %v7263_v26, %v4072_v45  ;;  %v7431_v30 = vpop.f32.mrf.mxu0 }
 0x367   : > { %v10860_v49 = vpop.f32.mrf.mxu1 }
 0x368   : > { %v4461_v20 = vadd.f32 %v10828_v35, %v4266_v6 }
 0x36a   : > { %v10862_v53 = vpop.f32.mrf.mxu1 }
 0x36c   : > { %v10864_v29 = vpop.f32.mrf.mxu1 }
 0x36f   : > { %v10866_v56 = vpop.f32.mrf.mxu1 }
 0x371   : > { %v10869_v7 = vpop.f32.mrf.mxu1 }
 0x372   : > { %11459 = vst [vmem:[#allocation23_spill] sm:$0xff] %v10869_v7 }
 0x373   : > { %v10873_v2 = vpop.f32.mrf.mxu1 }
 0x375   : > { %v10877_v34 = vpop.f32.mrf.mxu1 }
 0x377   : > { %v10882_v7 = vpop.f32.mrf.mxu1 }
 0x379   : > { %v10889_v28 = vpop.f32.mrf.mxu1 }
 0x37b   : > { %v7366_v42 = vpop.f32.mrf.mxu1 }
 0x37c   : > { %v4649_v1 = vadd.f32 %v7366_v42, %v4455_v18 }
 0x37d   : > { %v4569_v37 = vpop.f32.mrf.mxu1 }
 0x37e   : > { %v4843_v8 = vadd.f32 %v7422_v38, %v4649_v1  ;;  %v4648_v57 = vadd.f32 %v4569_v37, %v4454_v32  ;;  %v4267_v32 = vadd.f32 %v10864_v29, %v4073_v22 }
 0x37f   : > { %v7369_v5 = vpop.f32.mrf.mxu1 }
 0x380   : > { %v4882_v44 = vmul.f32 %v10906_v21, %v4843_v8  ;;  %v4842_v15 = vadd.f32 %v4763_v48, %v4648_v57  ;;  %v4651_v41 = vadd.f32 %v7369_v5, %v4457_v33  ;;  %v4265_v48 = vadd.f32 %v10860_v49, %v4071_v63  ;;  %v11460_v8 = vld [vmem:[#allocation18_spill] sm:$0xff] }
 0x381   : > { %v4579_v59 = vpop.f32.mrf.mxu1 }
 0x382   : > { %v4905_v31 = vadd.f32 %v10920_v58, %v4882_v44  ;;  %v4881_v38 = vmul.f32 %v10906_v21, %v4842_v15  ;;  %v4845_v23 = vadd.f32 %v7425_v27, %v4651_v41  ;;  %v4650_v17 = vadd.f32 %v4579_v59, %v4456_v4  ;;  %v5527_v44 = vld [vmem:[%s7764_s9 + $0x8a] sm:$0xff]  ;;  %v5526_v59 = vld [vmem:[%s7764_s9 + $0x82] sm:$0xff] }
 0x383   : > { %v7372_v26 = vpop.f32.mrf.mxu1  ;;  %v4268_v27 = vadd.f32 %v10862_v53, %v4074_v50  ;;  %v4793_v53 = vpop.f32.mrf.mxu0  ;;  %v4460_v61 = vadd.f32 %v11460_v8, %v4265_v48 }
 0x384   : > { %v4921_v52 = vadd.f32 %v5523_v10, %v4905_v31  ;;  %v4904_v14 = vadd.f32 %v10920_v58, %v4881_v38  ;;  %v4884_v11 = vmul.f32 %v10906_v21, %v4845_v23  ;;  %v4844_v18 = vadd.f32 %v4773_v54, %v4650_v17 }
 0x385   : > { %v4653_v62 = vadd.f32 %v7372_v26, %v4459_v43  ;;  %v4589_v49 = vpop.f32.mrf.mxu1  ;;  %v4463_v29 = vadd.f32 %v10836_v0, %v4268_v27  ;;  %v7434_v4 = vpop.f32.mrf.mxu0 }
 0x386   : > { %v4937_v42 = vmax.f32 %v4921_v52, 0.0  ;;  %v4920_v13 = vadd.f32 %v5522_v9, %v4904_v14  ;;  %v4907_v1 = vadd.f32 %v10920_v58, %v4884_v11  ;;  %v4883_v54 = vmul.f32 %v10906_v21, %v4844_v18  ;;  %v5528_v14 = vld [vmem:[%s7764_s9 + $0xa2] sm:$0xff] }
 0x387   : > { %v4847_v39 = vadd.f32 %v7428_v36, %v4653_v62  ;;  %v4652_v37 = vadd.f32 %v4589_v49, %v4458_v51  ;;  %v7375_v46 = vpop.f32.mrf.mxu1  ;;  %v4803_v43 = vpop.f32.mrf.mxu0  ;;  %v5531_v49 = vld [vmem:[%s7764_s9 + $0xca] sm:$0xff] }
 0x388   : > { %4953 = vst [vmem:[%s10940_s16 + $0x8] sm:$0xff] %v4937_v42  ;;  %v4936_v57 = vmax.f32 %v4920_v13, 0.0  ;;  %v4923_v35 = vadd.f32 %v5525_v3, %v4907_v1  ;;  %v4906_v33 = vadd.f32 %v10920_v58, %v4883_v54  ;;  %v4655_v60 = vadd.f32 %v7375_v46, %v4461_v20 }
 0x389   : > { %v4886_v24 = vmul.f32 %v10906_v21, %v4847_v39  ;;  %v4846_v16 = vadd.f32 %v4783_v40, %v4652_v37  ;;  %v4599_v45 = vpop.f32.mrf.mxu1  ;;  %v4462_v40 = vadd.f32 %v10840_v55, %v4267_v32 }
 0x38a   : > { %4952 = vst [vmem:[%s10940_s16] sm:$0xff] %v4936_v57  ;;  %v4939_v36 = vmax.f32 %v4923_v35, 0.0  ;;  %v4922_v5 = vadd.f32 %v5524_v12, %v4906_v33  ;;  %v4849_v15 = vadd.f32 %v7431_v30, %v4655_v60  ;;  %v4654_v41 = vadd.f32 %v4599_v45, %v4460_v61  ;;  %v5529_v30 = vld [vmem:[%s7764_s9 + $0xaa] sm:$0xff] }
 0x38b   : > { %v4909_v25 = vadd.f32 %v10920_v58, %v4886_v24  ;;  %v4885_v6 = vmul.f32 %v10906_v21, %v4846_v16  ;;  %v7378_v63 = vpop.f32.mrf.mxu1  ;;  %v4270_v12 = vadd.f32 %v10866_v56, %v10832_v47  ;;  %v11461_v61 = vld [vmem:[#allocation23_spill] sm:$0xff]  ;;  %v11462_v24 = vld [vmem:[#allocation13_spill] sm:$0xff]  ;;  %v11463_v47 = vld [vmem:[#allocation22_spill] sm:$0xff] }
 0x38c   : > { %4955 = vst [vmem:[%s10940_s16 + $0x18] sm:$0xff] %v4939_v36  ;;  %v4938_v10 = vmax.f32 %v4922_v5, 0.0  ;;  %v4888_v0 = vmul.f32 %v10906_v21, %v4849_v15  ;;  %v4848_v31 = vadd.f32 %v4793_v53, %v4654_v41  ;;  %v4657_v38 = vadd.f32 %v7378_v63, %v4463_v29  ;;  %v5530_v53 = vld [vmem:[%s7764_s9 + $0xc2] sm:$0xff] }
 0x38d   : > { %v4925_v23 = vadd.f32 %v5527_v44, %v4909_v25  ;;  %v4908_v17 = vadd.f32 %v10920_v58, %v4885_v6  ;;  %v4609_v48 = vpop.f32.mrf.mxu1  ;;  %v4269_v57 = vadd.f32 %v11461_v61, %v10834_v19  ;;  %v4272_v16 = vadd.f32 %v10873_v2, %v11462_v24  ;;  %v11464_v36 = vld [vmem:[#allocation14_spill] sm:$0xff]  ;;  %v11466_v25 = vld [vmem:[#allocation17_spill] sm:$0xff] }
 0x38e   : > { %4954 = vst [vmem:[%s10940_s16 + $0x10] sm:$0xff] %v4938_v10  ;;  %v4911_v50 = vadd.f32 %v10920_v58, %v4888_v0  ;;  %v4887_v55 = vmul.f32 %v10906_v21, %v4848_v31  ;;  %v4851_v22 = vadd.f32 %v7434_v4, %v4657_v38  ;;  %v4656_v9 = vadd.f32 %v4609_v48, %v4462_v40  ;;  %v11465_v15 = vld [vmem:[#allocation30_spill] sm:$0xff]  ;;  %v11467_v40 = vld [vmem:[#allocation16_spill] sm:$0xff]  ;;  %v11469_v38 = vld [vmem:[#allocation19_spill] sm:$0xff] }
 0x38f   : > { %v4941_v26 = vmax.f32 %v4925_v23, 0.0  ;;  %v4924_v52 = vadd.f32 %v5526_v59, %v4908_v17  ;;  %v7381_v11 = vpop.f32.mrf.mxu1  ;;  %v4465_v56 = vadd.f32 %v11463_v47, %v4270_v12  ;;  %v4271_v5 = vadd.f32 %v10877_v34, %v11464_v36  ;;  %v11468_v10 = vld [vmem:[#allocation26_spill] sm:$0xff] }
 0x390   : > { %v4927_v18 = vadd.f32 %v5529_v30, %v4911_v50  ;;  %v4910_v27 = vadd.f32 %v10920_v58, %v4887_v55  ;;  %v4890_v3 = vmul.f32 %v10906_v21, %v4851_v22  ;;  %v4850_v62 = vadd.f32 %v4803_v43, %v4656_v9  ;;  %v5533_v30 = vld [vmem:[%s7764_s9 + $0xea] sm:$0xff] }
 0x391   : > { %4957 = vst [vmem:[%s10940_s16 + $0x28] sm:$0xff] %v4941_v26  ;;  %v4940_v51 = vmax.f32 %v4924_v52, 0.0  ;;  %v4619_v20 = vpop.f32.mrf.mxu1  ;;  %v4659_v44 = vadd.f32 %v7381_v11, %v4465_v56  ;;  %v4464_v19 = vadd.f32 %v11465_v15, %v4269_v57  ;;  %v4467_v6 = vadd.f32 %v11466_v25, %v4272_v16  ;;  %v11471_v26 = vld [vmem:[#allocation21_spill] sm:$0xff] }
 0x392   : > { %v4943_v42 = vmax.f32 %v4927_v18, 0.0  ;;  %v4926_v13 = vadd.f32 %v5528_v14, %v4910_v27  ;;  %v4913_v1 = vadd.f32 %v10920_v58, %v4890_v3  ;;  %v4889_v54 = vmul.f32 %v10906_v21, %v4850_v62  ;;  %v5532_v52 = vld [vmem:[%s7764_s9 + $0xe2] sm:$0xff] }
 0x393   : > { %4956 = vst [vmem:[%s10940_s16 + $0x20] sm:$0xff] %v4940_v51  ;;  %v7384_v32 = vpop.f32.mrf.mxu1  ;;  %v4658_v4 = vadd.f32 %v4619_v20, %v4464_v19  ;;  %v4274_v2 = vadd.f32 %v10882_v7, %v11467_v40  ;;  %v4273_v59 = vadd.f32 %v10889_v28, %v11468_v10  ;;  %v4466_v34 = vadd.f32 %v11469_v38, %v4271_v5  ;;  %v11470_v7 = vld [vmem:[#allocation20_spill] sm:$0xff]  ;;  %v5536_v16 = vld [vmem:[%s7764_s9 + $0x122] sm:$0xff] }
 0x394   : > { %4959 = vst [vmem:[%s10940_s16 + $0x38] sm:$0xff] %v4943_v42  ;;  %v4942_v39 = vmax.f32 %v4926_v13, 0.0  ;;  %v4929_v37 = vadd.f32 %v5531_v49, %v4913_v1  ;;  %v4912_v46 = vadd.f32 %v10920_v58, %v4889_v54  ;;  %v4661_v31 = vadd.f32 %v7384_v32, %v4467_v6  ;;  %v5535_v49 = vld [vmem:[%s7764_s9 + $0x10a] sm:$0xff] }
 0x395   : > { %v4629_v8 = vpop.f32.mrf.mxu1  ;;  %v4469_v43 = vadd.f32 %v11470_v7, %v4274_v2  ;;  %v4468_v28 = vadd.f32 %v11471_v26, %v4273_v59 }
 0x396   : > { %4958 = vst [vmem:[%s10940_s16 + $0x30] sm:$0xff] %v4942_v39  ;;  %v4945_v35 = vmax.f32 %v4929_v37, 0.0  ;;  %v4928_v33 = vadd.f32 %v5530_v53, %v4912_v46  ;;  %v4660_v50 = vadd.f32 %v4629_v8, %v4466_v34  ;;  %v5534_v53 = vld [vmem:[%s7764_s9 + $0x102] sm:$0xff] }
 0x397   : > { %v7387_v60 = vpop.f32.mrf.mxu1 }
 0x398   : > { %4961 = vst [vmem:[%s10940_s16 + $0x48] sm:$0xff] %v4945_v35  ;;  %v4944_v45 = vmax.f32 %v4928_v33, 0.0  ;;  %v4663_v62 = vadd.f32 %v7387_v60, %v4469_v43  ;;  %v5537_v33 = vld [vmem:[%s7764_s9 + $0x12a] sm:$0xff] }
 0x399   : > { %v4639_v29 = vpop.f32.mrf.mxu1 }
 0x39a   : > { %4960 = vst [vmem:[%s10940_s16 + $0x40] sm:$0xff] %v4944_v45  ;;  %v4662_v51 = vadd.f32 %v4639_v29, %v4468_v28 }
 0x39b   : > { %v7437_v41 = vpop.f32.mrf.mxu1 }
 0x39c   : > { %v4853_v63 = vadd.f32 %v7437_v41, %v4659_v44 }
 0x39d   : > { %v4813_v0 = vpop.f32.mrf.mxu1 }
 0x39e   : > { %v4892_v23 = vmul.f32 %v10906_v21, %v4853_v63  ;;  %v4852_v17 = vadd.f32 %v4813_v0, %v4658_v4 }
 0x39f   : > { %v7440_v48 = vpop.f32.mrf.mxu1 }
 0x3a0   : > { %v4915_v55 = vadd.f32 %v10920_v58, %v4892_v23  ;;  %v4891_v22 = vmul.f32 %v10906_v21, %v4852_v17  ;;  %v4855_v9 = vadd.f32 %v7440_v48, %v4661_v31 }
 0x3a1   : > { %v4823_v14 = vpop.f32.mrf.mxu1 }
 0x3a2   : > { %v4931_v11 = vadd.f32 %v5533_v30, %v4915_v55  ;;  %v4914_v18 = vadd.f32 %v10920_v58, %v4891_v22  ;;  %v4894_v27 = vmul.f32 %v10906_v21, %v4855_v9  ;;  %v4854_v3 = vadd.f32 %v4823_v14, %v4660_v50 }
 0x3a3   : > { %v7443_v20 = vpop.f32.mrf.mxu1 }
 0x3a4   : > { %v4947_v42 = vmax.f32 %v4931_v11, 0.0  ;;  %v4930_v13 = vadd.f32 %v5532_v52, %v4914_v18  ;;  %v4917_v1 = vadd.f32 %v10920_v58, %v4894_v27  ;;  %v4893_v54 = vmul.f32 %v10906_v21, %v4854_v3 }
 0x3a5   : > { %v4857_v32 = vadd.f32 %v7443_v20, %v4663_v62  ;;  %v4833_v12 = vpop.f32.mrf.mxu1 }
 0x3a6   : > { %4963 = vst [vmem:[%s10940_s16 + $0x58] sm:$0xff] %v4947_v42  ;;  %v4946_v39 = vmax.f32 %v4930_v13, 0.0  ;;  %v4933_v37 = vadd.f32 %v5535_v49, %v4917_v1  ;;  %v4916_v46 = vadd.f32 %v10920_v58, %v4893_v54  ;;  %v4856_v8 = vadd.f32 %v4833_v12, %v4662_v51 }
 0x3a7   : > { %v4896_v61 = vmul.f32 %v10906_v21, %v4857_v32 }
 0x3a8   : > { %4962 = vst [vmem:[%s10940_s16 + $0x50] sm:$0xff] %v4946_v39  ;;  %v4949_v57 = vmax.f32 %v4933_v37, 0.0  ;;  %v4932_v35 = vadd.f32 %v5534_v53, %v4916_v46  ;;  %v4895_v60 = vmul.f32 %v10906_v21, %v4856_v8 }
 0x3a9   : > { %v4919_v24 = vadd.f32 %v10920_v58, %v4896_v61 }
 0x3aa   : > { %4965 = vst [vmem:[%s10940_s16 + $0x68] sm:$0xff] %v4949_v57  ;;  %v4948_v45 = vmax.f32 %v4932_v35, 0.0  ;;  %v4918_v47 = vadd.f32 %v10920_v58, %v4895_v60 }
 0x3ab   : > { %v4935_v56 = vadd.f32 %v5537_v33, %v4919_v24 }
 0x3ac   : > { %4964 = vst [vmem:[%s10940_s16 + $0x60] sm:$0xff] %v4948_v45  ;;  %v4934_v29 = vadd.f32 %v5536_v16, %v4918_v47 }
 0x3ad   : > { %v4951_v36 = vmax.f32 %v4935_v56, 0.0 }
 0x3ae   : > { %v4950_v5 = vmax.f32 %v4934_v29, 0.0 }
 0x3af   : > { %4967 = vst [vmem:[%s10940_s16 + $0x78] sm:$0xff] %v4951_v36 }
 0x3b0   : > { %4966 = vst [vmem:[%s10940_s16 + $0x70] sm:$0xff] %v4950_v5 }
 0x3b1 PF: > { %s17_s28 = sadd.s32 1, %s7589_s28   ;;  %s11472_s24 = smov %s7581_s26 }
 0x3b2   : > { %p14_p9 = scmp.ge.s32.totalorder %s17_s28, 6   ;;  %s11473_s25 = smov %s7585_s27 }
 0x3b3   : > { %s11474_s26 = smov %s11477_s29  ;;  %s11475_s27 = smov %s11481_s30 }
 0x3b4   :  { %16 = sbr.rel (!%p14_p9) target bundleno = 3 (0x3), region = 99 }

</bundles_post_ra>
